<compile_context>
chip_gen: v7x
topology: tpu7x:2x2x1
jax: 0.10.0
libtpu: 0.0.40
codegen_flags: <defaults>
</compile_context>

<pallas_src>
import math
from functools import partial

import numpy as np
import jax
import jax.numpy as jnp
from jax.experimental import pallas as pl
from jax.experimental.pallas import tpu as pltpu


# ---------------------------------------------------------------------------
# Chip-dependent tiling / VMEM budget
# ---------------------------------------------------------------------------
def _tpu_vmem_capacity():
    try:
        return int(pltpu.get_tpu_info().vmem_capacity_bytes)
    except Exception:
        return 64 * 1024 * 1024                      # conservative (v7x-sized)


_VMEM_CAP = _tpu_vmem_capacity()
_BIG_VMEM = _VMEM_CAP >= 100 * 1024 * 1024           # v5e/v6e: 128 MiB, v7x: 64 MiB
VMEM_LIMIT = min(96 * 1024 * 1024, (_VMEM_CAP * 3) // 4)
TM_TARGET = 512 if _BIG_VMEM else 256
TN_TARGET = 1024 if _BIG_VMEM else 512
TK_TARGET = 1024 if _BIG_VMEM else 512

_GELU_C = math.sqrt(2.0 / math.pi)


def _pick_tile(dim, target, align):
    """Largest tile <= target that is either the full dim or an aligned divisor."""
    if dim <= target:
        return dim
    t = (target // align) * align
    while t >= align:
        if dim % t == 0:
            return t
        t -= align
    return dim


# ---------------------------------------------------------------------------
# Shared f32 math (used inside kernels AND in the pure-JAX reference)
# ---------------------------------------------------------------------------
def _apply_act(y, act):
    if act == "relu":
        return jnp.maximum(y, 0.0)
    if act == "silu":
        return y * jax.nn.sigmoid(y)
    if act == "gelu_tanh":                            # GELU(approximate='tanh')
        return 0.5 * y * (1.0 + jnp.tanh(_GELU_C * (y + 0.044715 * y * y * y)))
    return y


def _layernorm_f32(x, gamma, beta, eps):
    mu = jnp.mean(x, axis=-1, keepdims=True)
    xc = x - mu
    var = jnp.mean(xc * xc, axis=-1, keepdims=True)
    y = xc * jax.lax.rsqrt(var + eps)
    if gamma is not None:
        y = y * gamma
    if beta is not None:
        y = y + beta
    return y


def _prologue_f32(x, *, norm, pre, gamma=None, beta=None, modpair=None, eps=1e-6):
    """LayerNorm / adaLN-modulate / SiLU prologue in f32."""
    if norm == "ln":
        x = _layernorm_f32(x, gamma, beta, eps)
    elif norm == "mod":
        hdim = x.shape[-1]
        mod = modpair.astype(jnp.float32)
        shift, scale = mod[:, :hdim], mod[:, hdim:]
        x = _layernorm_f32(x, None, None, eps) * (1.0 + scale) + shift
    if pre == "silu":
        x = x * jax.nn.sigmoid(x)
    return x


def _softmax_f32(s):
    s = s - jnp.max(s, axis=-1, keepdims=True)
    p = jnp.exp(s)
    return p / jnp.sum(p, axis=-1, keepdims=True)


def _mha_2d(q_all, k_all, v_all, nh, hd):
    """Multi-head attention on 2-D (tokens, H) operands; q is pre-scaled.
    TODO(synk): pack several heads into one >=128-lane MXU contraction; with
    hd=16 each per-head matmul under-fills the MXU (fine at these sizes)."""
    outs = []
    for h in range(nh):
        sl = slice(h * hd, (h + 1) * hd)
        q = q_all[:, sl].astype(jnp.bfloat16)
        k = k_all[:, sl].astype(jnp.bfloat16)
        v = v_all[:, sl].astype(jnp.bfloat16)
        s = jax.lax.dot_general(q, k, (((1,), (1,)), ((), ())),
                                preferred_element_type=jnp.float32)
        p = _softmax_f32(s)
        outs.append(jnp.dot(p.astype(jnp.bfloat16), v,
                            preferred_element_type=jnp.float32))
    return jnp.concatenate(outs, axis=-1)


# ---------------------------------------------------------------------------
# Fused (norm/modulate/SiLU -> matmul -> bias -> act -> residual) linear
# ---------------------------------------------------------------------------
def _fused_linear_kernel(*refs, nk, norm, pre, act, n_res, eps, cache):
    x_ref, w_ref, b_ref = refs[0], refs[1], refs[2]
    p = 3
    g_ref = be_ref = mod_ref = None
    if norm == "ln":
        g_ref, be_ref = refs[p], refs[p + 1]
        p += 2
    elif norm == "mod":
        mod_ref = refs[p]
        p += 1
    res_refs = refs[p:p + n_res]
    p += n_res
    o_ref = refs[p]
    acc_ref = refs[p + 1]
    xn_ref = refs[p + 2] if cache else None

    k = pl.program_id(2)

    @pl.when(k == 0)
    def _():
        acc_ref[...] = jnp.zeros_like(acc_ref)

    if cache:
        # Full feature row per block (tk == din, nk == 1): compute the prologue
        # once per row tile (j == 0) and reuse the cached bf16 result for every
        # output-column tile j.
        @pl.when(pl.program_id(1) == 0)
        def _():
            x = x_ref[...].astype(jnp.float32)
            g = g_ref[...] if g_ref is not None else None
            be = be_ref[...] if be_ref is not None else None
            mod = mod_ref[...] if mod_ref is not None else None
            xn_ref[...] = _prologue_f32(
                x, norm=norm, pre=pre, gamma=g, beta=be, modpair=mod, eps=eps
            ).astype(jnp.bfloat16)
        x_op = xn_ref[...]
    else:
        x_op = x_ref[...].astype(jnp.bfloat16)

    acc_ref[...] += jnp.dot(x_op, w_ref[...], preferred_element_type=jnp.float32)

    @pl.when(k == nk - 1)
    def _():
        y = _apply_act(acc_ref[...] + b_ref[...], act)
        for r_ref in res_refs:                        # fused residual add(s)
            y = y + r_ref[...].astype(jnp.float32)
        o_ref[...] = y.astype(o_ref.dtype)


def pallas_linear(x, w, b, *, act="none", pre="none", norm="none",
                  gamma=None, beta=None, modpair=None, residuals=(),
                  out_dtype=jnp.bfloat16):
    """y = act(prologue(x) @ w + b) (+ residuals).  x:(R,Din), w:(Din,Dout) bf16."""
    rows, din = x.shape
    dout = w.shape[1]
    cache = (norm != "none") or (pre != "none")

    tm = _pick_tile(rows, TM_TARGET, 8)
    tn = _pick_tile(dout, TN_TARGET, 128)
    if dout // tn == 1 and dout >= 256:
        # guarantee >=2 output-column tiles so a megacore part (v7x) can shard
        # the parallel axes across its two TensorCores even at small row counts
        tn = _pick_tile(dout, max(dout // 2, 128), 128)
    # Fused prologue needs the whole feature row resident (tk == din).  This is
    # only used with din == hidden_size; keep it off very wide inputs on
    # 64-MiB-VMEM parts.
    tk = din if cache else _pick_tile(din, TK_TARGET, 128)
    nk = din // tk
    grid = (rows // tm, dout // tn, nk)

    in_specs = [pl.BlockSpec((tm, tk), lambda i, j, k: (i, k)),
                pl.BlockSpec((tk, tn), lambda i, j, k: (k, j)),
                pl.BlockSpec((1, tn), lambda i, j, k: (0, j))]
    args = [x, w, b]
    if norm == "ln":
        in_specs += [pl.BlockSpec((1, tk), lambda i, j, k: (0, k)),
                     pl.BlockSpec((1, tk), lambda i, j, k: (0, k))]
        args += [gamma, beta]
    elif norm == "mod":
        in_specs += [pl.BlockSpec((tm, 2 * tk), lambda i, j, k: (i, 0))]
        args += [modpair]
    for r in residuals:
        in_specs.append(pl.BlockSpec((tm, tn), lambda i, j, k: (i, j)))
        args.append(r)

    scratch = [pltpu.VMEM((tm, tn), jnp.float32)]
    if cache:
        scratch.append(pltpu.VMEM((tm, tk), jnp.bfloat16))

    # With the cached prologue the j axis must iterate sequentially per core so
    # the j == 0 fill is always observed; otherwise both leading axes parallel.
    dims = (("parallel", "arbitrary", "arbitrary") if cache
            else ("parallel", "parallel", "arbitrary"))

    return pl.pallas_call(
        partial(_fused_linear_kernel, nk=nk, norm=norm, pre=pre, act=act,
                n_res=len(residuals), eps=1e-6, cache=cache),
        out_shape=jax.ShapeDtypeStruct((rows, dout), out_dtype),
        grid=grid,
        in_specs=in_specs,
        out_specs=pl.BlockSpec((tm, tn), lambda i, j, k: (i, j)),
        scratch_shapes=scratch,
        compiler_params=pltpu.CompilerParams(
            dimension_semantics=dims, vmem_limit_bytes=VMEM_LIMIT),
    )(*args)


# ---------------------------------------------------------------------------
# Fused Adaptor: relu(w2 @ relu(w1 @ x + b1) + b2) + pos_embed, per batch
# ---------------------------------------------------------------------------
def _adaptor_kernel(x_ref, w1_ref, b1_ref, w2_ref, b2_ref, pos_ref, o_ref,
                    acc_ref, *, nk):
    k = pl.program_id(1)

    @pl.when(k == 0)
    def _():
        acc_ref[...] = jnp.zeros_like(acc_ref)

    acc_ref[...] += jnp.dot(w1_ref[...], x_ref[...],
                            preferred_element_type=jnp.float32)

    @pl.when(k == nk - 1)
    def _():
        y1 = jnp.maximum(acc_ref[...] + b1_ref[...], 0.0)          # conv1 + ReLU
        y2 = jnp.dot(w2_ref[...], y1.astype(jnp.bfloat16),
                     preferred_element_type=jnp.float32)
        y2 = jnp.maximum(y2 + b2_ref[...], 0.0)                    # conv2 + ReLU
        o_ref[...] = (y2 + pos_ref[...]).astype(o_ref.dtype)


def pallas_adaptor(x, w1, b1, w2, b2, pos, out_dtype=jnp.bfloat16):
    """x:(B,K,H) bf16, w1:(T,K) bf16, w2:(T,T) bf16, pos:(1,T,H) f32 -> (B,T,H)."""
    B, K, H = x.shape
    T = w1.shape[0]
    tk = _pick_tile(K, TK_TARGET, 128)
    nk = K // tk
    return pl.pallas_call(
        partial(_adaptor_kernel, nk=nk),
        out_shape=jax.ShapeDtypeStruct((B, T, H), out_dtype),
        grid=(B, nk),
        in_specs=[
            pl.BlockSpec((None, tk, H), lambda b, k: (b, k, 0)),
            pl.BlockSpec((T, tk), lambda b, k: (0, k)),
            pl.BlockSpec((T, 1), lambda b, k: (0, 0)),
            pl.BlockSpec((T, T), lambda b, k: (0, 0)),
            pl.BlockSpec((T, 1), lambda b, k: (0, 0)),
            pl.BlockSpec((None, T, H), lambda b, k: (0, 0, 0)),
        ],
        out_specs=pl.BlockSpec((None, T, H), lambda b, k: (b, 0, 0)),
        scratch_shapes=[pltpu.VMEM((T, H), jnp.float32)],
        compiler_params=pltpu.CompilerParams(
            dimension_semantics=("parallel", "arbitrary"),
            vmem_limit_bytes=VMEM_LIMIT),
    )(x, w1, b1, w2, b2, pos)


# ---------------------------------------------------------------------------
# Fused self-attention: heads + softmax + out-proj + residual (per batch)
# ---------------------------------------------------------------------------
def _self_attn_kernel(qkv_ref, w_ref, b_ref, res_ref, o_ref, *, nh, hd, hidden):
    qkv = qkv_ref[...]                               # (T, 3H), q already scaled
    o = _mha_2d(qkv[:, :hidden], qkv[:, hidden:2 * hidden],
                qkv[:, 2 * hidden:], nh, hd)
    y = jnp.dot(o.astype(jnp.bfloat16), w_ref[...],
                preferred_element_type=jnp.float32)
    y = y + b_ref[...] + res_ref[...].astype(jnp.float32)
    o_ref[...] = y.astype(o_ref.dtype)


def pallas_self_attention(qkv, proj_w, proj_b, res, *, num_heads,
                          out_dtype=jnp.bfloat16):
    B, T, H3 = qkv.shape
    H = H3 // 3
    return pl.pallas_call(
        partial(_self_attn_kernel, nh=num_heads, hd=H // num_heads, hidden=H),
        out_shape=jax.ShapeDtypeStruct((B, T, H), out_dtype),
        grid=(B,),
        in_specs=[
            pl.BlockSpec((None, T, H3), lambda b: (b, 0, 0)),
            pl.BlockSpec((H, H), lambda b: (0, 0)),
            pl.BlockSpec((1, H), lambda b: (0, 0)),
            pl.BlockSpec((None, T, H), lambda b: (b, 0, 0)),
        ],
        out_specs=pl.BlockSpec((None, T, H), lambda b: (b, 0, 0)),
        compiler_params=pltpu.CompilerParams(
            dimension_semantics=("parallel",), vmem_limit_bytes=VMEM_LIMIT),
    )(qkv, proj_w, proj_b, res)


# ---------------------------------------------------------------------------
# Fused cross-attention: heads + softmax + out-proj + (x, norm2(x)) residuals
# ---------------------------------------------------------------------------
def _cross_attn_kernel(q_ref, k_ref, v_ref, w_ref, b_ref, res_ref, g_ref,
                       be_ref, o_ref, *, nh, hd, eps):
    h = res_ref[...].astype(jnp.float32)
    hn = _layernorm_f32(h, g_ref[...], be_ref[...], eps)   # norm2(x) residual
    o = _mha_2d(q_ref[...], k_ref[...], v_ref[...], nh, hd)
    y = jnp.dot(o.astype(jnp.bfloat16), w_ref[...],
                preferred_element_type=jnp.float32)
    y = y + b_ref[...] + h + hn                     # x + (norm2(x) + attended)
    o_ref[...] = y.astype(o_ref.dtype)


def pallas_cross_attention(q, k, v, out_w, out_b, res, ln_g, ln_b, *,
                           num_heads, out_dtype=jnp.bfloat16):
    B, T, H = q.shape
    M = k.shape[1]
    return pl.pallas_call(
        partial(_cross_attn_kernel, nh=num_heads, hd=H // num_heads, eps=1e-6),
        out_shape=jax.ShapeDtypeStruct((B, T, H), out_dtype),
        grid=(B,),
        in_specs=[
            pl.BlockSpec((None, T, H), lambda b: (b, 0, 0)),
            pl.BlockSpec((None, M, H), lambda b: (b, 0, 0)),
            pl.BlockSpec((None, M, H), lambda b: (b, 0, 0)),
            pl.BlockSpec((H, H), lambda b: (0, 0)),
            pl.BlockSpec((1, H), lambda b: (0, 0)),
            pl.BlockSpec((None, T, H), lambda b: (b, 0, 0)),
            pl.BlockSpec((1, H), lambda b: (0, 0)),
            pl.BlockSpec((1, H), lambda b: (0, 0)),
        ],
        out_specs=pl.BlockSpec((None, T, H), lambda b: (b, 0, 0)),
        compiler_params=pltpu.CompilerParams(
            dimension_semantics=("parallel",), vmem_limit_bytes=VMEM_LIMIT),
    )(q, k, v, out_w, out_b, res, ln_g, ln_b)


# ---------------------------------------------------------------------------
# Pure-JAX reference ops (identical dtypes / casts -> tight cross-check)
# ---------------------------------------------------------------------------
def ref_linear(x, w, b, *, act="none", pre="none", norm="none",
               gamma=None, beta=None, modpair=None, residuals=(),
               out_dtype=jnp.bfloat16):
    xf = _prologue_f32(x.astype(jnp.float32), norm=norm, pre=pre,
                       gamma=gamma, beta=beta, modpair=modpair, eps=1e-6)
    y = jnp.dot(xf.astype(jnp.bfloat16), w,
                preferred_element_type=jnp.float32) + b
    y = _apply_act(y, act)
    for r in residuals:
        y = y + r.astype(jnp.float32)
    return y.astype(out_dtype)


def ref_adaptor(x, w1, b1, w2, b2, pos, out_dtype=jnp.bfloat16):
    y1 = jnp.einsum("tk,bkh->bth", w1, x, preferred_element_type=jnp.float32)
    y1 = jnp.maximum(y1 + b1[None], 0.0)
    y2 = jnp.einsum("ts,bsh->bth", w2, y1.astype(jnp.bfloat16),
                    preferred_element_type=jnp.float32)
    y2 = jnp.maximum(y2 + b2[None], 0.0)
    return (y2 + pos).astype(out_dtype)


def ref_self_attention(qkv, proj_w, proj_b, res, *, num_heads,
                       out_dtype=jnp.bfloat16):
    B, T, H3 = qkv.shape
    H = H3 // 3
    hd = H // num_heads
    o = jax.vmap(lambda z: _mha_2d(z[:, :H], z[:, H:2 * H], z[:, 2 * H:],
                                   num_heads, hd))(qkv)
    y = jnp.dot(o.astype(jnp.bfloat16), proj_w,
                preferred_element_type=jnp.float32)
    y = y + proj_b + res.astype(jnp.float32)
    return y.astype(out_dtype)


def ref_cross_attention(q, k, v, out_w, out_b, res, ln_g, ln_b, *,
                        num_heads, out_dtype=jnp.bfloat16):
    H = q.shape[-1]
    hd = H // num_heads
    h = res.astype(jnp.float32)
    hn = _layernorm_f32(h, ln_g, ln_b, 1e-6)
    o = jax.vmap(lambda qq, kk, vv: _mha_2d(qq, kk, vv, num_heads, hd))(q, k, v)
    y = jnp.dot(o.astype(jnp.bfloat16), out_w,
                preferred_element_type=jnp.float32)
    y = y + out_b + h + hn
    return y.astype(out_dtype)


# ---------------------------------------------------------------------------
# Model
# ---------------------------------------------------------------------------
def get_1d_sincos_pos_embed(embed_dim, length):
    pos_embed = np.zeros((length, embed_dim), dtype=np.float32)
    position = np.arange(0, length, dtype=np.float32)
    div_term = np.exp(np.arange(0, embed_dim, 2, dtype=np.float32)
                      * -(np.log(10000.0) / embed_dim))
    pos_embed[:, 0::2] = np.sin(position[:, None] * div_term)
    pos_embed[:, 1::2] = np.cos(position[:, None] * div_term)
    return pos_embed


def init_params(key, cfg):
    H = cfg["hidden_size"]
    P = cfg["patch_size"]
    C = cfg["in_channels"]
    T = cfg["input_size"] // P
    MH = int(H * cfg["mlp_ratio"])
    OC = cfg["out_channels"]
    CD = cfg["cond_dim"]
    FD = cfg["freq_dim"]
    NH = cfg["num_heads"]
    hd = H // NH
    scale = hd ** -0.5
    keys = iter(jax.random.split(key, 1024))

    # Weights stored pre-transposed (Din, Dout) and cast to bf16 ONCE at init.
    def wmat(din, dout):
        return (0.02 * jax.random.normal(next(keys), (din, dout), jnp.float32)
                ).astype(jnp.bfloat16)

    def bvec(dout):
        return 0.02 * jax.random.normal(next(keys), (1, dout), jnp.float32)

    half = FD // 2
    params = {
        "patch_w": wmat(C * P, H), "patch_b": bvec(H),
        "pos_embed": jnp.asarray(get_1d_sincos_pos_embed(H, T))[None],
        "t_freqs": jnp.exp(-math.log(10000.0)
                           * jnp.arange(half, dtype=jnp.float32) / half),
        "t_w1": wmat(FD, H), "t_b1": bvec(H),
        "t_w2": wmat(H, H), "t_b2": bvec(H),
        # Adaptor 1x1 convs in Conv1d (out_ch, in_ch) layout.
        "c_w1": (0.02 * jax.random.normal(next(keys), (T, CD), jnp.float32)
                 ).astype(jnp.bfloat16),
        "c_b1": 0.02 * jax.random.normal(next(keys), (T, 1), jnp.float32),
        "c_w2": (0.02 * jax.random.normal(next(keys), (T, T), jnp.float32)
                 ).astype(jnp.bfloat16),
        "c_b2": 0.02 * jax.random.normal(next(keys), (T, 1), jnp.float32),
        "blocks": [],
        "final": {"ada_w": wmat(H, 2 * H), "ada_b": bvec(2 * H),
                  "lin_w": wmat(H, P * OC), "lin_b": bvec(P * OC)},
    }
    for _ in range(cfg["depth"]):
        # 1/sqrt(head_dim) folded into the q weights/bias at init (the PyTorch
        # modules apply it to q / to the scores at run time).
        qkv_w = 0.02 * jax.random.normal(next(keys), (H, 3 * H), jnp.float32)
        qkv_w = qkv_w.at[:, :H].multiply(scale)
        q_bias = 0.02 * jax.random.normal(next(keys), (H,), jnp.float32) * scale
        v_bias = 0.02 * jax.random.normal(next(keys), (H,), jnp.float32)
        cq_w = (0.02 * jax.random.normal(next(keys), (H, H), jnp.float32)
                * scale).astype(jnp.bfloat16)
        cq_b = bvec(H) * scale
        params["blocks"].append({
            "ln1_g": jnp.ones((1, H), jnp.float32), "ln1_b": jnp.zeros((1, H), jnp.float32),
            "ln2_g": jnp.ones((1, H), jnp.float32), "ln2_b": jnp.zeros((1, H), jnp.float32),
            "ln3_g": jnp.ones((1, H), jnp.float32), "ln3_b": jnp.zeros((1, H), jnp.float32),
            "attn": {
                "qkv_w": qkv_w.astype(jnp.bfloat16),
                # qkv bias = cat(q_bias*scale, zeros, v_bias), hoisted to init.
                "qkv_bias": jnp.concatenate(
                    [q_bias, jnp.zeros((H,), jnp.float32), v_bias]).reshape(1, 3 * H),
                "proj_w": wmat(H, H), "proj_b": bvec(H),
            },
            # NOTE: CrossAttention.v_proj exists in the PyTorch module but is never
            # used by its forward (K and V both come from k_proj), so it is omitted.
            "cross": {"q_w": cq_w, "q_b": cq_b,
                      "k_w": wmat(H, H), "k_b": bvec(H),
                      "out_w": wmat(H, H), "out_b": bvec(H)},
            "mlp": {"fc1_w": wmat(H, MH), "fc1_b": bvec(MH),
                    "fc2_w": wmat(MH, H), "fc2_b": bvec(H)},
        })
    return params


def dit_forward(x, t, c, params, cfg, ops):
    linear = ops["linear"]
    adaptor = ops["adaptor"]
    self_attn = ops["self_attn"]
    cross_attn = ops["cross_attn"]

    B = x.shape[0]
    C = x.shape[1]
    H = cfg["hidden_size"]
    P = cfg["patch_size"]
    NH = cfg["num_heads"]
    T = cfg["input_size"] // P
    OC = cfg["out_channels"]

    # --- PatchEmbed1D: Conv1d(k=P, stride=P) == matmul over unfolded patches
    xp = x.reshape(B, C, T, P).transpose(0, 2, 1, 3).reshape(B * T, C * P)
    xe = linear(xp, params["patch_w"], params["patch_b"])            # (B*T,H) bf16
    h = ((xe.reshape(B, T, H).astype(jnp.float32) + params["pos_embed"])
         .astype(jnp.bfloat16).reshape(B * T, H))

    # --- TimestepEmbedder (sinusoid frequency table precomputed at init)
    args = t.astype(jnp.float32)[:, None] * params["t_freqs"][None]
    t_freq = jnp.concatenate([jnp.cos(args), jnp.sin(args)], axis=-1)
    te = linear(t_freq, params["t_w1"], params["t_b1"], act="silu")
    te = linear(te, params["t_w2"], params["t_b2"])                  # (B,H) bf16

    # --- Adaptor: both 1x1 convs + pos_embed fused into one kernel
    ce = adaptor(c.astype(jnp.bfloat16), params["c_w1"], params["c_b1"],
                 params["c_w2"], params["c_b2"], params["pos_embed"])  # (B,T,H)
    cond = (te[:, None, :].astype(jnp.float32)
            + ce.astype(jnp.float32)).astype(jnp.bfloat16)             # all_conditioning
    cond2d = cond.reshape(B * T, H)

    for bp in params["blocks"]:
        # ---- self-attention: LN1 fused into QKV proj; heads, softmax, out-proj
        #      and the residual all fused into one attention kernel.
        ap = bp["attn"]
        qkv = linear(h, ap["qkv_w"], ap["qkv_bias"],
                     norm="ln", gamma=bp["ln1_g"], beta=bp["ln1_b"])
        h = self_attn(qkv.reshape(B, T, 3 * H), ap["proj_w"], ap["proj_b"],
                      h.reshape(B, T, H), num_heads=NH).reshape(B * T, H)

        # ---- cross-attention: LN2 fused into the q proj; K = even tokens of
        #      k_proj(cond), V = odd tokens (exactly the PyTorch reshape); the
        #      out-proj plus the x and norm2(x) residuals are fused in-kernel.
        cp = bp["cross"]
        q = linear(h, cp["q_w"], cp["q_b"],
                   norm="ln", gamma=bp["ln2_g"], beta=bp["ln2_b"])
        kv = linear(cond2d, cp["k_w"], cp["k_b"]).reshape(B, T // 2, 2, H)
        h = cross_attn(q.reshape(B, T, H), kv[:, :, 0], kv[:, :, 1],
                       cp["out_w"], cp["out_b"], h.reshape(B, T, H),
                       bp["ln2_g"], bp["ln2_b"], num_heads=NH).reshape(B * T, H)

        # ---- MLP: LN3 fused into fc1, residual fused into fc2
        mp = bp["mlp"]
        m = linear(h, mp["fc1_w"], mp["fc1_b"], act="gelu_tanh",
                   norm="ln", gamma=bp["ln3_g"], beta=bp["ln3_b"])
        h = linear(m, mp["fc2_w"], mp["fc2_b"], residuals=(h,))

    # --- FinalLayer: per-token adaLN from ce (the PyTorch module passes
    #     c = c_embedder(c) + pos_embed); modulate fused into the output linear
    #     and the (shift|scale) pair sliced inside the kernel.
    fp = params["final"]
    mod = linear(ce.reshape(B * T, H), fp["ada_w"], fp["ada_b"], pre="silu")
    y = linear(h, fp["lin_w"], fp["lin_b"], norm="mod", modpair=mod,
               out_dtype=jnp.float32)

    # --- unpatchify: (B, T, P*OC) -> (B, OC, T*P)
    return (y.reshape(B, T, P, OC).transpose(0, 3, 1, 2)
            .reshape(B, OC, T * P))


# TODO(synk): dropout layers (attn/proj/resid) are identity in eval mode and are
# omitted; training-mode stochastic dropout is not implemented.

PALLAS_OPS = dict(linear=pallas_linear, adaptor=pallas_adaptor,
                  self_attn=pallas_self_attention,
                  cross_attn=pallas_cross_attention)
REF_OPS = dict(linear=ref_linear, adaptor=ref_adaptor,
               self_attn=ref_self_attention, cross_attn=ref_cross_attention)


if __name__ == "__main__":
    cfg = dict(input_size=16, patch_size=2, in_channels=4, hidden_size=64,
               depth=2, num_heads=4, mlp_ratio=4.0, freq_dim=256,
               cond_dim=2560)                       # DiT hardcodes Adaptor(2560)
    cfg["out_channels"] = cfg["in_channels"] * 2    # learn_sigma=True

    key = jax.random.PRNGKey(0)
    kp, kx, kt, kc = jax.random.split(key, 4)
    params = init_params(kp, cfg)

    B = 2
    x = jax.random.normal(kx, (B, cfg["in_channels"], cfg["input_size"]), jnp.float32)
    t = jax.random.uniform(kt, (B,), jnp.float32, 0.0, 1000.0)
    c = jax.random.normal(kc, (B, cfg["cond_dim"], cfg["hidden_size"]), jnp.float32)

    fwd = jax.jit(lambda x, t, c, p: dit_forward(x, t, c, p, cfg, PALLAS_OPS))
    out = jax.block_until_ready(fwd(x, t, c, params))

    assert out.shape == (B, cfg["out_channels"], cfg["input_size"]), out.shape
    assert bool(jnp.all(jnp.isfinite(out)))

    ref_fwd = jax.jit(lambda x, t, c, p: dit_forward(x, t, c, p, cfg, REF_OPS))
    ref = jax.block_until_ready(ref_fwd(x, t, c, params))
    rel_err = float(jnp.max(jnp.abs(out - ref)) / (jnp.max(jnp.abs(ref)) + 1e-6))
    # Both paths share dtypes/casts; remaining budget covers MXU vs XLA
    # accumulation order through bf16-stored intermediates.
    assert rel_err < 2e-2, f"Pallas vs reference mismatch: rel_err={rel_err}"

    print("KERNEL_OK")
</pallas_src>

<mosaic_0001>
module attributes {stable_mosaic.version = 11 : i64} {
  func.func @_fused_linear_kernel(%arg0: i32, %arg1: i32, %arg2: i32, %arg3: memref<2x256xf32, #tpu.memory_space<vmem>>, %arg4: memref<256x64xbf16, #tpu.memory_space<vmem>>, %arg5: memref<1x64xf32, #tpu.memory_space<vmem>>, %arg6: memref<2x64xbf16, #tpu.memory_space<vmem>>, %arg7: memref<2x64xf32, #tpu.memory_space<vmem>>) attributes {dimension_semantics = [#tpu.dimension_semantics<parallel>, #tpu.dimension_semantics<parallel>, #tpu.dimension_semantics<arbitrary>], iteration_bounds = array<i64: 1, 1, 1>, scalar_prefetch = 0 : i64, scratch_operands = 1 : i64, tpu.core_type = #tpu.core_type<tc>, window_params = [{transform_indices = @transform_0, window_bounds = array<i64: 2, 256>}, {transform_indices = @transform_1, window_bounds = array<i64: 256, 64>}, {transform_indices = @transform_2, window_bounds = array<i64: 1, 64>}, {transform_indices = @transform_3, window_bounds = array<i64: 2, 64>}]} {
    %c0_i32 = arith.constant 0 : i32
    %0 = arith.cmpi eq, %arg2, %c0_i32 : i32
    %1 = arith.extui %0 : i1 to i32
    %c0_i32_0 = arith.constant 0 : i32
    %2 = arith.cmpi ne, %1, %c0_i32_0 : i32
    scf.if %2 {
      %cst_10 = arith.constant 0.000000e+00 : f32
      %13 = vector.broadcast %cst_10 : f32 to vector<2x64xf32>
      %c0_11 = arith.constant 0 : index
      %c0_12 = arith.constant 0 : index
      %14 = vector.load %arg7[%c0_11, %c0_12] : memref<2x64xf32, #tpu.memory_space<vmem>>, vector<2x64xf32>
      tpu.vector_store %arg7[%c0_11, %c0_12], %13 {strides = array<i32>} : memref<2x64xf32, #tpu.memory_space<vmem>>, vector<2x64xf32>,
    } else {
    }
    %c0 = arith.constant 0 : index
    %c0_1 = arith.constant 0 : index
    %3 = vector.load %arg3[%c0, %c0_1] : memref<2x256xf32, #tpu.memory_space<vmem>>, vector<2x256xf32>
    %4 = arith.truncf %3 : vector<2x256xf32> to vector<2x256xbf16>
    %c0_2 = arith.constant 0 : index
    %c0_3 = arith.constant 0 : index
    %5 = vector.load %arg7[%c0_2, %c0_3] : memref<2x64xf32, #tpu.memory_space<vmem>>, vector<2x64xf32>
    %c0_4 = arith.constant 0 : index
    %c0_5 = arith.constant 0 : index
    %6 = vector.load %arg4[%c0_4, %c0_5] : memref<256x64xbf16, #tpu.memory_space<vmem>>, vector<256x64xbf16>
    %cst = arith.constant dense<0.000000e+00> : vector<2x64xf32>
    %7 = tpu.matmul %4, %6, %cst {dimension_numbers = #tpu.dot_dimension_numbers<[1], [0], [0], [1], [0, 0, 1, 1], [], []>} : vector<2x256xbf16>, vector<256x64xbf16>, vector<2x64xf32> -> vector<2x64xf32>
    %8 = arith.addf %5, %7 : vector<2x64xf32>
    %c0_6 = arith.constant 0 : index
    %c0_7 = arith.constant 0 : index
    %9 = vector.load %arg7[%c0_6, %c0_7] : memref<2x64xf32, #tpu.memory_space<vmem>>, vector<2x64xf32>
    tpu.vector_store %arg7[%c0_6, %c0_7], %8 {strides = array<i32>} : memref<2x64xf32, #tpu.memory_space<vmem>>, vector<2x64xf32>,
    %c0_i32_8 = arith.constant 0 : i32
    %10 = arith.cmpi eq, %arg2, %c0_i32_8 : i32
    %11 = arith.extui %10 : i1 to i32
    %c0_i32_9 = arith.constant 0 : i32
    %12 = arith.cmpi ne, %11, %c0_i32_9 : i32
    scf.if %12 {
      %c0_10 = arith.constant 0 : index
      %c0_11 = arith.constant 0 : index
      %13 = vector.load %arg7[%c0_10, %c0_11] : memref<2x64xf32, #tpu.memory_space<vmem>>, vector<2x64xf32>
      %c0_12 = arith.constant 0 : index
      %c0_13 = arith.constant 0 : index
      %14 = vector.load %arg5[%c0_12, %c0_13] : memref<1x64xf32, #tpu.memory_space<vmem>>, vector<1x64xf32>
      %15 = vector.broadcast %14 : vector<1x64xf32> to vector<2x64xf32>
      %16 = arith.addf %13, %15 : vector<2x64xf32>
      %17 = arith.negf %16 : vector<2x64xf32>
      %18 = math.exp %17 : vector<2x64xf32>
      %cst_14 = arith.constant 1.000000e+00 : f32
      %19 = vector.broadcast %cst_14 : f32 to vector<2x64xf32>
      %20 = arith.addf %19, %18 : vector<2x64xf32>
      %21 = arith.divf %19, %20 : vector<2x64xf32>
      %22 = arith.mulf %16, %21 : vector<2x64xf32>
      %23 = arith.truncf %22 : vector<2x64xf32> to vector<2x64xbf16>
      %c0_15 = arith.constant 0 : index
      %c0_16 = arith.constant 0 : index
      %24 = vector.load %arg6[%c0_15, %c0_16] : memref<2x64xbf16, #tpu.memory_space<vmem>>, vector<2x64xbf16>
      tpu.vector_store %arg6[%c0_15, %c0_16], %23 {strides = array<i32>} : memref<2x64xbf16, #tpu.memory_space<vmem>>, vector<2x64xbf16>,
    } else {
    }
    return
  }
  func.func @transform_0(%arg0: i32, %arg1: i32, %arg2: i32) -> (i32, i32) {
    %c0_i32 = arith.constant 0 : i32
    return %arg0, %arg2 : i32, i32
  }
  func.func @transform_1(%arg0: i32, %arg1: i32, %arg2: i32) -> (i32, i32) {
    %c0_i32 = arith.constant 0 : i32
    return %arg2, %arg1 : i32, i32
  }
  func.func @transform_2(%arg0: i32, %arg1: i32, %arg2: i32) -> (i32, i32) {
    %c0_i32 = arith.constant 0 : i32
    %c0_i32_0 = arith.constant 0 : i32
    return %c0_i32, %arg1 : i32, i32
  }
  func.func @transform_3(%arg0: i32, %arg1: i32, %arg2: i32) -> (i32, i32) {
    %c0_i32 = arith.constant 0 : i32
    return %arg0, %arg1 : i32, i32
  }
}

module attributes {stable_mosaic.version = 11 : i64} {
  func.func @_fused_linear_kernel(%arg0: i32, %arg1: i32, %arg2: i32, %arg3: memref<2x64xbf16, #tpu.memory_space<vmem>>, %arg4: memref<64x64xbf16, #tpu.memory_space<vmem>>, %arg5: memref<1x64xf32, #tpu.memory_space<vmem>>, %arg6: memref<2x64xbf16, #tpu.memory_space<vmem>>, %arg7: memref<2x64xf32, #tpu.memory_space<vmem>>) attributes {dimension_semantics = [#tpu.dimension_semantics<parallel>, #tpu.dimension_semantics<parallel>, #tpu.dimension_semantics<arbitrary>], iteration_bounds = array<i64: 1, 1, 1>, scalar_prefetch = 0 : i64, scratch_operands = 1 : i64, tpu.core_type = #tpu.core_type<tc>, window_params = [{transform_indices = @transform_0, window_bounds = array<i64: 2, 64>}, {transform_indices = @transform_1, window_bounds = array<i64: 64, 64>}, {transform_indices = @transform_2, window_bounds = array<i64: 1, 64>}, {transform_indices = @transform_3, window_bounds = array<i64: 2, 64>}]} {
    %c0_i32 = arith.constant 0 : i32
    %0 = arith.cmpi eq, %arg2, %c0_i32 : i32
    %1 = arith.extui %0 : i1 to i32
    %c0_i32_0 = arith.constant 0 : i32
    %2 = arith.cmpi ne, %1, %c0_i32_0 : i32
    scf.if %2 {
      %cst_10 = arith.constant 0.000000e+00 : f32
      %12 = vector.broadcast %cst_10 : f32 to vector<2x64xf32>
      %c0_11 = arith.constant 0 : index
      %c0_12 = arith.constant 0 : index
      %13 = vector.load %arg7[%c0_11, %c0_12] : memref<2x64xf32, #tpu.memory_space<vmem>>, vector<2x64xf32>
      tpu.vector_store %arg7[%c0_11, %c0_12], %12 {strides = array<i32>} : memref<2x64xf32, #tpu.memory_space<vmem>>, vector<2x64xf32>,
    } else {
    }
    %c0 = arith.constant 0 : index
    %c0_1 = arith.constant 0 : index
    %3 = vector.load %arg3[%c0, %c0_1] : memref<2x64xbf16, #tpu.memory_space<vmem>>, vector<2x64xbf16>
    %c0_2 = arith.constant 0 : index
    %c0_3 = arith.constant 0 : index
    %4 = vector.load %arg7[%c0_2, %c0_3] : memref<2x64xf32, #tpu.memory_space<vmem>>, vector<2x64xf32>
    %c0_4 = arith.constant 0 : index
    %c0_5 = arith.constant 0 : index
    %5 = vector.load %arg4[%c0_4, %c0_5] : memref<64x64xbf16, #tpu.memory_space<vmem>>, vector<64x64xbf16>
    %cst = arith.constant dense<0.000000e+00> : vector<2x64xf32>
    %6 = tpu.matmul %3, %5, %cst {dimension_numbers = #tpu.dot_dimension_numbers<[1], [0], [0], [1], [0, 0, 1, 1], [], []>} : vector<2x64xbf16>, vector<64x64xbf16>, vector<2x64xf32> -> vector<2x64xf32>
    %7 = arith.addf %4, %6 : vector<2x64xf32>
    %c0_6 = arith.constant 0 : index
    %c0_7 = arith.constant 0 : index
    %8 = vector.load %arg7[%c0_6, %c0_7] : memref<2x64xf32, #tpu.memory_space<vmem>>, vector<2x64xf32>
    tpu.vector_store %arg7[%c0_6, %c0_7], %7 {strides = array<i32>} : memref<2x64xf32, #tpu.memory_space<vmem>>, vector<2x64xf32>,
    %c0_i32_8 = arith.constant 0 : i32
    %9 = arith.cmpi eq, %arg2, %c0_i32_8 : i32
    %10 = arith.extui %9 : i1 to i32
    %c0_i32_9 = arith.constant 0 : i32
    %11 = arith.cmpi ne, %10, %c0_i32_9 : i32
    scf.if %11 {
      %c0_10 = arith.constant 0 : index
      %c0_11 = arith.constant 0 : index
      %12 = vector.load %arg7[%c0_10, %c0_11] : memref<2x64xf32, #tpu.memory_space<vmem>>, vector<2x64xf32>
      %c0_12 = arith.constant 0 : index
      %c0_13 = arith.constant 0 : index
      %13 = vector.load %arg5[%c0_12, %c0_13] : memref<1x64xf32, #tpu.memory_space<vmem>>, vector<1x64xf32>
      %14 = vector.broadcast %13 : vector<1x64xf32> to vector<2x64xf32>
      %15 = arith.addf %12, %14 : vector<2x64xf32>
      %16 = arith.truncf %15 : vector<2x64xf32> to vector<2x64xbf16>
      %c0_14 = arith.constant 0 : index
      %c0_15 = arith.constant 0 : index
      %17 = vector.load %arg6[%c0_14, %c0_15] : memref<2x64xbf16, #tpu.memory_space<vmem>>, vector<2x64xbf16>
      tpu.vector_store %arg6[%c0_14, %c0_15], %16 {strides = array<i32>} : memref<2x64xbf16, #tpu.memory_space<vmem>>, vector<2x64xbf16>,
    } else {
    }
    return
  }
  func.func @transform_0(%arg0: i32, %arg1: i32, %arg2: i32) -> (i32, i32) {
    %c0_i32 = arith.constant 0 : i32
    return %arg0, %arg2 : i32, i32
  }
  func.func @transform_1(%arg0: i32, %arg1: i32, %arg2: i32) -> (i32, i32) {
    %c0_i32 = arith.constant 0 : i32
    return %arg2, %arg1 : i32, i32
  }
  func.func @transform_2(%arg0: i32, %arg1: i32, %arg2: i32) -> (i32, i32) {
    %c0_i32 = arith.constant 0 : i32
    %c0_i32_0 = arith.constant 0 : i32
    return %c0_i32, %arg1 : i32, i32
  }
  func.func @transform_3(%arg0: i32, %arg1: i32, %arg2: i32) -> (i32, i32) {
    %c0_i32 = arith.constant 0 : i32
    return %arg0, %arg1 : i32, i32
  }
}

module attributes {stable_mosaic.version = 11 : i64} {
  func.func @_adaptor_kernel(%arg0: i32, %arg1: i32, %arg2: memref<1x512x64xbf16, #tpu.memory_space<vmem>>, %arg3: memref<8x512xbf16, #tpu.memory_space<vmem>>, %arg4: memref<8x1xf32, #tpu.memory_space<vmem>>, %arg5: memref<8x8xbf16, #tpu.memory_space<vmem>>, %arg6: memref<8x1xf32, #tpu.memory_space<vmem>>, %arg7: memref<1x8x64xf32, #tpu.memory_space<vmem>>, %arg8: memref<1x8x64xbf16, #tpu.memory_space<vmem>>, %arg9: memref<8x64xf32, #tpu.memory_space<vmem>>) attributes {dimension_semantics = [#tpu.dimension_semantics<parallel>, #tpu.dimension_semantics<arbitrary>], iteration_bounds = array<i64: 2, 5>, scalar_prefetch = 0 : i64, scratch_operands = 1 : i64, tpu.core_type = #tpu.core_type<tc>, window_params = [{transform_indices = @transform_0, window_bounds = array<i64: 1, 512, 64>}, {transform_indices = @transform_1, window_bounds = array<i64: 8, 512>}, {pipeline_mode = #tpu.pipeline_mode<synchronous>, transform_indices = @transform_2, window_bounds = array<i64: 8, 1>}, {pipeline_mode = #tpu.pipeline_mode<synchronous>, transform_indices = @transform_3, window_bounds = array<i64: 8, 8>}, {pipeline_mode = #tpu.pipeline_mode<synchronous>, transform_indices = @transform_4, window_bounds = array<i64: 8, 1>}, {pipeline_mode = #tpu.pipeline_mode<synchronous>, transform_indices = @transform_5, window_bounds = array<i64: 1, 8, 64>}, {transform_indices = @transform_6, window_bounds = array<i64: 1, 8, 64>}]} {
    %c0_i32 = arith.constant 0 : i32
    %0 = arith.cmpi eq, %arg1, %c0_i32 : i32
    %1 = arith.extui %0 : i1 to i32
    %c0_i32_0 = arith.constant 0 : i32
    %2 = arith.cmpi ne, %1, %c0_i32_0 : i32
    scf.if %2 {
      %cst_10 = arith.constant 0.000000e+00 : f32
      %13 = vector.broadcast %cst_10 : f32 to vector<8x64xf32>
      %c0_11 = arith.constant 0 : index
      %c0_12 = arith.constant 0 : index
      %14 = vector.load %arg9[%c0_11, %c0_12] : memref<8x64xf32, #tpu.memory_space<vmem>>, vector<8x64xf32>
      tpu.vector_store %arg9[%c0_11, %c0_12], %13 {strides = array<i32>} : memref<8x64xf32, #tpu.memory_space<vmem>>, vector<8x64xf32>,
    } else {
    }
    %c0 = arith.constant 0 : index
    %c0_1 = arith.constant 0 : index
    %3 = vector.load %arg9[%c0, %c0_1] : memref<8x64xf32, #tpu.memory_space<vmem>>, vector<8x64xf32>
    %c0_2 = arith.constant 0 : index
    %c0_3 = arith.constant 0 : index
    %4 = vector.load %arg3[%c0_2, %c0_3] : memref<8x512xbf16, #tpu.memory_space<vmem>>, vector<8x512xbf16>
    %c0_4 = arith.constant 0 : index
    %c0_5 = arith.constant 0 : index
    %c0_6 = arith.constant 0 : index
    %5 = vector.load %arg2[%c0_4, %c0_5, %c0_6] : memref<1x512x64xbf16, #tpu.memory_space<vmem>>, vector<1x512x64xbf16>
    %6 = vector.shape_cast %5 : vector<1x512x64xbf16> to vector<512x64xbf16>
    %cst = arith.constant dense<0.000000e+00> : vector<8x64xf32>
    %7 = tpu.matmul %4, %6, %cst {dimension_numbers = #tpu.dot_dimension_numbers<[1], [0], [0], [1], [0, 0, 1, 1], [], []>} : vector<8x512xbf16>, vector<512x64xbf16>, vector<8x64xf32> -> vector<8x64xf32>
    %8 = arith.addf %3, %7 : vector<8x64xf32>
    %c0_7 = arith.constant 0 : index
    %c0_8 = arith.constant 0 : index
    %9 = vector.load %arg9[%c0_7, %c0_8] : memref<8x64xf32, #tpu.memory_space<vmem>>, vector<8x64xf32>
    tpu.vector_store %arg9[%c0_7, %c0_8], %8 {strides = array<i32>} : memref<8x64xf32, #tpu.memory_space<vmem>>, vector<8x64xf32>,
    %c4_i32 = arith.constant 4 : i32
    %10 = arith.cmpi eq, %arg1, %c4_i32 : i32
    %11 = arith.extui %10 : i1 to i32
    %c0_i32_9 = arith.constant 0 : i32
    %12 = arith.cmpi ne, %11, %c0_i32_9 : i32
    scf.if %12 {
      %c0_10 = arith.constant 0 : index
      %c0_11 = arith.constant 0 : index
      %13 = vector.load %arg9[%c0_10, %c0_11] : memref<8x64xf32, #tpu.memory_space<vmem>>, vector<8x64xf32>
      %c0_12 = arith.constant 0 : index
      %c0_13 = arith.constant 0 : index
      %14 = vector.load %arg4[%c0_12, %c0_13] : memref<8x1xf32, #tpu.memory_space<vmem>>, vector<8x1xf32>
      %15 = vector.broadcast %14 : vector<8x1xf32> to vector<8x64xf32>
      %16 = arith.addf %13, %15 : vector<8x64xf32>
      %cst_14 = arith.constant 0.000000e+00 : f32
      %17 = vector.broadcast %cst_14 : f32 to vector<8x64xf32>
      %18 = arith.maximumf %16, %17 : vector<8x64xf32>
      %c0_15 = arith.constant 0 : index
      %c0_16 = arith.constant 0 : index
      %19 = vector.load %arg5[%c0_15, %c0_16] : memref<8x8xbf16, #tpu.memory_space<vmem>>, vector<8x8xbf16>
      %20 = arith.truncf %18 : vector<8x64xf32> to vector<8x64xbf16>
      %cst_17 = arith.constant dense<0.000000e+00> : vector<8x64xf32>
      %21 = tpu.matmul %19, %20, %cst_17 {dimension_numbers = #tpu.dot_dimension_numbers<[1], [0], [0], [1], [0, 0, 1, 1], [], []>} : vector<8x8xbf16>, vector<8x64xbf16>, vector<8x64xf32> -> vector<8x64xf32>
      %c0_18 = arith.constant 0 : index
      %c0_19 = arith.constant 0 : index
      %22 = vector.load %arg6[%c0_18, %c0_19] : memref<8x1xf32, #tpu.memory_space<vmem>>, vector<8x1xf32>
      %23 = vector.broadcast %22 : vector<8x1xf32> to vector<8x64xf32>
      %24 = arith.addf %21, %23 : vector<8x64xf32>
      %cst_20 = arith.constant 0.000000e+00 : f32
      %25 = vector.broadcast %cst_20 : f32 to vector<8x64xf32>
      %26 = arith.maximumf %24, %25 : vector<8x64xf32>
      %c0_21 = arith.constant 0 : index
      %c0_22 = arith.constant 0 : index
      %c0_23 = arith.constant 0 : index
      %27 = vector.load %arg7[%c0_21, %c0_22, %c0_23] : memref<1x8x64xf32, #tpu.memory_space<vmem>>, vector<1x8x64xf32>
      %28 = vector.shape_cast %27 : vector<1x8x64xf32> to vector<8x64xf32>
      %29 = arith.addf %26, %28 : vector<8x64xf32>
      %30 = arith.truncf %29 : vector<8x64xf32> to vector<8x64xbf16>
      %c0_24 = arith.constant 0 : index
      %c0_25 = arith.constant 0 : index
      %c0_26 = arith.constant 0 : index
      %31 = vector.load %arg8[%c0_24, %c0_25, %c0_26] : memref<1x8x64xbf16, #tpu.memory_space<vmem>>, vector<1x8x64xbf16>
      %32 = vector.shape_cast %31 : vector<1x8x64xbf16> to vector<8x64xbf16>
      %33 = vector.shape_cast %30 : vector<8x64xbf16> to vector<1x8x64xbf16>
      tpu.vector_store %arg8[%c0_24, %c0_25, %c0_26], %33 {strides = array<i32>} : memref<1x8x64xbf16, #tpu.memory_space<vmem>>, vector<1x8x64xbf16>,
    } else {
    }
    return
  }
  func.func @transform_0(%arg0: i32, %arg1: i32) -> (i32, i32, i32) {
    %c0_i32 = arith.constant 0 : i32
    %c0_i32_0 = arith.constant 0 : i32
    return %arg0, %arg1, %c0_i32 : i32, i32, i32
  }
  func.func @transform_1(%arg0: i32, %arg1: i32) -> (i32, i32) {
    %c0_i32 = arith.constant 0 : i32
    %c0_i32_0 = arith.constant 0 : i32
    return %c0_i32, %arg1 : i32, i32
  }
  func.func @transform_2(%arg0: i32, %arg1: i32) -> (i32, i32) {
    %c0_i32 = arith.constant 0 : i32
    %c0_i32_0 = arith.constant 0 : i32
    %c0_i32_1 = arith.constant 0 : i32
    return %c0_i32, %c0_i32_0 : i32, i32
  }
  func.func @transform_3(%arg0: i32, %arg1: i32) -> (i32, i32) {
    %c0_i32 = arith.constant 0 : i32
    %c0_i32_0 = arith.constant 0 : i32
    %c0_i32_1 = arith.constant 0 : i32
    return %c0_i32, %c0_i32_0 : i32, i32
  }
  func.func @transform_4(%arg0: i32, %arg1: i32) -> (i32, i32) {
    %c0_i32 = arith.constant 0 : i32
    %c0_i32_0 = arith.constant 0 : i32
    %c0_i32_1 = arith.constant 0 : i32
    return %c0_i32, %c0_i32_0 : i32, i32
  }
  func.func @transform_5(%arg0: i32, %arg1: i32) -> (i32, i32, i32) {
    %c0_i32 = arith.constant 0 : i32
    %c0_i32_0 = arith.constant 0 : i32
    %c0_i32_1 = arith.constant 0 : i32
    %c0_i32_2 = arith.constant 0 : i32
    return %c0_i32, %c0_i32_0, %c0_i32_1 : i32, i32, i32
  }
  func.func @transform_6(%arg0: i32, %arg1: i32) -> (i32, i32, i32) {
    %c0_i32 = arith.constant 0 : i32
    %c0_i32_0 = arith.constant 0 : i32
    %c0_i32_1 = arith.constant 0 : i32
    return %arg0, %c0_i32, %c0_i32_0 : i32, i32, i32
  }
}

module attributes {stable_mosaic.version = 11 : i64} {
  func.func @_fused_linear_kernel(%arg0: i32, %arg1: i32, %arg2: i32, %arg3: memref<16x64xbf16, #tpu.memory_space<vmem>>, %arg4: memref<64x64xbf16, #tpu.memory_space<vmem>>, %arg5: memref<1x64xf32, #tpu.memory_space<vmem>>, %arg6: memref<16x64xbf16, #tpu.memory_space<vmem>>, %arg7: memref<16x64xf32, #tpu.memory_space<vmem>>) attributes {dimension_semantics = [#tpu.dimension_semantics<parallel>, #tpu.dimension_semantics<parallel>, #tpu.dimension_semantics<arbitrary>], iteration_bounds = array<i64: 1, 1, 1>, scalar_prefetch = 0 : i64, scratch_operands = 1 : i64, tpu.core_type = #tpu.core_type<tc>, window_params = [{transform_indices = @transform_0, window_bounds = array<i64: 16, 64>}, {transform_indices = @transform_1, window_bounds = array<i64: 64, 64>}, {transform_indices = @transform_2, window_bounds = array<i64: 1, 64>}, {transform_indices = @transform_3, window_bounds = array<i64: 16, 64>}]} {
    %c0_i32 = arith.constant 0 : i32
    %0 = arith.cmpi eq, %arg2, %c0_i32 : i32
    %1 = arith.extui %0 : i1 to i32
    %c0_i32_0 = arith.constant 0 : i32
    %2 = arith.cmpi ne, %1, %c0_i32_0 : i32
    scf.if %2 {
      %cst_10 = arith.constant 0.000000e+00 : f32
      %12 = vector.broadcast %cst_10 : f32 to vector<16x64xf32>
      %c0_11 = arith.constant 0 : index
      %c0_12 = arith.constant 0 : index
      %13 = vector.load %arg7[%c0_11, %c0_12] : memref<16x64xf32, #tpu.memory_space<vmem>>, vector<16x64xf32>
      tpu.vector_store %arg7[%c0_11, %c0_12], %12 {strides = array<i32>} : memref<16x64xf32, #tpu.memory_space<vmem>>, vector<16x64xf32>,
    } else {
    }
    %c0 = arith.constant 0 : index
    %c0_1 = arith.constant 0 : index
    %3 = vector.load %arg3[%c0, %c0_1] : memref<16x64xbf16, #tpu.memory_space<vmem>>, vector<16x64xbf16>
    %c0_2 = arith.constant 0 : index
    %c0_3 = arith.constant 0 : index
    %4 = vector.load %arg7[%c0_2, %c0_3] : memref<16x64xf32, #tpu.memory_space<vmem>>, vector<16x64xf32>
    %c0_4 = arith.constant 0 : index
    %c0_5 = arith.constant 0 : index
    %5 = vector.load %arg4[%c0_4, %c0_5] : memref<64x64xbf16, #tpu.memory_space<vmem>>, vector<64x64xbf16>
    %cst = arith.constant dense<0.000000e+00> : vector<16x64xf32>
    %6 = tpu.matmul %3, %5, %cst {dimension_numbers = #tpu.dot_dimension_numbers<[1], [0], [0], [1], [0, 0, 1, 1], [], []>} : vector<16x64xbf16>, vector<64x64xbf16>, vector<16x64xf32> -> vector<16x64xf32>
    %7 = arith.addf %4, %6 : vector<16x64xf32>
    %c0_6 = arith.constant 0 : index
    %c0_7 = arith.constant 0 : index
    %8 = vector.load %arg7[%c0_6, %c0_7] : memref<16x64xf32, #tpu.memory_space<vmem>>, vector<16x64xf32>
    tpu.vector_store %arg7[%c0_6, %c0_7], %7 {strides = array<i32>} : memref<16x64xf32, #tpu.memory_space<vmem>>, vector<16x64xf32>,
    %c0_i32_8 = arith.constant 0 : i32
    %9 = arith.cmpi eq, %arg2, %c0_i32_8 : i32
    %10 = arith.extui %9 : i1 to i32
    %c0_i32_9 = arith.constant 0 : i32
    %11 = arith.cmpi ne, %10, %c0_i32_9 : i32
    scf.if %11 {
      %c0_10 = arith.constant 0 : index
      %c0_11 = arith.constant 0 : index
      %12 = vector.load %arg7[%c0_10, %c0_11] : memref<16x64xf32, #tpu.memory_space<vmem>>, vector<16x64xf32>
      %c0_12 = arith.constant 0 : index
      %c0_13 = arith.constant 0 : index
      %13 = vector.load %arg5[%c0_12, %c0_13] : memref<1x64xf32, #tpu.memory_space<vmem>>, vector<1x64xf32>
      %14 = vector.broadcast %13 : vector<1x64xf32> to vector<16x64xf32>
      %15 = arith.addf %12, %14 : vector<16x64xf32>
      %16 = arith.truncf %15 : vector<16x64xf32> to vector<16x64xbf16>
      %c0_14 = arith.constant 0 : index
      %c0_15 = arith.constant 0 : index
      %17 = vector.load %arg6[%c0_14, %c0_15] : memref<16x64xbf16, #tpu.memory_space<vmem>>, vector<16x64xbf16>
      tpu.vector_store %arg6[%c0_14, %c0_15], %16 {strides = array<i32>} : memref<16x64xbf16, #tpu.memory_space<vmem>>, vector<16x64xbf16>,
    } else {
    }
    return
  }
  func.func @transform_0(%arg0: i32, %arg1: i32, %arg2: i32) -> (i32, i32) {
    %c0_i32 = arith.constant 0 : i32
    return %arg0, %arg2 : i32, i32
  }
  func.func @transform_1(%arg0: i32, %arg1: i32, %arg2: i32) -> (i32, i32) {
    %c0_i32 = arith.constant 0 : i32
    return %arg2, %arg1 : i32, i32
  }
  func.func @transform_2(%arg0: i32, %arg1: i32, %arg2: i32) -> (i32, i32) {
    %c0_i32 = arith.constant 0 : i32
    %c0_i32_0 = arith.constant 0 : i32
    return %c0_i32, %arg1 : i32, i32
  }
  func.func @transform_3(%arg0: i32, %arg1: i32, %arg2: i32) -> (i32, i32) {
    %c0_i32 = arith.constant 0 : i32
    return %arg0, %arg1 : i32, i32
  }
}

module attributes {stable_mosaic.version = 11 : i64} {
  func.func @_fused_linear_kernel(%arg0: i32, %arg1: i32, %arg2: i32, %arg3: memref<16x8xf32, #tpu.memory_space<vmem>>, %arg4: memref<8x64xbf16, #tpu.memory_space<vmem>>, %arg5: memref<1x64xf32, #tpu.memory_space<vmem>>, %arg6: memref<16x64xbf16, #tpu.memory_space<vmem>>, %arg7: memref<16x64xf32, #tpu.memory_space<vmem>>) attributes {dimension_semantics = [#tpu.dimension_semantics<parallel>, #tpu.dimension_semantics<parallel>, #tpu.dimension_semantics<arbitrary>], iteration_bounds = array<i64: 1, 1, 1>, scalar_prefetch = 0 : i64, scratch_operands = 1 : i64, tpu.core_type = #tpu.core_type<tc>, window_params = [{transform_indices = @transform_0, window_bounds = array<i64: 16, 8>}, {transform_indices = @transform_1, window_bounds = array<i64: 8, 64>}, {transform_indices = @transform_2, window_bounds = array<i64: 1, 64>}, {transform_indices = @transform_3, window_bounds = array<i64: 16, 64>}]} {
    %c0_i32 = arith.constant 0 : i32
    %0 = arith.cmpi eq, %arg2, %c0_i32 : i32
    %1 = arith.extui %0 : i1 to i32
    %c0_i32_0 = arith.constant 0 : i32
    %2 = arith.cmpi ne, %1, %c0_i32_0 : i32
    scf.if %2 {
      %cst_10 = arith.constant 0.000000e+00 : f32
      %13 = vector.broadcast %cst_10 : f32 to vector<16x64xf32>
      %c0_11 = arith.constant 0 : index
      %c0_12 = arith.constant 0 : index
      %14 = vector.load %arg7[%c0_11, %c0_12] : memref<16x64xf32, #tpu.memory_space<vmem>>, vector<16x64xf32>
      tpu.vector_store %arg7[%c0_11, %c0_12], %13 {strides = array<i32>} : memref<16x64xf32, #tpu.memory_space<vmem>>, vector<16x64xf32>,
    } else {
    }
    %c0 = arith.constant 0 : index
    %c0_1 = arith.constant 0 : index
    %3 = vector.load %arg3[%c0, %c0_1] : memref<16x8xf32, #tpu.memory_space<vmem>>, vector<16x8xf32>
    %4 = arith.truncf %3 : vector<16x8xf32> to vector<16x8xbf16>
    %c0_2 = arith.constant 0 : index
    %c0_3 = arith.constant 0 : index
    %5 = vector.load %arg7[%c0_2, %c0_3] : memref<16x64xf32, #tpu.memory_space<vmem>>, vector<16x64xf32>
    %c0_4 = arith.constant 0 : index
    %c0_5 = arith.constant 0 : index
    %6 = vector.load %arg4[%c0_4, %c0_5] : memref<8x64xbf16, #tpu.memory_space<vmem>>, vector<8x64xbf16>
    %cst = arith.constant dense<0.000000e+00> : vector<16x64xf32>
    %7 = tpu.matmul %4, %6, %cst {dimension_numbers = #tpu.dot_dimension_numbers<[1], [0], [0], [1], [0, 0, 1, 1], [], []>} : vector<16x8xbf16>, vector<8x64xbf16>, vector<16x64xf32> -> vector<16x64xf32>
    %8 = arith.addf %5, %7 : vector<16x64xf32>
    %c0_6 = arith.constant 0 : index
    %c0_7 = arith.constant 0 : index
    %9 = vector.load %arg7[%c0_6, %c0_7] : memref<16x64xf32, #tpu.memory_space<vmem>>, vector<16x64xf32>
    tpu.vector_store %arg7[%c0_6, %c0_7], %8 {strides = array<i32>} : memref<16x64xf32, #tpu.memory_space<vmem>>, vector<16x64xf32>,
    %c0_i32_8 = arith.constant 0 : i32
    %10 = arith.cmpi eq, %arg2, %c0_i32_8 : i32
    %11 = arith.extui %10 : i1 to i32
    %c0_i32_9 = arith.constant 0 : i32
    %12 = arith.cmpi ne, %11, %c0_i32_9 : i32
    scf.if %12 {
      %c0_10 = arith.constant 0 : index
      %c0_11 = arith.constant 0 : index
      %13 = vector.load %arg7[%c0_10, %c0_11] : memref<16x64xf32, #tpu.memory_space<vmem>>, vector<16x64xf32>
      %c0_12 = arith.constant 0 : index
      %c0_13 = arith.constant 0 : index
      %14 = vector.load %arg5[%c0_12, %c0_13] : memref<1x64xf32, #tpu.memory_space<vmem>>, vector<1x64xf32>
      %15 = vector.broadcast %14 : vector<1x64xf32> to vector<16x64xf32>
      %16 = arith.addf %13, %15 : vector<16x64xf32>
      %17 = arith.truncf %16 : vector<16x64xf32> to vector<16x64xbf16>
      %c0_14 = arith.constant 0 : index
      %c0_15 = arith.constant 0 : index
      %18 = vector.load %arg6[%c0_14, %c0_15] : memref<16x64xbf16, #tpu.memory_space<vmem>>, vector<16x64xbf16>
      tpu.vector_store %arg6[%c0_14, %c0_15], %17 {strides = array<i32>} : memref<16x64xbf16, #tpu.memory_space<vmem>>, vector<16x64xbf16>,
    } else {
    }
    return
  }
  func.func @transform_0(%arg0: i32, %arg1: i32, %arg2: i32) -> (i32, i32) {
    %c0_i32 = arith.constant 0 : i32
    return %arg0, %arg2 : i32, i32
  }
  func.func @transform_1(%arg0: i32, %arg1: i32, %arg2: i32) -> (i32, i32) {
    %c0_i32 = arith.constant 0 : i32
    return %arg2, %arg1 : i32, i32
  }
  func.func @transform_2(%arg0: i32, %arg1: i32, %arg2: i32) -> (i32, i32) {
    %c0_i32 = arith.constant 0 : i32
    %c0_i32_0 = arith.constant 0 : i32
    return %c0_i32, %arg1 : i32, i32
  }
  func.func @transform_3(%arg0: i32, %arg1: i32, %arg2: i32) -> (i32, i32) {
    %c0_i32 = arith.constant 0 : i32
    return %arg0, %arg1 : i32, i32
  }
}

module attributes {stable_mosaic.version = 11 : i64} {
  func.func @_self_attn_kernel(%arg0: i32, %arg1: memref<1x8x192xbf16, #tpu.memory_space<vmem>>, %arg2: memref<64x64xbf16, #tpu.memory_space<vmem>>, %arg3: memref<1x64xf32, #tpu.memory_space<vmem>>, %arg4: memref<1x8x64xbf16, #tpu.memory_space<vmem>>, %arg5: memref<1x8x64xbf16, #tpu.memory_space<vmem>>) attributes {dimension_semantics = [#tpu.dimension_semantics<parallel>], iteration_bounds = array<i64: 2>, scalar_prefetch = 0 : i64, scratch_operands = 0 : i64, tpu.core_type = #tpu.core_type<tc>, window_params = [{transform_indices = @transform_0, window_bounds = array<i64: 1, 8, 192>}, {pipeline_mode = #tpu.pipeline_mode<synchronous>, transform_indices = @transform_1, window_bounds = array<i64: 64, 64>}, {pipeline_mode = #tpu.pipeline_mode<synchronous>, transform_indices = @transform_2, window_bounds = array<i64: 1, 64>}, {transform_indices = @transform_3, window_bounds = array<i64: 1, 8, 64>}, {transform_indices = @transform_4, window_bounds = array<i64: 1, 8, 64>}]} {
    %c0 = arith.constant 0 : index
    %c0_0 = arith.constant 0 : index
    %c0_1 = arith.constant 0 : index
    %0 = vector.load %arg1[%c0, %c0_0, %c0_1] : memref<1x8x192xbf16, #tpu.memory_space<vmem>>, vector<1x8x192xbf16>
    %1 = vector.shape_cast %0 : vector<1x8x192xbf16> to vector<8x192xbf16>
    %2 = vector.extract_strided_slice %1 {offsets = [0, 0], sizes = [8, 64], strides = [1, 1]} : vector<8x192xbf16> to vector<8x64xbf16>
    %3 = vector.extract_strided_slice %1 {offsets = [0, 64], sizes = [8, 64], strides = [1, 1]} : vector<8x192xbf16> to vector<8x64xbf16>
    %4 = vector.extract_strided_slice %1 {offsets = [0, 128], sizes = [8, 64], strides = [1, 1]} : vector<8x192xbf16> to vector<8x64xbf16>
    %5 = vector.extract_strided_slice %2 {offsets = [0, 0], sizes = [8, 16], strides = [1, 1]} : vector<8x64xbf16> to vector<8x16xbf16>
    %6 = vector.extract_strided_slice %3 {offsets = [0, 0], sizes = [8, 16], strides = [1, 1]} : vector<8x64xbf16> to vector<8x16xbf16>
    %7 = vector.extract_strided_slice %4 {offsets = [0, 0], sizes = [8, 16], strides = [1, 1]} : vector<8x64xbf16> to vector<8x16xbf16>
    %cst = arith.constant dense<0.000000e+00> : vector<8x8xf32>
    %8 = tpu.matmul %5, %6, %cst {dimension_numbers = #tpu.dot_dimension_numbers<[1], [1], [0], [0], [0, 0, 1, 0], [], []>} : vector<8x16xbf16>, vector<8x16xbf16>, vector<8x8xf32> -> vector<8x8xf32>
    %cst_2 = arith.constant dense<0xFF800000> : vector<8xf32>
    %9 = vector.multi_reduction <maximumf>, %8, %cst_2 [1] : vector<8x8xf32> to vector<8xf32>
    %10 = vector.shape_cast %9 : vector<8xf32> to vector<8x1xf32>
    %11 = vector.broadcast %10 : vector<8x1xf32> to vector<8x8xf32>
    %12 = arith.subf %8, %11 : vector<8x8xf32>
    %13 = math.exp %12 : vector<8x8xf32>
    %cst_3 = arith.constant dense<0.000000e+00> : vector<8xf32>
    %14 = vector.multi_reduction <add>, %13, %cst_3 [1] : vector<8x8xf32> to vector<8xf32>
    %15 = vector.shape_cast %14 : vector<8xf32> to vector<8x1xf32>
    %16 = vector.broadcast %15 : vector<8x1xf32> to vector<8x8xf32>
    %17 = arith.divf %13, %16 : vector<8x8xf32>
    %18 = arith.truncf %17 : vector<8x8xf32> to vector<8x8xbf16>
    %cst_4 = arith.constant dense<0.000000e+00> : vector<8x16xf32>
    %19 = tpu.matmul %18, %7, %cst_4 {dimension_numbers = #tpu.dot_dimension_numbers<[1], [0], [0], [1], [0, 0, 1, 1], [], []>} : vector<8x8xbf16>, vector<8x16xbf16>, vector<8x16xf32> -> vector<8x16xf32>
    %20 = vector.extract_strided_slice %2 {offsets = [0, 16], sizes = [8, 16], strides = [1, 1]} : vector<8x64xbf16> to vector<8x16xbf16>
    %21 = vector.extract_strided_slice %3 {offsets = [0, 16], sizes = [8, 16], strides = [1, 1]} : vector<8x64xbf16> to vector<8x16xbf16>
    %22 = vector.extract_strided_slice %4 {offsets = [0, 16], sizes = [8, 16], strides = [1, 1]} : vector<8x64xbf16> to vector<8x16xbf16>
    %cst_5 = arith.constant dense<0.000000e+00> : vector<8x8xf32>
    %23 = tpu.matmul %20, %21, %cst_5 {dimension_numbers = #tpu.dot_dimension_numbers<[1], [1], [0], [0], [0, 0, 1, 0], [], []>} : vector<8x16xbf16>, vector<8x16xbf16>, vector<8x8xf32> -> vector<8x8xf32>
    %cst_6 = arith.constant dense<0xFF800000> : vector<8xf32>
    %24 = vector.multi_reduction <maximumf>, %23, %cst_6 [1] : vector<8x8xf32> to vector<8xf32>
    %25 = vector.shape_cast %24 : vector<8xf32> to vector<8x1xf32>
    %26 = vector.broadcast %25 : vector<8x1xf32> to vector<8x8xf32>
    %27 = arith.subf %23, %26 : vector<8x8xf32>
    %28 = math.exp %27 : vector<8x8xf32>
    %cst_7 = arith.constant dense<0.000000e+00> : vector<8xf32>
    %29 = vector.multi_reduction <add>, %28, %cst_7 [1] : vector<8x8xf32> to vector<8xf32>
    %30 = vector.shape_cast %29 : vector<8xf32> to vector<8x1xf32>
    %31 = vector.broadcast %30 : vector<8x1xf32> to vector<8x8xf32>
    %32 = arith.divf %28, %31 : vector<8x8xf32>
    %33 = arith.truncf %32 : vector<8x8xf32> to vector<8x8xbf16>
    %cst_8 = arith.constant dense<0.000000e+00> : vector<8x16xf32>
    %34 = tpu.matmul %33, %22, %cst_8 {dimension_numbers = #tpu.dot_dimension_numbers<[1], [0], [0], [1], [0, 0, 1, 1], [], []>} : vector<8x8xbf16>, vector<8x16xbf16>, vector<8x16xf32> -> vector<8x16xf32>
    %35 = vector.extract_strided_slice %2 {offsets = [0, 32], sizes = [8, 16], strides = [1, 1]} : vector<8x64xbf16> to vector<8x16xbf16>
    %36 = vector.extract_strided_slice %3 {offsets = [0, 32], sizes = [8, 16], strides = [1, 1]} : vector<8x64xbf16> to vector<8x16xbf16>
    %37 = vector.extract_strided_slice %4 {offsets = [0, 32], sizes = [8, 16], strides = [1, 1]} : vector<8x64xbf16> to vector<8x16xbf16>
    %cst_9 = arith.constant dense<0.000000e+00> : vector<8x8xf32>
    %38 = tpu.matmul %35, %36, %cst_9 {dimension_numbers = #tpu.dot_dimension_numbers<[1], [1], [0], [0], [0, 0, 1, 0], [], []>} : vector<8x16xbf16>, vector<8x16xbf16>, vector<8x8xf32> -> vector<8x8xf32>
    %cst_10 = arith.constant dense<0xFF800000> : vector<8xf32>
    %39 = vector.multi_reduction <maximumf>, %38, %cst_10 [1] : vector<8x8xf32> to vector<8xf32>
    %40 = vector.shape_cast %39 : vector<8xf32> to vector<8x1xf32>
    %41 = vector.broadcast %40 : vector<8x1xf32> to vector<8x8xf32>
    %42 = arith.subf %38, %41 : vector<8x8xf32>
    %43 = math.exp %42 : vector<8x8xf32>
    %cst_11 = arith.constant dense<0.000000e+00> : vector<8xf32>
    %44 = vector.multi_reduction <add>, %43, %cst_11 [1] : vector<8x8xf32> to vector<8xf32>
    %45 = vector.shape_cast %44 : vector<8xf32> to vector<8x1xf32>
    %46 = vector.broadcast %45 : vector<8x1xf32> to vector<8x8xf32>
    %47 = arith.divf %43, %46 : vector<8x8xf32>
    %48 = arith.truncf %47 : vector<8x8xf32> to vector<8x8xbf16>
    %cst_12 = arith.constant dense<0.000000e+00> : vector<8x16xf32>
    %49 = tpu.matmul %48, %37, %cst_12 {dimension_numbers = #tpu.dot_dimension_numbers<[1], [0], [0], [1], [0, 0, 1, 1], [], []>} : vector<8x8xbf16>, vector<8x16xbf16>, vector<8x16xf32> -> vector<8x16xf32>
    %50 = vector.extract_strided_slice %2 {offsets = [0, 48], sizes = [8, 16], strides = [1, 1]} : vector<8x64xbf16> to vector<8x16xbf16>
    %51 = vector.extract_strided_slice %3 {offsets = [0, 48], sizes = [8, 16], strides = [1, 1]} : vector<8x64xbf16> to vector<8x16xbf16>
    %52 = vector.extract_strided_slice %4 {offsets = [0, 48], sizes = [8, 16], strides = [1, 1]} : vector<8x64xbf16> to vector<8x16xbf16>
    %cst_13 = arith.constant dense<0.000000e+00> : vector<8x8xf32>
    %53 = tpu.matmul %50, %51, %cst_13 {dimension_numbers = #tpu.dot_dimension_numbers<[1], [1], [0], [0], [0, 0, 1, 0], [], []>} : vector<8x16xbf16>, vector<8x16xbf16>, vector<8x8xf32> -> vector<8x8xf32>
    %cst_14 = arith.constant dense<0xFF800000> : vector<8xf32>
    %54 = vector.multi_reduction <maximumf>, %53, %cst_14 [1] : vector<8x8xf32> to vector<8xf32>
    %55 = vector.shape_cast %54 : vector<8xf32> to vector<8x1xf32>
    %56 = vector.broadcast %55 : vector<8x1xf32> to vector<8x8xf32>
    %57 = arith.subf %53, %56 : vector<8x8xf32>
    %58 = math.exp %57 : vector<8x8xf32>
    %cst_15 = arith.constant dense<0.000000e+00> : vector<8xf32>
    %59 = vector.multi_reduction <add>, %58, %cst_15 [1] : vector<8x8xf32> to vector<8xf32>
    %60 = vector.shape_cast %59 : vector<8xf32> to vector<8x1xf32>
    %61 = vector.broadcast %60 : vector<8x1xf32> to vector<8x8xf32>
    %62 = arith.divf %58, %61 : vector<8x8xf32>
    %63 = arith.truncf %62 : vector<8x8xf32> to vector<8x8xbf16>
    %cst_16 = arith.constant dense<0.000000e+00> : vector<8x16xf32>
    %64 = tpu.matmul %63, %52, %cst_16 {dimension_numbers = #tpu.dot_dimension_numbers<[1], [0], [0], [1], [0, 0, 1, 1], [], []>} : vector<8x8xbf16>, vector<8x16xbf16>, vector<8x16xf32> -> vector<8x16xf32>
    %65 = tpu.concatenate %19, %34, %49, %64 in 1 : vector<8x16xf32>, vector<8x16xf32>, vector<8x16xf32>, vector<8x16xf32> -> vector<8x64xf32>
    %66 = arith.truncf %65 : vector<8x64xf32> to vector<8x64xbf16>
    %c0_17 = arith.constant 0 : index
    %c0_18 = arith.constant 0 : index
    %67 = vector.load %arg2[%c0_17, %c0_18] : memref<64x64xbf16, #tpu.memory_space<vmem>>, vector<64x64xbf16>
    %cst_19 = arith.constant dense<0.000000e+00> : vector<8x64xf32>
    %68 = tpu.matmul %66, %67, %cst_19 {dimension_numbers = #tpu.dot_dimension_numbers<[1], [0], [0], [1], [0, 0, 1, 1], [], []>} : vector<8x64xbf16>, vector<64x64xbf16>, vector<8x64xf32> -> vector<8x64xf32>
    %c0_20 = arith.constant 0 : index
    %c0_21 = arith.constant 0 : index
    %69 = vector.load %arg3[%c0_20, %c0_21] : memref<1x64xf32, #tpu.memory_space<vmem>>, vector<1x64xf32>
    %70 = vector.broadcast %69 : vector<1x64xf32> to vector<8x64xf32>
    %71 = arith.addf %68, %70 : vector<8x64xf32>
    %c0_22 = arith.constant 0 : index
    %c0_23 = arith.constant 0 : index
    %c0_24 = arith.constant 0 : index
    %72 = vector.load %arg4[%c0_22, %c0_23, %c0_24] : memref<1x8x64xbf16, #tpu.memory_space<vmem>>, vector<1x8x64xbf16>
    %73 = vector.shape_cast %72 : vector<1x8x64xbf16> to vector<8x64xbf16>
    %74 = arith.extf %73 : vector<8x64xbf16> to vector<8x64xf32>
    %75 = arith.addf %71, %74 : vector<8x64xf32>
    %76 = arith.truncf %75 : vector<8x64xf32> to vector<8x64xbf16>
    %c0_25 = arith.constant 0 : index
    %c0_26 = arith.constant 0 : index
    %c0_27 = arith.constant 0 : index
    %77 = vector.load %arg5[%c0_25, %c0_26, %c0_27] : memref<1x8x64xbf16, #tpu.memory_space<vmem>>, vector<1x8x64xbf16>
    %78 = vector.shape_cast %77 : vector<1x8x64xbf16> to vector<8x64xbf16>
    %79 = vector.shape_cast %76 : vector<8x64xbf16> to vector<1x8x64xbf16>
    tpu.vector_store %arg5[%c0_25, %c0_26, %c0_27], %79 {strides = array<i32>} : memref<1x8x64xbf16, #tpu.memory_space<vmem>>, vector<1x8x64xbf16>,
    return
  }
  func.func @transform_0(%arg0: i32) -> (i32, i32, i32) {
    %c0_i32 = arith.constant 0 : i32
    %c0_i32_0 = arith.constant 0 : i32
    %c0_i32_1 = arith.constant 0 : i32
    return %arg0, %c0_i32, %c0_i32_0 : i32, i32, i32
  }
  func.func @transform_1(%arg0: i32) -> (i32, i32) {
    %c0_i32 = arith.constant 0 : i32
    %c0_i32_0 = arith.constant 0 : i32
    %c0_i32_1 = arith.constant 0 : i32
    return %c0_i32, %c0_i32_0 : i32, i32
  }
  func.func @transform_2(%arg0: i32) -> (i32, i32) {
    %c0_i32 = arith.constant 0 : i32
    %c0_i32_0 = arith.constant 0 : i32
    %c0_i32_1 = arith.constant 0 : i32
    return %c0_i32, %c0_i32_0 : i32, i32
  }
  func.func @transform_3(%arg0: i32) -> (i32, i32, i32) {
    %c0_i32 = arith.constant 0 : i32
    %c0_i32_0 = arith.constant 0 : i32
    %c0_i32_1 = arith.constant 0 : i32
    return %arg0, %c0_i32, %c0_i32_0 : i32, i32, i32
  }
  func.func @transform_4(%arg0: i32) -> (i32, i32, i32) {
    %c0_i32 = arith.constant 0 : i32
    %c0_i32_0 = arith.constant 0 : i32
    %c0_i32_1 = arith.constant 0 : i32
    return %arg0, %c0_i32, %c0_i32_0 : i32, i32, i32
  }
}

module attributes {stable_mosaic.version = 11 : i64} {
  func.func @_fused_linear_kernel(%arg0: i32, %arg1: i32, %arg2: i32, %arg3: memref<16x64xbf16, #tpu.memory_space<vmem>>, %arg4: memref<64x192xbf16, #tpu.memory_space<vmem>>, %arg5: memref<1x192xf32, #tpu.memory_space<vmem>>, %arg6: memref<1x64xf32, #tpu.memory_space<vmem>>, %arg7: memref<1x64xf32, #tpu.memory_space<vmem>>, %arg8: memref<16x192xbf16, #tpu.memory_space<vmem>>, %arg9: memref<16x192xf32, #tpu.memory_space<vmem>>, %arg10: memref<16x64xbf16, #tpu.memory_space<vmem>>) attributes {dimension_semantics = [#tpu.dimension_semantics<parallel>, #tpu.dimension_semantics<arbitrary>, #tpu.dimension_semantics<arbitrary>], iteration_bounds = array<i64: 1, 1, 1>, scalar_prefetch = 0 : i64, scratch_operands = 2 : i64, tpu.core_type = #tpu.core_type<tc>, window_params = [{transform_indices = @transform_0, window_bounds = array<i64: 16, 64>}, {transform_indices = @transform_1, window_bounds = array<i64: 64, 192>}, {transform_indices = @transform_2, window_bounds = array<i64: 1, 192>}, {transform_indices = @transform_3, window_bounds = array<i64: 1, 64>}, {transform_indices = @transform_4, window_bounds = array<i64: 1, 64>}, {transform_indices = @transform_5, window_bounds = array<i64: 16, 192>}]} {
    %c0_i32 = arith.constant 0 : i32
    %0 = arith.cmpi eq, %arg2, %c0_i32 : i32
    %1 = arith.extui %0 : i1 to i32
    %c0_i32_0 = arith.constant 0 : i32
    %2 = arith.cmpi ne, %1, %c0_i32_0 : i32
    scf.if %2 {
      %cst_12 = arith.constant 0.000000e+00 : f32
      %15 = vector.broadcast %cst_12 : f32 to vector<16x192xf32>
      %c0_13 = arith.constant 0 : index
      %c0_14 = arith.constant 0 : index
      %16 = vector.load %arg9[%c0_13, %c0_14] : memref<16x192xf32, #tpu.memory_space<vmem>>, vector<16x192xf32>
      tpu.vector_store %arg9[%c0_13, %c0_14], %15 {strides = array<i32>} : memref<16x192xf32, #tpu.memory_space<vmem>>, vector<16x192xf32>,
    } else {
    }
    %c0_i32_1 = arith.constant 0 : i32
    %3 = arith.cmpi eq, %arg1, %c0_i32_1 : i32
    %4 = arith.extui %3 : i1 to i32
    %c0_i32_2 = arith.constant 0 : i32
    %5 = arith.cmpi ne, %4, %c0_i32_2 : i32
    scf.if %5 {
      %c0_12 = arith.constant 0 : index
      %c0_13 = arith.constant 0 : index
      %15 = vector.load %arg3[%c0_12, %c0_13] : memref<16x64xbf16, #tpu.memory_space<vmem>>, vector<16x64xbf16>
      %16 = arith.extf %15 : vector<16x64xbf16> to vector<16x64xf32>
      %c0_14 = arith.constant 0 : index
      %c0_15 = arith.constant 0 : index
      %17 = vector.load %arg6[%c0_14, %c0_15] : memref<1x64xf32, #tpu.memory_space<vmem>>, vector<1x64xf32>
      %c0_16 = arith.constant 0 : index
      %c0_17 = arith.constant 0 : index
      %18 = vector.load %arg7[%c0_16, %c0_17] : memref<1x64xf32, #tpu.memory_space<vmem>>, vector<1x64xf32>
      %cst_18 = arith.constant dense<0.000000e+00> : vector<16xf32>
      %19 = vector.multi_reduction <add>, %16, %cst_18 [1] : vector<16x64xf32> to vector<16xf32>
      %20 = vector.shape_cast %19 : vector<16xf32> to vector<16x1xf32>
      %cst_19 = arith.constant 6.400000e+01 : f32
      %21 = vector.broadcast %cst_19 : f32 to vector<16x1xf32>
      %22 = arith.divf %20, %21 : vector<16x1xf32>
      %23 = vector.broadcast %22 : vector<16x1xf32> to vector<16x64xf32>
      %24 = arith.subf %16, %23 : vector<16x64xf32>
      %25 = arith.mulf %24, %24 : vector<16x64xf32>
      %cst_20 = arith.constant dense<0.000000e+00> : vector<16xf32>
      %26 = vector.multi_reduction <add>, %25, %cst_20 [1] : vector<16x64xf32> to vector<16xf32>
      %27 = vector.shape_cast %26 : vector<16xf32> to vector<16x1xf32>
      %cst_21 = arith.constant 6.400000e+01 : f32
      %28 = vector.broadcast %cst_21 : f32 to vector<16x1xf32>
      %29 = arith.divf %27, %28 : vector<16x1xf32>
      %cst_22 = arith.constant 9.99999997E-7 : f32
      %30 = vector.broadcast %cst_22 : f32 to vector<16x1xf32>
      %31 = arith.addf %29, %30 : vector<16x1xf32>
      %32 = math.rsqrt %31 : vector<16x1xf32>
      %33 = vector.broadcast %32 : vector<16x1xf32> to vector<16x64xf32>
      %34 = arith.mulf %24, %33 : vector<16x64xf32>
      %35 = vector.broadcast %17 : vector<1x64xf32> to vector<16x64xf32>
      %36 = arith.mulf %34, %35 : vector<16x64xf32>
      %37 = vector.broadcast %18 : vector<1x64xf32> to vector<16x64xf32>
      %38 = arith.addf %36, %37 : vector<16x64xf32>
      %39 = arith.truncf %38 : vector<16x64xf32> to vector<16x64xbf16>
      %c0_23 = arith.constant 0 : index
      %c0_24 = arith.constant 0 : index
      %40 = vector.load %arg10[%c0_23, %c0_24] : memref<16x64xbf16, #tpu.memory_space<vmem>>, vector<16x64xbf16>
      tpu.vector_store %arg10[%c0_23, %c0_24], %39 {strides = array<i32>} : memref<16x64xbf16, #tpu.memory_space<vmem>>, vector<16x64xbf16>,
    } else {
    }
    %c0 = arith.constant 0 : index
    %c0_3 = arith.constant 0 : index
    %6 = vector.load %arg10[%c0, %c0_3] : memref<16x64xbf16, #tpu.memory_space<vmem>>, vector<16x64xbf16>
    %c0_4 = arith.constant 0 : index
    %c0_5 = arith.constant 0 : index
    %7 = vector.load %arg9[%c0_4, %c0_5] : memref<16x192xf32, #tpu.memory_space<vmem>>, vector<16x192xf32>
    %c0_6 = arith.constant 0 : index
    %c0_7 = arith.constant 0 : index
    %8 = vector.load %arg4[%c0_6, %c0_7] : memref<64x192xbf16, #tpu.memory_space<vmem>>, vector<64x192xbf16>
    %cst = arith.constant dense<0.000000e+00> : vector<16x192xf32>
    %9 = tpu.matmul %6, %8, %cst {dimension_numbers = #tpu.dot_dimension_numbers<[1], [0], [0], [1], [0, 0, 1, 1], [], []>} : vector<16x64xbf16>, vector<64x192xbf16>, vector<16x192xf32> -> vector<16x192xf32>
    %10 = arith.addf %7, %9 : vector<16x192xf32>
    %c0_8 = arith.constant 0 : index
    %c0_9 = arith.constant 0 : index
    %11 = vector.load %arg9[%c0_8, %c0_9] : memref<16x192xf32, #tpu.memory_space<vmem>>, vector<16x192xf32>
    tpu.vector_store %arg9[%c0_8, %c0_9], %10 {strides = array<i32>} : memref<16x192xf32, #tpu.memory_space<vmem>>, vector<16x192xf32>,
    %c0_i32_10 = arith.constant 0 : i32
    %12 = arith.cmpi eq, %arg2, %c0_i32_10 : i32
    %13 = arith.extui %12 : i1 to i32
    %c0_i32_11 = arith.constant 0 : i32
    %14 = arith.cmpi ne, %13, %c0_i32_11 : i32
    scf.if %14 {
      %c0_12 = arith.constant 0 : index
      %c0_13 = arith.constant 0 : index
      %15 = vector.load %arg9[%c0_12, %c0_13] : memref<16x192xf32, #tpu.memory_space<vmem>>, vector<16x192xf32>
      %c0_14 = arith.constant 0 : index
      %c0_15 = arith.constant 0 : index
      %16 = vector.load %arg5[%c0_14, %c0_15] : memref<1x192xf32, #tpu.memory_space<vmem>>, vector<1x192xf32>
      %17 = vector.broadcast %16 : vector<1x192xf32> to vector<16x192xf32>
      %18 = arith.addf %15, %17 : vector<16x192xf32>
      %19 = arith.truncf %18 : vector<16x192xf32> to vector<16x192xbf16>
      %c0_16 = arith.constant 0 : index
      %c0_17 = arith.constant 0 : index
      %20 = vector.load %arg8[%c0_16, %c0_17] : memref<16x192xbf16, #tpu.memory_space<vmem>>, vector<16x192xbf16>
      tpu.vector_store %arg8[%c0_16, %c0_17], %19 {strides = array<i32>} : memref<16x192xbf16, #tpu.memory_space<vmem>>, vector<16x192xbf16>,
    } else {
    }
    return
  }
  func.func @transform_0(%arg0: i32, %arg1: i32, %arg2: i32) -> (i32, i32) {
    %c0_i32 = arith.constant 0 : i32
    return %arg0, %arg2 : i32, i32
  }
  func.func @transform_1(%arg0: i32, %arg1: i32, %arg2: i32) -> (i32, i32) {
    %c0_i32 = arith.constant 0 : i32
    return %arg2, %arg1 : i32, i32
  }
  func.func @transform_2(%arg0: i32, %arg1: i32, %arg2: i32) -> (i32, i32) {
    %c0_i32 = arith.constant 0 : i32
    %c0_i32_0 = arith.constant 0 : i32
    return %c0_i32, %arg1 : i32, i32
  }
  func.func @transform_3(%arg0: i32, %arg1: i32, %arg2: i32) -> (i32, i32) {
    %c0_i32 = arith.constant 0 : i32
    %c0_i32_0 = arith.constant 0 : i32
    return %c0_i32, %arg2 : i32, i32
  }
  func.func @transform_4(%arg0: i32, %arg1: i32, %arg2: i32) -> (i32, i32) {
    %c0_i32 = arith.constant 0 : i32
    %c0_i32_0 = arith.constant 0 : i32
    return %c0_i32, %arg2 : i32, i32
  }
  func.func @transform_5(%arg0: i32, %arg1: i32, %arg2: i32) -> (i32, i32) {
    %c0_i32 = arith.constant 0 : i32
    return %arg0, %arg1 : i32, i32
  }
}

module attributes {stable_mosaic.version = 11 : i64} {
  func.func @_fused_linear_kernel(%arg0: i32, %arg1: i32, %arg2: i32, %arg3: memref<16x64xbf16, #tpu.memory_space<vmem>>, %arg4: memref<64x64xbf16, #tpu.memory_space<vmem>>, %arg5: memref<1x64xf32, #tpu.memory_space<vmem>>, %arg6: memref<1x64xf32, #tpu.memory_space<vmem>>, %arg7: memref<1x64xf32, #tpu.memory_space<vmem>>, %arg8: memref<16x64xbf16, #tpu.memory_space<vmem>>, %arg9: memref<16x64xf32, #tpu.memory_space<vmem>>, %arg10: memref<16x64xbf16, #tpu.memory_space<vmem>>) attributes {dimension_semantics = [#tpu.dimension_semantics<parallel>, #tpu.dimension_semantics<arbitrary>, #tpu.dimension_semantics<arbitrary>], iteration_bounds = array<i64: 1, 1, 1>, scalar_prefetch = 0 : i64, scratch_operands = 2 : i64, tpu.core_type = #tpu.core_type<tc>, window_params = [{transform_indices = @transform_0, window_bounds = array<i64: 16, 64>}, {transform_indices = @transform_1, window_bounds = array<i64: 64, 64>}, {transform_indices = @transform_2, window_bounds = array<i64: 1, 64>}, {transform_indices = @transform_3, window_bounds = array<i64: 1, 64>}, {transform_indices = @transform_4, window_bounds = array<i64: 1, 64>}, {transform_indices = @transform_5, window_bounds = array<i64: 16, 64>}]} {
    %c0_i32 = arith.constant 0 : i32
    %0 = arith.cmpi eq, %arg2, %c0_i32 : i32
    %1 = arith.extui %0 : i1 to i32
    %c0_i32_0 = arith.constant 0 : i32
    %2 = arith.cmpi ne, %1, %c0_i32_0 : i32
    scf.if %2 {
      %cst_12 = arith.constant 0.000000e+00 : f32
      %15 = vector.broadcast %cst_12 : f32 to vector<16x64xf32>
      %c0_13 = arith.constant 0 : index
      %c0_14 = arith.constant 0 : index
      %16 = vector.load %arg9[%c0_13, %c0_14] : memref<16x64xf32, #tpu.memory_space<vmem>>, vector<16x64xf32>
      tpu.vector_store %arg9[%c0_13, %c0_14], %15 {strides = array<i32>} : memref<16x64xf32, #tpu.memory_space<vmem>>, vector<16x64xf32>,
    } else {
    }
    %c0_i32_1 = arith.constant 0 : i32
    %3 = arith.cmpi eq, %arg1, %c0_i32_1 : i32
    %4 = arith.extui %3 : i1 to i32
    %c0_i32_2 = arith.constant 0 : i32
    %5 = arith.cmpi ne, %4, %c0_i32_2 : i32
    scf.if %5 {
      %c0_12 = arith.constant 0 : index
      %c0_13 = arith.constant 0 : index
      %15 = vector.load %arg3[%c0_12, %c0_13] : memref<16x64xbf16, #tpu.memory_space<vmem>>, vector<16x64xbf16>
      %16 = arith.extf %15 : vector<16x64xbf16> to vector<16x64xf32>
      %c0_14 = arith.constant 0 : index
      %c0_15 = arith.constant 0 : index
      %17 = vector.load %arg6[%c0_14, %c0_15] : memref<1x64xf32, #tpu.memory_space<vmem>>, vector<1x64xf32>
      %c0_16 = arith.constant 0 : index
      %c0_17 = arith.constant 0 : index
      %18 = vector.load %arg7[%c0_16, %c0_17] : memref<1x64xf32, #tpu.memory_space<vmem>>, vector<1x64xf32>
      %cst_18 = arith.constant dense<0.000000e+00> : vector<16xf32>
      %19 = vector.multi_reduction <add>, %16, %cst_18 [1] : vector<16x64xf32> to vector<16xf32>
      %20 = vector.shape_cast %19 : vector<16xf32> to vector<16x1xf32>
      %cst_19 = arith.constant 6.400000e+01 : f32
      %21 = vector.broadcast %cst_19 : f32 to vector<16x1xf32>
      %22 = arith.divf %20, %21 : vector<16x1xf32>
      %23 = vector.broadcast %22 : vector<16x1xf32> to vector<16x64xf32>
      %24 = arith.subf %16, %23 : vector<16x64xf32>
      %25 = arith.mulf %24, %24 : vector<16x64xf32>
      %cst_20 = arith.constant dense<0.000000e+00> : vector<16xf32>
      %26 = vector.multi_reduction <add>, %25, %cst_20 [1] : vector<16x64xf32> to vector<16xf32>
      %27 = vector.shape_cast %26 : vector<16xf32> to vector<16x1xf32>
      %cst_21 = arith.constant 6.400000e+01 : f32
      %28 = vector.broadcast %cst_21 : f32 to vector<16x1xf32>
      %29 = arith.divf %27, %28 : vector<16x1xf32>
      %cst_22 = arith.constant 9.99999997E-7 : f32
      %30 = vector.broadcast %cst_22 : f32 to vector<16x1xf32>
      %31 = arith.addf %29, %30 : vector<16x1xf32>
      %32 = math.rsqrt %31 : vector<16x1xf32>
      %33 = vector.broadcast %32 : vector<16x1xf32> to vector<16x64xf32>
      %34 = arith.mulf %24, %33 : vector<16x64xf32>
      %35 = vector.broadcast %17 : vector<1x64xf32> to vector<16x64xf32>
      %36 = arith.mulf %34, %35 : vector<16x64xf32>
      %37 = vector.broadcast %18 : vector<1x64xf32> to vector<16x64xf32>
      %38 = arith.addf %36, %37 : vector<16x64xf32>
      %39 = arith.truncf %38 : vector<16x64xf32> to vector<16x64xbf16>
      %c0_23 = arith.constant 0 : index
      %c0_24 = arith.constant 0 : index
      %40 = vector.load %arg10[%c0_23, %c0_24] : memref<16x64xbf16, #tpu.memory_space<vmem>>, vector<16x64xbf16>
      tpu.vector_store %arg10[%c0_23, %c0_24], %39 {strides = array<i32>} : memref<16x64xbf16, #tpu.memory_space<vmem>>, vector<16x64xbf16>,
    } else {
    }
    %c0 = arith.constant 0 : index
    %c0_3 = arith.constant 0 : index
    %6 = vector.load %arg10[%c0, %c0_3] : memref<16x64xbf16, #tpu.memory_space<vmem>>, vector<16x64xbf16>
    %c0_4 = arith.constant 0 : index
    %c0_5 = arith.constant 0 : index
    %7 = vector.load %arg9[%c0_4, %c0_5] : memref<16x64xf32, #tpu.memory_space<vmem>>, vector<16x64xf32>
    %c0_6 = arith.constant 0 : index
    %c0_7 = arith.constant 0 : index
    %8 = vector.load %arg4[%c0_6, %c0_7] : memref<64x64xbf16, #tpu.memory_space<vmem>>, vector<64x64xbf16>
    %cst = arith.constant dense<0.000000e+00> : vector<16x64xf32>
    %9 = tpu.matmul %6, %8, %cst {dimension_numbers = #tpu.dot_dimension_numbers<[1], [0], [0], [1], [0, 0, 1, 1], [], []>} : vector<16x64xbf16>, vector<64x64xbf16>, vector<16x64xf32> -> vector<16x64xf32>
    %10 = arith.addf %7, %9 : vector<16x64xf32>
    %c0_8 = arith.constant 0 : index
    %c0_9 = arith.constant 0 : index
    %11 = vector.load %arg9[%c0_8, %c0_9] : memref<16x64xf32, #tpu.memory_space<vmem>>, vector<16x64xf32>
    tpu.vector_store %arg9[%c0_8, %c0_9], %10 {strides = array<i32>} : memref<16x64xf32, #tpu.memory_space<vmem>>, vector<16x64xf32>,
    %c0_i32_10 = arith.constant 0 : i32
    %12 = arith.cmpi eq, %arg2, %c0_i32_10 : i32
    %13 = arith.extui %12 : i1 to i32
    %c0_i32_11 = arith.constant 0 : i32
    %14 = arith.cmpi ne, %13, %c0_i32_11 : i32
    scf.if %14 {
      %c0_12 = arith.constant 0 : index
      %c0_13 = arith.constant 0 : index
      %15 = vector.load %arg9[%c0_12, %c0_13] : memref<16x64xf32, #tpu.memory_space<vmem>>, vector<16x64xf32>
      %c0_14 = arith.constant 0 : index
      %c0_15 = arith.constant 0 : index
      %16 = vector.load %arg5[%c0_14, %c0_15] : memref<1x64xf32, #tpu.memory_space<vmem>>, vector<1x64xf32>
      %17 = vector.broadcast %16 : vector<1x64xf32> to vector<16x64xf32>
      %18 = arith.addf %15, %17 : vector<16x64xf32>
      %19 = arith.truncf %18 : vector<16x64xf32> to vector<16x64xbf16>
      %c0_16 = arith.constant 0 : index
      %c0_17 = arith.constant 0 : index
      %20 = vector.load %arg8[%c0_16, %c0_17] : memref<16x64xbf16, #tpu.memory_space<vmem>>, vector<16x64xbf16>
      tpu.vector_store %arg8[%c0_16, %c0_17], %19 {strides = array<i32>} : memref<16x64xbf16, #tpu.memory_space<vmem>>, vector<16x64xbf16>,
    } else {
    }
    return
  }
  func.func @transform_0(%arg0: i32, %arg1: i32, %arg2: i32) -> (i32, i32) {
    %c0_i32 = arith.constant 0 : i32
    return %arg0, %arg2 : i32, i32
  }
  func.func @transform_1(%arg0: i32, %arg1: i32, %arg2: i32) -> (i32, i32) {
    %c0_i32 = arith.constant 0 : i32
    return %arg2, %arg1 : i32, i32
  }
  func.func @transform_2(%arg0: i32, %arg1: i32, %arg2: i32) -> (i32, i32) {
    %c0_i32 = arith.constant 0 : i32
    %c0_i32_0 = arith.constant 0 : i32
    return %c0_i32, %arg1 : i32, i32
  }
  func.func @transform_3(%arg0: i32, %arg1: i32, %arg2: i32) -> (i32, i32) {
    %c0_i32 = arith.constant 0 : i32
    %c0_i32_0 = arith.constant 0 : i32
    return %c0_i32, %arg2 : i32, i32
  }
  func.func @transform_4(%arg0: i32, %arg1: i32, %arg2: i32) -> (i32, i32) {
    %c0_i32 = arith.constant 0 : i32
    %c0_i32_0 = arith.constant 0 : i32
    return %c0_i32, %arg2 : i32, i32
  }
  func.func @transform_5(%arg0: i32, %arg1: i32, %arg2: i32) -> (i32, i32) {
    %c0_i32 = arith.constant 0 : i32
    return %arg0, %arg1 : i32, i32
  }
}

module attributes {stable_mosaic.version = 11 : i64} {
  func.func @_cross_attn_kernel(%arg0: i32, %arg1: memref<1x8x64xbf16, #tpu.memory_space<vmem>>, %arg2: memref<1x4x64xbf16, #tpu.memory_space<vmem>>, %arg3: memref<1x4x64xbf16, #tpu.memory_space<vmem>>, %arg4: memref<64x64xbf16, #tpu.memory_space<vmem>>, %arg5: memref<1x64xf32, #tpu.memory_space<vmem>>, %arg6: memref<1x8x64xbf16, #tpu.memory_space<vmem>>, %arg7: memref<1x64xf32, #tpu.memory_space<vmem>>, %arg8: memref<1x64xf32, #tpu.memory_space<vmem>>, %arg9: memref<1x8x64xbf16, #tpu.memory_space<vmem>>) attributes {dimension_semantics = [#tpu.dimension_semantics<parallel>], iteration_bounds = array<i64: 2>, scalar_prefetch = 0 : i64, scratch_operands = 0 : i64, tpu.core_type = #tpu.core_type<tc>, window_params = [{transform_indices = @transform_0, window_bounds = array<i64: 1, 8, 64>}, {transform_indices = @transform_1, window_bounds = array<i64: 1, 4, 64>}, {transform_indices = @transform_2, window_bounds = array<i64: 1, 4, 64>}, {pipeline_mode = #tpu.pipeline_mode<synchronous>, transform_indices = @transform_3, window_bounds = array<i64: 64, 64>}, {pipeline_mode = #tpu.pipeline_mode<synchronous>, transform_indices = @transform_4, window_bounds = array<i64: 1, 64>}, {transform_indices = @transform_5, window_bounds = array<i64: 1, 8, 64>}, {pipeline_mode = #tpu.pipeline_mode<synchronous>, transform_indices = @transform_6, window_bounds = array<i64: 1, 64>}, {pipeline_mode = #tpu.pipeline_mode<synchronous>, transform_indices = @transform_7, window_bounds = array<i64: 1, 64>}, {transform_indices = @transform_8, window_bounds = array<i64: 1, 8, 64>}]} {
    %c0 = arith.constant 0 : index
    %c0_0 = arith.constant 0 : index
    %c0_1 = arith.constant 0 : index
    %0 = vector.load %arg6[%c0, %c0_0, %c0_1] : memref<1x8x64xbf16, #tpu.memory_space<vmem>>, vector<1x8x64xbf16>
    %1 = vector.shape_cast %0 : vector<1x8x64xbf16> to vector<8x64xbf16>
    %2 = arith.extf %1 : vector<8x64xbf16> to vector<8x64xf32>
    %c0_2 = arith.constant 0 : index
    %c0_3 = arith.constant 0 : index
    %3 = vector.load %arg7[%c0_2, %c0_3] : memref<1x64xf32, #tpu.memory_space<vmem>>, vector<1x64xf32>
    %c0_4 = arith.constant 0 : index
    %c0_5 = arith.constant 0 : index
    %4 = vector.load %arg8[%c0_4, %c0_5] : memref<1x64xf32, #tpu.memory_space<vmem>>, vector<1x64xf32>
    %cst = arith.constant dense<0.000000e+00> : vector<8xf32>
    %5 = vector.multi_reduction <add>, %2, %cst [1] : vector<8x64xf32> to vector<8xf32>
    %6 = vector.shape_cast %5 : vector<8xf32> to vector<8x1xf32>
    %cst_6 = arith.constant 6.400000e+01 : f32
    %7 = vector.broadcast %cst_6 : f32 to vector<8x1xf32>
    %8 = arith.divf %6, %7 : vector<8x1xf32>
    %9 = vector.broadcast %8 : vector<8x1xf32> to vector<8x64xf32>
    %10 = arith.subf %2, %9 : vector<8x64xf32>
    %11 = arith.mulf %10, %10 : vector<8x64xf32>
    %cst_7 = arith.constant dense<0.000000e+00> : vector<8xf32>
    %12 = vector.multi_reduction <add>, %11, %cst_7 [1] : vector<8x64xf32> to vector<8xf32>
    %13 = vector.shape_cast %12 : vector<8xf32> to vector<8x1xf32>
    %cst_8 = arith.constant 6.400000e+01 : f32
    %14 = vector.broadcast %cst_8 : f32 to vector<8x1xf32>
    %15 = arith.divf %13, %14 : vector<8x1xf32>
    %cst_9 = arith.constant 9.99999997E-7 : f32
    %16 = vector.broadcast %cst_9 : f32 to vector<8x1xf32>
    %17 = arith.addf %15, %16 : vector<8x1xf32>
    %18 = math.rsqrt %17 : vector<8x1xf32>
    %19 = vector.broadcast %18 : vector<8x1xf32> to vector<8x64xf32>
    %20 = arith.mulf %10, %19 : vector<8x64xf32>
    %21 = vector.broadcast %3 : vector<1x64xf32> to vector<8x64xf32>
    %22 = arith.mulf %20, %21 : vector<8x64xf32>
    %23 = vector.broadcast %4 : vector<1x64xf32> to vector<8x64xf32>
    %24 = arith.addf %22, %23 : vector<8x64xf32>
    %c0_10 = arith.constant 0 : index
    %c0_11 = arith.constant 0 : index
    %c0_12 = arith.constant 0 : index
    %25 = vector.load %arg1[%c0_10, %c0_11, %c0_12] : memref<1x8x64xbf16, #tpu.memory_space<vmem>>, vector<1x8x64xbf16>
    %26 = vector.shape_cast %25 : vector<1x8x64xbf16> to vector<8x64xbf16>
    %c0_13 = arith.constant 0 : index
    %c0_14 = arith.constant 0 : index
    %c0_15 = arith.constant 0 : index
    %27 = vector.load %arg2[%c0_13, %c0_14, %c0_15] : memref<1x4x64xbf16, #tpu.memory_space<vmem>>, vector<1x4x64xbf16>
    %28 = vector.shape_cast %27 : vector<1x4x64xbf16> to vector<4x64xbf16>
    %c0_16 = arith.constant 0 : index
    %c0_17 = arith.constant 0 : index
    %c0_18 = arith.constant 0 : index
    %29 = vector.load %arg3[%c0_16, %c0_17, %c0_18] : memref<1x4x64xbf16, #tpu.memory_space<vmem>>, vector<1x4x64xbf16>
    %30 = vector.shape_cast %29 : vector<1x4x64xbf16> to vector<4x64xbf16>
    %31 = vector.extract_strided_slice %26 {offsets = [0, 0], sizes = [8, 16], strides = [1, 1]} : vector<8x64xbf16> to vector<8x16xbf16>
    %32 = vector.extract_strided_slice %28 {offsets = [0, 0], sizes = [4, 16], strides = [1, 1]} : vector<4x64xbf16> to vector<4x16xbf16>
    %33 = vector.extract_strided_slice %30 {offsets = [0, 0], sizes = [4, 16], strides = [1, 1]} : vector<4x64xbf16> to vector<4x16xbf16>
    %cst_19 = arith.constant dense<0.000000e+00> : vector<8x4xf32>
    %34 = tpu.matmul %31, %32, %cst_19 {dimension_numbers = #tpu.dot_dimension_numbers<[1], [1], [0], [0], [0, 0, 1, 0], [], []>} : vector<8x16xbf16>, vector<4x16xbf16>, vector<8x4xf32> -> vector<8x4xf32>
    %cst_20 = arith.constant dense<0xFF800000> : vector<8xf32>
    %35 = vector.multi_reduction <maximumf>, %34, %cst_20 [1] : vector<8x4xf32> to vector<8xf32>
    %36 = vector.shape_cast %35 : vector<8xf32> to vector<8x1xf32>
    %37 = vector.broadcast %36 : vector<8x1xf32> to vector<8x4xf32>
    %38 = arith.subf %34, %37 : vector<8x4xf32>
    %39 = math.exp %38 : vector<8x4xf32>
    %cst_21 = arith.constant dense<0.000000e+00> : vector<8xf32>
    %40 = vector.multi_reduction <add>, %39, %cst_21 [1] : vector<8x4xf32> to vector<8xf32>
    %41 = vector.shape_cast %40 : vector<8xf32> to vector<8x1xf32>
    %42 = vector.broadcast %41 : vector<8x1xf32> to vector<8x4xf32>
    %43 = arith.divf %39, %42 : vector<8x4xf32>
    %44 = arith.truncf %43 : vector<8x4xf32> to vector<8x4xbf16>
    %cst_22 = arith.constant dense<0.000000e+00> : vector<8x16xf32>
    %45 = tpu.matmul %44, %33, %cst_22 {dimension_numbers = #tpu.dot_dimension_numbers<[1], [0], [0], [1], [0, 0, 1, 1], [], []>} : vector<8x4xbf16>, vector<4x16xbf16>, vector<8x16xf32> -> vector<8x16xf32>
    %46 = vector.extract_strided_slice %26 {offsets = [0, 16], sizes = [8, 16], strides = [1, 1]} : vector<8x64xbf16> to vector<8x16xbf16>
    %47 = vector.extract_strided_slice %28 {offsets = [0, 16], sizes = [4, 16], strides = [1, 1]} : vector<4x64xbf16> to vector<4x16xbf16>
    %48 = vector.extract_strided_slice %30 {offsets = [0, 16], sizes = [4, 16], strides = [1, 1]} : vector<4x64xbf16> to vector<4x16xbf16>
    %cst_23 = arith.constant dense<0.000000e+00> : vector<8x4xf32>
    %49 = tpu.matmul %46, %47, %cst_23 {dimension_numbers = #tpu.dot_dimension_numbers<[1], [1], [0], [0], [0, 0, 1, 0], [], []>} : vector<8x16xbf16>, vector<4x16xbf16>, vector<8x4xf32> -> vector<8x4xf32>
    %cst_24 = arith.constant dense<0xFF800000> : vector<8xf32>
    %50 = vector.multi_reduction <maximumf>, %49, %cst_24 [1] : vector<8x4xf32> to vector<8xf32>
    %51 = vector.shape_cast %50 : vector<8xf32> to vector<8x1xf32>
    %52 = vector.broadcast %51 : vector<8x1xf32> to vector<8x4xf32>
    %53 = arith.subf %49, %52 : vector<8x4xf32>
    %54 = math.exp %53 : vector<8x4xf32>
    %cst_25 = arith.constant dense<0.000000e+00> : vector<8xf32>
    %55 = vector.multi_reduction <add>, %54, %cst_25 [1] : vector<8x4xf32> to vector<8xf32>
    %56 = vector.shape_cast %55 : vector<8xf32> to vector<8x1xf32>
    %57 = vector.broadcast %56 : vector<8x1xf32> to vector<8x4xf32>
    %58 = arith.divf %54, %57 : vector<8x4xf32>
    %59 = arith.truncf %58 : vector<8x4xf32> to vector<8x4xbf16>
    %cst_26 = arith.constant dense<0.000000e+00> : vector<8x16xf32>
    %60 = tpu.matmul %59, %48, %cst_26 {dimension_numbers = #tpu.dot_dimension_numbers<[1], [0], [0], [1], [0, 0, 1, 1], [], []>} : vector<8x4xbf16>, vector<4x16xbf16>, vector<8x16xf32> -> vector<8x16xf32>
    %61 = vector.extract_strided_slice %26 {offsets = [0, 32], sizes = [8, 16], strides = [1, 1]} : vector<8x64xbf16> to vector<8x16xbf16>
    %62 = vector.extract_strided_slice %28 {offsets = [0, 32], sizes = [4, 16], strides = [1, 1]} : vector<4x64xbf16> to vector<4x16xbf16>
    %63 = vector.extract_strided_slice %30 {offsets = [0, 32], sizes = [4, 16], strides = [1, 1]} : vector<4x64xbf16> to vector<4x16xbf16>
    %cst_27 = arith.constant dense<0.000000e+00> : vector<8x4xf32>
    %64 = tpu.matmul %61, %62, %cst_27 {dimension_numbers = #tpu.dot_dimension_numbers<[1], [1], [0], [0], [0, 0, 1, 0], [], []>} : vector<8x16xbf16>, vector<4x16xbf16>, vector<8x4xf32> -> vector<8x4xf32>
    %cst_28 = arith.constant dense<0xFF800000> : vector<8xf32>
    %65 = vector.multi_reduction <maximumf>, %64, %cst_28 [1] : vector<8x4xf32> to vector<8xf32>
    %66 = vector.shape_cast %65 : vector<8xf32> to vector<8x1xf32>
    %67 = vector.broadcast %66 : vector<8x1xf32> to vector<8x4xf32>
    %68 = arith.subf %64, %67 : vector<8x4xf32>
    %69 = math.exp %68 : vector<8x4xf32>
    %cst_29 = arith.constant dense<0.000000e+00> : vector<8xf32>
    %70 = vector.multi_reduction <add>, %69, %cst_29 [1] : vector<8x4xf32> to vector<8xf32>
    %71 = vector.shape_cast %70 : vector<8xf32> to vector<8x1xf32>
    %72 = vector.broadcast %71 : vector<8x1xf32> to vector<8x4xf32>
    %73 = arith.divf %69, %72 : vector<8x4xf32>
    %74 = arith.truncf %73 : vector<8x4xf32> to vector<8x4xbf16>
    %cst_30 = arith.constant dense<0.000000e+00> : vector<8x16xf32>
    %75 = tpu.matmul %74, %63, %cst_30 {dimension_numbers = #tpu.dot_dimension_numbers<[1], [0], [0], [1], [0, 0, 1, 1], [], []>} : vector<8x4xbf16>, vector<4x16xbf16>, vector<8x16xf32> -> vector<8x16xf32>
    %76 = vector.extract_strided_slice %26 {offsets = [0, 48], sizes = [8, 16], strides = [1, 1]} : vector<8x64xbf16> to vector<8x16xbf16>
    %77 = vector.extract_strided_slice %28 {offsets = [0, 48], sizes = [4, 16], strides = [1, 1]} : vector<4x64xbf16> to vector<4x16xbf16>
    %78 = vector.extract_strided_slice %30 {offsets = [0, 48], sizes = [4, 16], strides = [1, 1]} : vector<4x64xbf16> to vector<4x16xbf16>
    %cst_31 = arith.constant dense<0.000000e+00> : vector<8x4xf32>
    %79 = tpu.matmul %76, %77, %cst_31 {dimension_numbers = #tpu.dot_dimension_numbers<[1], [1], [0], [0], [0, 0, 1, 0], [], []>} : vector<8x16xbf16>, vector<4x16xbf16>, vector<8x4xf32> -> vector<8x4xf32>
    %cst_32 = arith.constant dense<0xFF800000> : vector<8xf32>
    %80 = vector.multi_reduction <maximumf>, %79, %cst_32 [1] : vector<8x4xf32> to vector<8xf32>
    %81 = vector.shape_cast %80 : vector<8xf32> to vector<8x1xf32>
    %82 = vector.broadcast %81 : vector<8x1xf32> to vector<8x4xf32>
    %83 = arith.subf %79, %82 : vector<8x4xf32>
    %84 = math.exp %83 : vector<8x4xf32>
    %cst_33 = arith.constant dense<0.000000e+00> : vector<8xf32>
    %85 = vector.multi_reduction <add>, %84, %cst_33 [1] : vector<8x4xf32> to vector<8xf32>
    %86 = vector.shape_cast %85 : vector<8xf32> to vector<8x1xf32>
    %87 = vector.broadcast %86 : vector<8x1xf32> to vector<8x4xf32>
    %88 = arith.divf %84, %87 : vector<8x4xf32>
    %89 = arith.truncf %88 : vector<8x4xf32> to vector<8x4xbf16>
    %cst_34 = arith.constant dense<0.000000e+00> : vector<8x16xf32>
    %90 = tpu.matmul %89, %78, %cst_34 {dimension_numbers = #tpu.dot_dimension_numbers<[1], [0], [0], [1], [0, 0, 1, 1], [], []>} : vector<8x4xbf16>, vector<4x16xbf16>, vector<8x16xf32> -> vector<8x16xf32>
    %91 = tpu.concatenate %45, %60, %75, %90 in 1 : vector<8x16xf32>, vector<8x16xf32>, vector<8x16xf32>, vector<8x16xf32> -> vector<8x64xf32>
    %92 = arith.truncf %91 : vector<8x64xf32> to vector<8x64xbf16>
    %c0_35 = arith.constant 0 : index
    %c0_36 = arith.constant 0 : index
    %93 = vector.load %arg4[%c0_35, %c0_36] : memref<64x64xbf16, #tpu.memory_space<vmem>>, vector<64x64xbf16>
    %cst_37 = arith.constant dense<0.000000e+00> : vector<8x64xf32>
    %94 = tpu.matmul %92, %93, %cst_37 {dimension_numbers = #tpu.dot_dimension_numbers<[1], [0], [0], [1], [0, 0, 1, 1], [], []>} : vector<8x64xbf16>, vector<64x64xbf16>, vector<8x64xf32> -> vector<8x64xf32>
    %c0_38 = arith.constant 0 : index
    %c0_39 = arith.constant 0 : index
    %95 = vector.load %arg5[%c0_38, %c0_39] : memref<1x64xf32, #tpu.memory_space<vmem>>, vector<1x64xf32>
    %96 = vector.broadcast %95 : vector<1x64xf32> to vector<8x64xf32>
    %97 = arith.addf %94, %96 : vector<8x64xf32>
    %98 = arith.addf %97, %2 : vector<8x64xf32>
    %99 = arith.addf %98, %24 : vector<8x64xf32>
    %100 = arith.truncf %99 : vector<8x64xf32> to vector<8x64xbf16>
    %c0_40 = arith.constant 0 : index
    %c0_41 = arith.constant 0 : index
    %c0_42 = arith.constant 0 : index
    %101 = vector.load %arg9[%c0_40, %c0_41, %c0_42] : memref<1x8x64xbf16, #tpu.memory_space<vmem>>, vector<1x8x64xbf16>
    %102 = vector.shape_cast %101 : vector<1x8x64xbf16> to vector<8x64xbf16>
    %103 = vector.shape_cast %100 : vector<8x64xbf16> to vector<1x8x64xbf16>
    tpu.vector_store %arg9[%c0_40, %c0_41, %c0_42], %103 {strides = array<i32>} : memref<1x8x64xbf16, #tpu.memory_space<vmem>>, vector<1x8x64xbf16>,
    return
  }
  func.func @transform_0(%arg0: i32) -> (i32, i32, i32) {
    %c0_i32 = arith.constant 0 : i32
    %c0_i32_0 = arith.constant 0 : i32
    %c0_i32_1 = arith.constant 0 : i32
    return %arg0, %c0_i32, %c0_i32_0 : i32, i32, i32
  }
  func.func @transform_1(%arg0: i32) -> (i32, i32, i32) {
    %c0_i32 = arith.constant 0 : i32
    %c0_i32_0 = arith.constant 0 : i32
    %c0_i32_1 = arith.constant 0 : i32
    return %arg0, %c0_i32, %c0_i32_0 : i32, i32, i32
  }
  func.func @transform_2(%arg0: i32) -> (i32, i32, i32) {
    %c0_i32 = arith.constant 0 : i32
    %c0_i32_0 = arith.constant 0 : i32
    %c0_i32_1 = arith.constant 0 : i32
    return %arg0, %c0_i32, %c0_i32_0 : i32, i32, i32
  }
  func.func @transform_3(%arg0: i32) -> (i32, i32) {
    %c0_i32 = arith.constant 0 : i32
    %c0_i32_0 = arith.constant 0 : i32
    %c0_i32_1 = arith.constant 0 : i32
    return %c0_i32, %c0_i32_0 : i32, i32
  }
  func.func @transform_4(%arg0: i32) -> (i32, i32) {
    %c0_i32 = arith.constant 0 : i32
    %c0_i32_0 = arith.constant 0 : i32
    %c0_i32_1 = arith.constant 0 : i32
    return %c0_i32, %c0_i32_0 : i32, i32
  }
  func.func @transform_5(%arg0: i32) -> (i32, i32, i32) {
    %c0_i32 = arith.constant 0 : i32
    %c0_i32_0 = arith.constant 0 : i32
    %c0_i32_1 = arith.constant 0 : i32
    return %arg0, %c0_i32, %c0_i32_0 : i32, i32, i32
  }
  func.func @transform_6(%arg0: i32) -> (i32, i32) {
    %c0_i32 = arith.constant 0 : i32
    %c0_i32_0 = arith.constant 0 : i32
    %c0_i32_1 = arith.constant 0 : i32
    return %c0_i32, %c0_i32_0 : i32, i32
  }
  func.func @transform_7(%arg0: i32) -> (i32, i32) {
    %c0_i32 = arith.constant 0 : i32
    %c0_i32_0 = arith.constant 0 : i32
    %c0_i32_1 = arith.constant 0 : i32
    return %c0_i32, %c0_i32_0 : i32, i32
  }
  func.func @transform_8(%arg0: i32) -> (i32, i32, i32) {
    %c0_i32 = arith.constant 0 : i32
    %c0_i32_0 = arith.constant 0 : i32
    %c0_i32_1 = arith.constant 0 : i32
    return %arg0, %c0_i32, %c0_i32_0 : i32, i32, i32
  }
}

module attributes {stable_mosaic.version = 11 : i64} {
  func.func @_fused_linear_kernel(%arg0: i32, %arg1: i32, %arg2: i32, %arg3: memref<16x64xbf16, #tpu.memory_space<vmem>>, %arg4: memref<64x128xbf16, #tpu.memory_space<vmem>>, %arg5: memref<1x128xf32, #tpu.memory_space<vmem>>, %arg6: memref<1x64xf32, #tpu.memory_space<vmem>>, %arg7: memref<1x64xf32, #tpu.memory_space<vmem>>, %arg8: memref<16x128xbf16, #tpu.memory_space<vmem>>, %arg9: memref<16x128xf32, #tpu.memory_space<vmem>>, %arg10: memref<16x64xbf16, #tpu.memory_space<vmem>>) attributes {dimension_semantics = [#tpu.dimension_semantics<parallel>, #tpu.dimension_semantics<arbitrary>, #tpu.dimension_semantics<arbitrary>], iteration_bounds = array<i64: 1, 2, 1>, scalar_prefetch = 0 : i64, scratch_operands = 2 : i64, tpu.core_type = #tpu.core_type<tc>, window_params = [{transform_indices = @transform_0, window_bounds = array<i64: 16, 64>}, {transform_indices = @transform_1, window_bounds = array<i64: 64, 128>}, {transform_indices = @transform_2, window_bounds = array<i64: 1, 128>}, {transform_indices = @transform_3, window_bounds = array<i64: 1, 64>}, {transform_indices = @transform_4, window_bounds = array<i64: 1, 64>}, {transform_indices = @transform_5, window_bounds = array<i64: 16, 128>}]} {
    %c0_i32 = arith.constant 0 : i32
    %0 = arith.cmpi eq, %arg2, %c0_i32 : i32
    %1 = arith.extui %0 : i1 to i32
    %c0_i32_0 = arith.constant 0 : i32
    %2 = arith.cmpi ne, %1, %c0_i32_0 : i32
    scf.if %2 {
      %cst_12 = arith.constant 0.000000e+00 : f32
      %15 = vector.broadcast %cst_12 : f32 to vector<16x128xf32>
      %c0_13 = arith.constant 0 : index
      %c0_14 = arith.constant 0 : index
      %16 = vector.load %arg9[%c0_13, %c0_14] : memref<16x128xf32, #tpu.memory_space<vmem>>, vector<16x128xf32>
      tpu.vector_store %arg9[%c0_13, %c0_14], %15 {strides = array<i32>} : memref<16x128xf32, #tpu.memory_space<vmem>>, vector<16x128xf32>,
    } else {
    }
    %c0_i32_1 = arith.constant 0 : i32
    %3 = arith.cmpi eq, %arg1, %c0_i32_1 : i32
    %4 = arith.extui %3 : i1 to i32
    %c0_i32_2 = arith.constant 0 : i32
    %5 = arith.cmpi ne, %4, %c0_i32_2 : i32
    scf.if %5 {
      %c0_12 = arith.constant 0 : index
      %c0_13 = arith.constant 0 : index
      %15 = vector.load %arg3[%c0_12, %c0_13] : memref<16x64xbf16, #tpu.memory_space<vmem>>, vector<16x64xbf16>
      %16 = arith.extf %15 : vector<16x64xbf16> to vector<16x64xf32>
      %c0_14 = arith.constant 0 : index
      %c0_15 = arith.constant 0 : index
      %17 = vector.load %arg6[%c0_14, %c0_15] : memref<1x64xf32, #tpu.memory_space<vmem>>, vector<1x64xf32>
      %c0_16 = arith.constant 0 : index
      %c0_17 = arith.constant 0 : index
      %18 = vector.load %arg7[%c0_16, %c0_17] : memref<1x64xf32, #tpu.memory_space<vmem>>, vector<1x64xf32>
      %cst_18 = arith.constant dense<0.000000e+00> : vector<16xf32>
      %19 = vector.multi_reduction <add>, %16, %cst_18 [1] : vector<16x64xf32> to vector<16xf32>
      %20 = vector.shape_cast %19 : vector<16xf32> to vector<16x1xf32>
      %cst_19 = arith.constant 6.400000e+01 : f32
      %21 = vector.broadcast %cst_19 : f32 to vector<16x1xf32>
      %22 = arith.divf %20, %21 : vector<16x1xf32>
      %23 = vector.broadcast %22 : vector<16x1xf32> to vector<16x64xf32>
      %24 = arith.subf %16, %23 : vector<16x64xf32>
      %25 = arith.mulf %24, %24 : vector<16x64xf32>
      %cst_20 = arith.constant dense<0.000000e+00> : vector<16xf32>
      %26 = vector.multi_reduction <add>, %25, %cst_20 [1] : vector<16x64xf32> to vector<16xf32>
      %27 = vector.shape_cast %26 : vector<16xf32> to vector<16x1xf32>
      %cst_21 = arith.constant 6.400000e+01 : f32
      %28 = vector.broadcast %cst_21 : f32 to vector<16x1xf32>
      %29 = arith.divf %27, %28 : vector<16x1xf32>
      %cst_22 = arith.constant 9.99999997E-7 : f32
      %30 = vector.broadcast %cst_22 : f32 to vector<16x1xf32>
      %31 = arith.addf %29, %30 : vector<16x1xf32>
      %32 = math.rsqrt %31 : vector<16x1xf32>
      %33 = vector.broadcast %32 : vector<16x1xf32> to vector<16x64xf32>
      %34 = arith.mulf %24, %33 : vector<16x64xf32>
      %35 = vector.broadcast %17 : vector<1x64xf32> to vector<16x64xf32>
      %36 = arith.mulf %34, %35 : vector<16x64xf32>
      %37 = vector.broadcast %18 : vector<1x64xf32> to vector<16x64xf32>
      %38 = arith.addf %36, %37 : vector<16x64xf32>
      %39 = arith.truncf %38 : vector<16x64xf32> to vector<16x64xbf16>
      %c0_23 = arith.constant 0 : index
      %c0_24 = arith.constant 0 : index
      %40 = vector.load %arg10[%c0_23, %c0_24] : memref<16x64xbf16, #tpu.memory_space<vmem>>, vector<16x64xbf16>
      tpu.vector_store %arg10[%c0_23, %c0_24], %39 {strides = array<i32>} : memref<16x64xbf16, #tpu.memory_space<vmem>>, vector<16x64xbf16>,
    } else {
    }
    %c0 = arith.constant 0 : index
    %c0_3 = arith.constant 0 : index
    %6 = vector.load %arg10[%c0, %c0_3] : memref<16x64xbf16, #tpu.memory_space<vmem>>, vector<16x64xbf16>
    %c0_4 = arith.constant 0 : index
    %c0_5 = arith.constant 0 : index
    %7 = vector.load %arg9[%c0_4, %c0_5] : memref<16x128xf32, #tpu.memory_space<vmem>>, vector<16x128xf32>
    %c0_6 = arith.constant 0 : index
    %c0_7 = arith.constant 0 : index
    %8 = vector.load %arg4[%c0_6, %c0_7] : memref<64x128xbf16, #tpu.memory_space<vmem>>, vector<64x128xbf16>
    %cst = arith.constant dense<0.000000e+00> : vector<16x128xf32>
    %9 = tpu.matmul %6, %8, %cst {dimension_numbers = #tpu.dot_dimension_numbers<[1], [0], [0], [1], [0, 0, 1, 1], [], []>} : vector<16x64xbf16>, vector<64x128xbf16>, vector<16x128xf32> -> vector<16x128xf32>
    %10 = arith.addf %7, %9 : vector<16x128xf32>
    %c0_8 = arith.constant 0 : index
    %c0_9 = arith.constant 0 : index
    %11 = vector.load %arg9[%c0_8, %c0_9] : memref<16x128xf32, #tpu.memory_space<vmem>>, vector<16x128xf32>
    tpu.vector_store %arg9[%c0_8, %c0_9], %10 {strides = array<i32>} : memref<16x128xf32, #tpu.memory_space<vmem>>, vector<16x128xf32>,
    %c0_i32_10 = arith.constant 0 : i32
    %12 = arith.cmpi eq, %arg2, %c0_i32_10 : i32
    %13 = arith.extui %12 : i1 to i32
    %c0_i32_11 = arith.constant 0 : i32
    %14 = arith.cmpi ne, %13, %c0_i32_11 : i32
    scf.if %14 {
      %c0_12 = arith.constant 0 : index
      %c0_13 = arith.constant 0 : index
      %15 = vector.load %arg9[%c0_12, %c0_13] : memref<16x128xf32, #tpu.memory_space<vmem>>, vector<16x128xf32>
      %c0_14 = arith.constant 0 : index
      %c0_15 = arith.constant 0 : index
      %16 = vector.load %arg5[%c0_14, %c0_15] : memref<1x128xf32, #tpu.memory_space<vmem>>, vector<1x128xf32>
      %17 = vector.broadcast %16 : vector<1x128xf32> to vector<16x128xf32>
      %18 = arith.addf %15, %17 : vector<16x128xf32>
      %cst_16 = arith.constant 5.000000e-01 : f32
      %19 = vector.broadcast %cst_16 : f32 to vector<16x128xf32>
      %20 = arith.mulf %19, %18 : vector<16x128xf32>
      %cst_17 = arith.constant 4.471500e-02 : f32
      %21 = vector.broadcast %cst_17 : f32 to vector<16x128xf32>
      %22 = arith.mulf %21, %18 : vector<16x128xf32>
      %23 = arith.mulf %22, %18 : vector<16x128xf32>
      %24 = arith.mulf %23, %18 : vector<16x128xf32>
      %25 = arith.addf %18, %24 : vector<16x128xf32>
      %cst_18 = arith.constant 0.797884583 : f32
      %26 = vector.broadcast %cst_18 : f32 to vector<16x128xf32>
      %27 = arith.mulf %26, %25 : vector<16x128xf32>
      %28 = math.tanh %27 : vector<16x128xf32>
      %cst_19 = arith.constant 1.000000e+00 : f32
      %29 = vector.broadcast %cst_19 : f32 to vector<16x128xf32>
      %30 = arith.addf %29, %28 : vector<16x128xf32>
      %31 = arith.mulf %20, %30 : vector<16x128xf32>
      %32 = arith.truncf %31 : vector<16x128xf32> to vector<16x128xbf16>
      %c0_20 = arith.constant 0 : index
      %c0_21 = arith.constant 0 : index
      %33 = vector.load %arg8[%c0_20, %c0_21] : memref<16x128xbf16, #tpu.memory_space<vmem>>, vector<16x128xbf16>
      tpu.vector_store %arg8[%c0_20, %c0_21], %32 {strides = array<i32>} : memref<16x128xbf16, #tpu.memory_space<vmem>>, vector<16x128xbf16>,
    } else {
    }
    return
  }
  func.func @transform_0(%arg0: i32, %arg1: i32, %arg2: i32) -> (i32, i32) {
    %c0_i32 = arith.constant 0 : i32
    return %arg0, %arg2 : i32, i32
  }
  func.func @transform_1(%arg0: i32, %arg1: i32, %arg2: i32) -> (i32, i32) {
    %c0_i32 = arith.constant 0 : i32
    return %arg2, %arg1 : i32, i32
  }
  func.func @transform_2(%arg0: i32, %arg1: i32, %arg2: i32) -> (i32, i32) {
    %c0_i32 = arith.constant 0 : i32
    %c0_i32_0 = arith.constant 0 : i32
    return %c0_i32, %arg1 : i32, i32
  }
  func.func @transform_3(%arg0: i32, %arg1: i32, %arg2: i32) -> (i32, i32) {
    %c0_i32 = arith.constant 0 : i32
    %c0_i32_0 = arith.constant 0 : i32
    return %c0_i32, %arg2 : i32, i32
  }
  func.func @transform_4(%arg0: i32, %arg1: i32, %arg2: i32) -> (i32, i32) {
    %c0_i32 = arith.constant 0 : i32
    %c0_i32_0 = arith.constant 0 : i32
    return %c0_i32, %arg2 : i32, i32
  }
  func.func @transform_5(%arg0: i32, %arg1: i32, %arg2: i32) -> (i32, i32) {
    %c0_i32 = arith.constant 0 : i32
    return %arg0, %arg1 : i32, i32
  }
}

module attributes {stable_mosaic.version = 11 : i64} {
  func.func @_fused_linear_kernel(%arg0: i32, %arg1: i32, %arg2: i32, %arg3: memref<16x256xbf16, #tpu.memory_space<vmem>>, %arg4: memref<256x64xbf16, #tpu.memory_space<vmem>>, %arg5: memref<1x64xf32, #tpu.memory_space<vmem>>, %arg6: memref<16x64xbf16, #tpu.memory_space<vmem>>, %arg7: memref<16x64xbf16, #tpu.memory_space<vmem>>, %arg8: memref<16x64xf32, #tpu.memory_space<vmem>>) attributes {dimension_semantics = [#tpu.dimension_semantics<parallel>, #tpu.dimension_semantics<parallel>, #tpu.dimension_semantics<arbitrary>], iteration_bounds = array<i64: 1, 1, 1>, scalar_prefetch = 0 : i64, scratch_operands = 1 : i64, tpu.core_type = #tpu.core_type<tc>, window_params = [{transform_indices = @transform_0, window_bounds = array<i64: 16, 256>}, {transform_indices = @transform_1, window_bounds = array<i64: 256, 64>}, {transform_indices = @transform_2, window_bounds = array<i64: 1, 64>}, {transform_indices = @transform_3, window_bounds = array<i64: 16, 64>}, {transform_indices = @transform_4, window_bounds = array<i64: 16, 64>}]} {
    %c0_i32 = arith.constant 0 : i32
    %0 = arith.cmpi eq, %arg2, %c0_i32 : i32
    %1 = arith.extui %0 : i1 to i32
    %c0_i32_0 = arith.constant 0 : i32
    %2 = arith.cmpi ne, %1, %c0_i32_0 : i32
    scf.if %2 {
      %cst_10 = arith.constant 0.000000e+00 : f32
      %12 = vector.broadcast %cst_10 : f32 to vector<16x64xf32>
      %c0_11 = arith.constant 0 : index
      %c0_12 = arith.constant 0 : index
      %13 = vector.load %arg8[%c0_11, %c0_12] : memref<16x64xf32, #tpu.memory_space<vmem>>, vector<16x64xf32>
      tpu.vector_store %arg8[%c0_11, %c0_12], %12 {strides = array<i32>} : memref<16x64xf32, #tpu.memory_space<vmem>>, vector<16x64xf32>,
    } else {
    }
    %c0 = arith.constant 0 : index
    %c0_1 = arith.constant 0 : index
    %3 = vector.load %arg3[%c0, %c0_1] : memref<16x256xbf16, #tpu.memory_space<vmem>>, vector<16x256xbf16>
    %c0_2 = arith.constant 0 : index
    %c0_3 = arith.constant 0 : index
    %4 = vector.load %arg8[%c0_2, %c0_3] : memref<16x64xf32, #tpu.memory_space<vmem>>, vector<16x64xf32>
    %c0_4 = arith.constant 0 : index
    %c0_5 = arith.constant 0 : index
    %5 = vector.load %arg4[%c0_4, %c0_5] : memref<256x64xbf16, #tpu.memory_space<vmem>>, vector<256x64xbf16>
    %cst = arith.constant dense<0.000000e+00> : vector<16x64xf32>
    %6 = tpu.matmul %3, %5, %cst {dimension_numbers = #tpu.dot_dimension_numbers<[1], [0], [0], [1], [0, 0, 1, 1], [], []>} : vector<16x256xbf16>, vector<256x64xbf16>, vector<16x64xf32> -> vector<16x64xf32>
    %7 = arith.addf %4, %6 : vector<16x64xf32>
    %c0_6 = arith.constant 0 : index
    %c0_7 = arith.constant 0 : index
    %8 = vector.load %arg8[%c0_6, %c0_7] : memref<16x64xf32, #tpu.memory_space<vmem>>, vector<16x64xf32>
    tpu.vector_store %arg8[%c0_6, %c0_7], %7 {strides = array<i32>} : memref<16x64xf32, #tpu.memory_space<vmem>>, vector<16x64xf32>,
    %c0_i32_8 = arith.constant 0 : i32
    %9 = arith.cmpi eq, %arg2, %c0_i32_8 : i32
    %10 = arith.extui %9 : i1 to i32
    %c0_i32_9 = arith.constant 0 : i32
    %11 = arith.cmpi ne, %10, %c0_i32_9 : i32
    scf.if %11 {
      %c0_10 = arith.constant 0 : index
      %c0_11 = arith.constant 0 : index
      %12 = vector.load %arg8[%c0_10, %c0_11] : memref<16x64xf32, #tpu.memory_space<vmem>>, vector<16x64xf32>
      %c0_12 = arith.constant 0 : index
      %c0_13 = arith.constant 0 : index
      %13 = vector.load %arg5[%c0_12, %c0_13] : memref<1x64xf32, #tpu.memory_space<vmem>>, vector<1x64xf32>
      %14 = vector.broadcast %13 : vector<1x64xf32> to vector<16x64xf32>
      %15 = arith.addf %12, %14 : vector<16x64xf32>
      %c0_14 = arith.constant 0 : index
      %c0_15 = arith.constant 0 : index
      %16 = vector.load %arg6[%c0_14, %c0_15] : memref<16x64xbf16, #tpu.memory_space<vmem>>, vector<16x64xbf16>
      %17 = arith.extf %16 : vector<16x64xbf16> to vector<16x64xf32>
      %18 = arith.addf %15, %17 : vector<16x64xf32>
      %19 = arith.truncf %18 : vector<16x64xf32> to vector<16x64xbf16>
      %c0_16 = arith.constant 0 : index
      %c0_17 = arith.constant 0 : index
      %20 = vector.load %arg7[%c0_16, %c0_17] : memref<16x64xbf16, #tpu.memory_space<vmem>>, vector<16x64xbf16>
      tpu.vector_store %arg7[%c0_16, %c0_17], %19 {strides = array<i32>} : memref<16x64xbf16, #tpu.memory_space<vmem>>, vector<16x64xbf16>,
    } else {
    }
    return
  }
  func.func @transform_0(%arg0: i32, %arg1: i32, %arg2: i32) -> (i32, i32) {
    %c0_i32 = arith.constant 0 : i32
    return %arg0, %arg2 : i32, i32
  }
  func.func @transform_1(%arg0: i32, %arg1: i32, %arg2: i32) -> (i32, i32) {
    %c0_i32 = arith.constant 0 : i32
    return %arg2, %arg1 : i32, i32
  }
  func.func @transform_2(%arg0: i32, %arg1: i32, %arg2: i32) -> (i32, i32) {
    %c0_i32 = arith.constant 0 : i32
    %c0_i32_0 = arith.constant 0 : i32
    return %c0_i32, %arg1 : i32, i32
  }
  func.func @transform_3(%arg0: i32, %arg1: i32, %arg2: i32) -> (i32, i32) {
    %c0_i32 = arith.constant 0 : i32
    return %arg0, %arg1 : i32, i32
  }
  func.func @transform_4(%arg0: i32, %arg1: i32, %arg2: i32) -> (i32, i32) {
    %c0_i32 = arith.constant 0 : i32
    return %arg0, %arg1 : i32, i32
  }
}

module attributes {stable_mosaic.version = 11 : i64} {
  func.func @_fused_linear_kernel(%arg0: i32, %arg1: i32, %arg2: i32, %arg3: memref<16x64xbf16, #tpu.memory_space<vmem>>, %arg4: memref<64x128xbf16, #tpu.memory_space<vmem>>, %arg5: memref<1x128xf32, #tpu.memory_space<vmem>>, %arg6: memref<1x64xf32, #tpu.memory_space<vmem>>, %arg7: memref<1x64xf32, #tpu.memory_space<vmem>>, %arg8: memref<16x128xbf16, #tpu.memory_space<vmem>>, %arg9: memref<16x128xf32, #tpu.memory_space<vmem>>, %arg10: memref<16x64xbf16, #tpu.memory_space<vmem>>) attributes {dimension_semantics = [#tpu.dimension_semantics<parallel>, #tpu.dimension_semantics<arbitrary>, #tpu.dimension_semantics<arbitrary>], iteration_bounds = array<i64: 1, 2, 1>, scalar_prefetch = 0 : i64, scratch_operands = 2 : i64, tpu.core_type = #tpu.core_type<tc>, window_params = [{transform_indices = @transform_0, window_bounds = array<i64: 16, 64>}, {transform_indices = @transform_1, window_bounds = array<i64: 64, 128>}, {transform_indices = @transform_2, window_bounds = array<i64: 1, 128>}, {transform_indices = @transform_3, window_bounds = array<i64: 1, 64>}, {transform_indices = @transform_4, window_bounds = array<i64: 1, 64>}, {transform_indices = @transform_5, window_bounds = array<i64: 16, 128>}]} {
    %c0_i32 = arith.constant 0 : i32
    %0 = arith.cmpi eq, %arg2, %c0_i32 : i32
    %1 = arith.extui %0 : i1 to i32
    %c0_i32_0 = arith.constant 0 : i32
    %2 = arith.cmpi ne, %1, %c0_i32_0 : i32
    scf.if %2 {
      %cst_12 = arith.constant 0.000000e+00 : f32
      %15 = vector.broadcast %cst_12 : f32 to vector<16x128xf32>
      %c0_13 = arith.constant 0 : index
      %c0_14 = arith.constant 0 : index
      %16 = vector.load %arg9[%c0_13, %c0_14] : memref<16x128xf32, #tpu.memory_space<vmem>>, vector<16x128xf32>
      tpu.vector_store %arg9[%c0_13, %c0_14], %15 {strides = array<i32>} : memref<16x128xf32, #tpu.memory_space<vmem>>, vector<16x128xf32>,
    } else {
    }
    %c0_i32_1 = arith.constant 0 : i32
    %3 = arith.cmpi eq, %arg1, %c0_i32_1 : i32
    %4 = arith.extui %3 : i1 to i32
    %c0_i32_2 = arith.constant 0 : i32
    %5 = arith.cmpi ne, %4, %c0_i32_2 : i32
    scf.if %5 {
      %c0_12 = arith.constant 0 : index
      %c0_13 = arith.constant 0 : index
      %15 = vector.load %arg3[%c0_12, %c0_13] : memref<16x64xbf16, #tpu.memory_space<vmem>>, vector<16x64xbf16>
      %16 = arith.extf %15 : vector<16x64xbf16> to vector<16x64xf32>
      %c0_14 = arith.constant 0 : index
      %c0_15 = arith.constant 0 : index
      %17 = vector.load %arg6[%c0_14, %c0_15] : memref<1x64xf32, #tpu.memory_space<vmem>>, vector<1x64xf32>
      %c0_16 = arith.constant 0 : index
      %c0_17 = arith.constant 0 : index
      %18 = vector.load %arg7[%c0_16, %c0_17] : memref<1x64xf32, #tpu.memory_space<vmem>>, vector<1x64xf32>
      %cst_18 = arith.constant dense<0.000000e+00> : vector<16xf32>
      %19 = vector.multi_reduction <add>, %16, %cst_18 [1] : vector<16x64xf32> to vector<16xf32>
      %20 = vector.shape_cast %19 : vector<16xf32> to vector<16x1xf32>
      %cst_19 = arith.constant 6.400000e+01 : f32
      %21 = vector.broadcast %cst_19 : f32 to vector<16x1xf32>
      %22 = arith.divf %20, %21 : vector<16x1xf32>
      %23 = vector.broadcast %22 : vector<16x1xf32> to vector<16x64xf32>
      %24 = arith.subf %16, %23 : vector<16x64xf32>
      %25 = arith.mulf %24, %24 : vector<16x64xf32>
      %cst_20 = arith.constant dense<0.000000e+00> : vector<16xf32>
      %26 = vector.multi_reduction <add>, %25, %cst_20 [1] : vector<16x64xf32> to vector<16xf32>
      %27 = vector.shape_cast %26 : vector<16xf32> to vector<16x1xf32>
      %cst_21 = arith.constant 6.400000e+01 : f32
      %28 = vector.broadcast %cst_21 : f32 to vector<16x1xf32>
      %29 = arith.divf %27, %28 : vector<16x1xf32>
      %cst_22 = arith.constant 9.99999997E-7 : f32
      %30 = vector.broadcast %cst_22 : f32 to vector<16x1xf32>
      %31 = arith.addf %29, %30 : vector<16x1xf32>
      %32 = math.rsqrt %31 : vector<16x1xf32>
      %33 = vector.broadcast %32 : vector<16x1xf32> to vector<16x64xf32>
      %34 = arith.mulf %24, %33 : vector<16x64xf32>
      %35 = vector.broadcast %17 : vector<1x64xf32> to vector<16x64xf32>
      %36 = arith.mulf %34, %35 : vector<16x64xf32>
      %37 = vector.broadcast %18 : vector<1x64xf32> to vector<16x64xf32>
      %38 = arith.addf %36, %37 : vector<16x64xf32>
      %39 = arith.truncf %38 : vector<16x64xf32> to vector<16x64xbf16>
      %c0_23 = arith.constant 0 : index
      %c0_24 = arith.constant 0 : index
      %40 = vector.load %arg10[%c0_23, %c0_24] : memref<16x64xbf16, #tpu.memory_space<vmem>>, vector<16x64xbf16>
      tpu.vector_store %arg10[%c0_23, %c0_24], %39 {strides = array<i32>} : memref<16x64xbf16, #tpu.memory_space<vmem>>, vector<16x64xbf16>,
    } else {
    }
    %c0 = arith.constant 0 : index
    %c0_3 = arith.constant 0 : index
    %6 = vector.load %arg10[%c0, %c0_3] : memref<16x64xbf16, #tpu.memory_space<vmem>>, vector<16x64xbf16>
    %c0_4 = arith.constant 0 : index
    %c0_5 = arith.constant 0 : index
    %7 = vector.load %arg9[%c0_4, %c0_5] : memref<16x128xf32, #tpu.memory_space<vmem>>, vector<16x128xf32>
    %c0_6 = arith.constant 0 : index
    %c0_7 = arith.constant 0 : index
    %8 = vector.load %arg4[%c0_6, %c0_7] : memref<64x128xbf16, #tpu.memory_space<vmem>>, vector<64x128xbf16>
    %cst = arith.constant dense<0.000000e+00> : vector<16x128xf32>
    %9 = tpu.matmul %6, %8, %cst {dimension_numbers = #tpu.dot_dimension_numbers<[1], [0], [0], [1], [0, 0, 1, 1], [], []>} : vector<16x64xbf16>, vector<64x128xbf16>, vector<16x128xf32> -> vector<16x128xf32>
    %10 = arith.addf %7, %9 : vector<16x128xf32>
    %c0_8 = arith.constant 0 : index
    %c0_9 = arith.constant 0 : index
    %11 = vector.load %arg9[%c0_8, %c0_9] : memref<16x128xf32, #tpu.memory_space<vmem>>, vector<16x128xf32>
    tpu.vector_store %arg9[%c0_8, %c0_9], %10 {strides = array<i32>} : memref<16x128xf32, #tpu.memory_space<vmem>>, vector<16x128xf32>,
    %c0_i32_10 = arith.constant 0 : i32
    %12 = arith.cmpi eq, %arg2, %c0_i32_10 : i32
    %13 = arith.extui %12 : i1 to i32
    %c0_i32_11 = arith.constant 0 : i32
    %14 = arith.cmpi ne, %13, %c0_i32_11 : i32
    scf.if %14 {
      %c0_12 = arith.constant 0 : index
      %c0_13 = arith.constant 0 : index
      %15 = vector.load %arg9[%c0_12, %c0_13] : memref<16x128xf32, #tpu.memory_space<vmem>>, vector<16x128xf32>
      %c0_14 = arith.constant 0 : index
      %c0_15 = arith.constant 0 : index
      %16 = vector.load %arg5[%c0_14, %c0_15] : memref<1x128xf32, #tpu.memory_space<vmem>>, vector<1x128xf32>
      %17 = vector.broadcast %16 : vector<1x128xf32> to vector<16x128xf32>
      %18 = arith.addf %15, %17 : vector<16x128xf32>
      %cst_16 = arith.constant 5.000000e-01 : f32
      %19 = vector.broadcast %cst_16 : f32 to vector<16x128xf32>
      %20 = arith.mulf %19, %18 : vector<16x128xf32>
      %cst_17 = arith.constant 4.471500e-02 : f32
      %21 = vector.broadcast %cst_17 : f32 to vector<16x128xf32>
      %22 = arith.mulf %21, %18 : vector<16x128xf32>
      %23 = arith.mulf %22, %18 : vector<16x128xf32>
      %24 = arith.mulf %23, %18 : vector<16x128xf32>
      %25 = arith.addf %18, %24 : vector<16x128xf32>
      %cst_18 = arith.constant 0.797884583 : f32
      %26 = vector.broadcast %cst_18 : f32 to vector<16x128xf32>
      %27 = arith.mulf %26, %25 : vector<16x128xf32>
      %28 = math.tanh %27 : vector<16x128xf32>
      %cst_19 = arith.constant 1.000000e+00 : f32
      %29 = vector.broadcast %cst_19 : f32 to vector<16x128xf32>
      %30 = arith.addf %29, %28 : vector<16x128xf32>
      %31 = arith.mulf %20, %30 : vector<16x128xf32>
      %32 = arith.truncf %31 : vector<16x128xf32> to vector<16x128xbf16>
      %c0_20 = arith.constant 0 : index
      %c0_21 = arith.constant 0 : index
      %33 = vector.load %arg8[%c0_20, %c0_21] : memref<16x128xbf16, #tpu.memory_space<vmem>>, vector<16x128xbf16>
      tpu.vector_store %arg8[%c0_20, %c0_21], %32 {strides = array<i32>} : memref<16x128xbf16, #tpu.memory_space<vmem>>, vector<16x128xbf16>,
    } else {
    }
    return
  }
  func.func @transform_0(%arg0: i32, %arg1: i32, %arg2: i32) -> (i32, i32) {
    %c0_i32 = arith.constant 0 : i32
    return %arg0, %arg2 : i32, i32
  }
  func.func @transform_1(%arg0: i32, %arg1: i32, %arg2: i32) -> (i32, i32) {
    %c0_i32 = arith.constant 0 : i32
    return %arg2, %arg1 : i32, i32
  }
  func.func @transform_2(%arg0: i32, %arg1: i32, %arg2: i32) -> (i32, i32) {
    %c0_i32 = arith.constant 0 : i32
    %c0_i32_0 = arith.constant 0 : i32
    return %c0_i32, %arg1 : i32, i32
  }
  func.func @transform_3(%arg0: i32, %arg1: i32, %arg2: i32) -> (i32, i32) {
    %c0_i32 = arith.constant 0 : i32
    %c0_i32_0 = arith.constant 0 : i32
    return %c0_i32, %arg2 : i32, i32
  }
  func.func @transform_4(%arg0: i32, %arg1: i32, %arg2: i32) -> (i32, i32) {
    %c0_i32 = arith.constant 0 : i32
    %c0_i32_0 = arith.constant 0 : i32
    return %c0_i32, %arg2 : i32, i32
  }
  func.func @transform_5(%arg0: i32, %arg1: i32, %arg2: i32) -> (i32, i32) {
    %c0_i32 = arith.constant 0 : i32
    return %arg0, %arg1 : i32, i32
  }
}

module attributes {stable_mosaic.version = 11 : i64} {
  func.func @_fused_linear_kernel(%arg0: i32, %arg1: i32, %arg2: i32, %arg3: memref<16x256xbf16, #tpu.memory_space<vmem>>, %arg4: memref<256x64xbf16, #tpu.memory_space<vmem>>, %arg5: memref<1x64xf32, #tpu.memory_space<vmem>>, %arg6: memref<16x64xbf16, #tpu.memory_space<vmem>>, %arg7: memref<16x64xbf16, #tpu.memory_space<vmem>>, %arg8: memref<16x64xf32, #tpu.memory_space<vmem>>) attributes {dimension_semantics = [#tpu.dimension_semantics<parallel>, #tpu.dimension_semantics<parallel>, #tpu.dimension_semantics<arbitrary>], iteration_bounds = array<i64: 1, 1, 1>, scalar_prefetch = 0 : i64, scratch_operands = 1 : i64, tpu.core_type = #tpu.core_type<tc>, window_params = [{transform_indices = @transform_0, window_bounds = array<i64: 16, 256>}, {transform_indices = @transform_1, window_bounds = array<i64: 256, 64>}, {transform_indices = @transform_2, window_bounds = array<i64: 1, 64>}, {transform_indices = @transform_3, window_bounds = array<i64: 16, 64>}, {transform_indices = @transform_4, window_bounds = array<i64: 16, 64>}]} {
    %c0_i32 = arith.constant 0 : i32
    %0 = arith.cmpi eq, %arg2, %c0_i32 : i32
    %1 = arith.extui %0 : i1 to i32
    %c0_i32_0 = arith.constant 0 : i32
    %2 = arith.cmpi ne, %1, %c0_i32_0 : i32
    scf.if %2 {
      %cst_10 = arith.constant 0.000000e+00 : f32
      %12 = vector.broadcast %cst_10 : f32 to vector<16x64xf32>
      %c0_11 = arith.constant 0 : index
      %c0_12 = arith.constant 0 : index
      %13 = vector.load %arg8[%c0_11, %c0_12] : memref<16x64xf32, #tpu.memory_space<vmem>>, vector<16x64xf32>
      tpu.vector_store %arg8[%c0_11, %c0_12], %12 {strides = array<i32>} : memref<16x64xf32, #tpu.memory_space<vmem>>, vector<16x64xf32>,
    } else {
    }
    %c0 = arith.constant 0 : index
    %c0_1 = arith.constant 0 : index
    %3 = vector.load %arg3[%c0, %c0_1] : memref<16x256xbf16, #tpu.memory_space<vmem>>, vector<16x256xbf16>
    %c0_2 = arith.constant 0 : index
    %c0_3 = arith.constant 0 : index
    %4 = vector.load %arg8[%c0_2, %c0_3] : memref<16x64xf32, #tpu.memory_space<vmem>>, vector<16x64xf32>
    %c0_4 = arith.constant 0 : index
    %c0_5 = arith.constant 0 : index
    %5 = vector.load %arg4[%c0_4, %c0_5] : memref<256x64xbf16, #tpu.memory_space<vmem>>, vector<256x64xbf16>
    %cst = arith.constant dense<0.000000e+00> : vector<16x64xf32>
    %6 = tpu.matmul %3, %5, %cst {dimension_numbers = #tpu.dot_dimension_numbers<[1], [0], [0], [1], [0, 0, 1, 1], [], []>} : vector<16x256xbf16>, vector<256x64xbf16>, vector<16x64xf32> -> vector<16x64xf32>
    %7 = arith.addf %4, %6 : vector<16x64xf32>
    %c0_6 = arith.constant 0 : index
    %c0_7 = arith.constant 0 : index
    %8 = vector.load %arg8[%c0_6, %c0_7] : memref<16x64xf32, #tpu.memory_space<vmem>>, vector<16x64xf32>
    tpu.vector_store %arg8[%c0_6, %c0_7], %7 {strides = array<i32>} : memref<16x64xf32, #tpu.memory_space<vmem>>, vector<16x64xf32>,
    %c0_i32_8 = arith.constant 0 : i32
    %9 = arith.cmpi eq, %arg2, %c0_i32_8 : i32
    %10 = arith.extui %9 : i1 to i32
    %c0_i32_9 = arith.constant 0 : i32
    %11 = arith.cmpi ne, %10, %c0_i32_9 : i32
    scf.if %11 {
      %c0_10 = arith.constant 0 : index
      %c0_11 = arith.constant 0 : index
      %12 = vector.load %arg8[%c0_10, %c0_11] : memref<16x64xf32, #tpu.memory_space<vmem>>, vector<16x64xf32>
      %c0_12 = arith.constant 0 : index
      %c0_13 = arith.constant 0 : index
      %13 = vector.load %arg5[%c0_12, %c0_13] : memref<1x64xf32, #tpu.memory_space<vmem>>, vector<1x64xf32>
      %14 = vector.broadcast %13 : vector<1x64xf32> to vector<16x64xf32>
      %15 = arith.addf %12, %14 : vector<16x64xf32>
      %c0_14 = arith.constant 0 : index
      %c0_15 = arith.constant 0 : index
      %16 = vector.load %arg6[%c0_14, %c0_15] : memref<16x64xbf16, #tpu.memory_space<vmem>>, vector<16x64xbf16>
      %17 = arith.extf %16 : vector<16x64xbf16> to vector<16x64xf32>
      %18 = arith.addf %15, %17 : vector<16x64xf32>
      %19 = arith.truncf %18 : vector<16x64xf32> to vector<16x64xbf16>
      %c0_16 = arith.constant 0 : index
      %c0_17 = arith.constant 0 : index
      %20 = vector.load %arg7[%c0_16, %c0_17] : memref<16x64xbf16, #tpu.memory_space<vmem>>, vector<16x64xbf16>
      tpu.vector_store %arg7[%c0_16, %c0_17], %19 {strides = array<i32>} : memref<16x64xbf16, #tpu.memory_space<vmem>>, vector<16x64xbf16>,
    } else {
    }
    return
  }
  func.func @transform_0(%arg0: i32, %arg1: i32, %arg2: i32) -> (i32, i32) {
    %c0_i32 = arith.constant 0 : i32
    return %arg0, %arg2 : i32, i32
  }
  func.func @transform_1(%arg0: i32, %arg1: i32, %arg2: i32) -> (i32, i32) {
    %c0_i32 = arith.constant 0 : i32
    return %arg2, %arg1 : i32, i32
  }
  func.func @transform_2(%arg0: i32, %arg1: i32, %arg2: i32) -> (i32, i32) {
    %c0_i32 = arith.constant 0 : i32
    %c0_i32_0 = arith.constant 0 : i32
    return %c0_i32, %arg1 : i32, i32
  }
  func.func @transform_3(%arg0: i32, %arg1: i32, %arg2: i32) -> (i32, i32) {
    %c0_i32 = arith.constant 0 : i32
    return %arg0, %arg1 : i32, i32
  }
  func.func @transform_4(%arg0: i32, %arg1: i32, %arg2: i32) -> (i32, i32) {
    %c0_i32 = arith.constant 0 : i32
    return %arg0, %arg1 : i32, i32
  }
}

module attributes {stable_mosaic.version = 11 : i64} {
  func.func @_fused_linear_kernel(%arg0: i32, %arg1: i32, %arg2: i32, %arg3: memref<16x64xbf16, #tpu.memory_space<vmem>>, %arg4: memref<64x128xbf16, #tpu.memory_space<vmem>>, %arg5: memref<1x128xf32, #tpu.memory_space<vmem>>, %arg6: memref<16x128xbf16, #tpu.memory_space<vmem>>, %arg7: memref<16x128xf32, #tpu.memory_space<vmem>>, %arg8: memref<16x64xbf16, #tpu.memory_space<vmem>>) attributes {dimension_semantics = [#tpu.dimension_semantics<parallel>, #tpu.dimension_semantics<arbitrary>, #tpu.dimension_semantics<arbitrary>], iteration_bounds = array<i64: 1, 1, 1>, scalar_prefetch = 0 : i64, scratch_operands = 2 : i64, tpu.core_type = #tpu.core_type<tc>, window_params = [{transform_indices = @transform_0, window_bounds = array<i64: 16, 64>}, {transform_indices = @transform_1, window_bounds = array<i64: 64, 128>}, {transform_indices = @transform_2, window_bounds = array<i64: 1, 128>}, {transform_indices = @transform_3, window_bounds = array<i64: 16, 128>}]} {
    %c0_i32 = arith.constant 0 : i32
    %0 = arith.cmpi eq, %arg2, %c0_i32 : i32
    %1 = arith.extui %0 : i1 to i32
    %c0_i32_0 = arith.constant 0 : i32
    %2 = arith.cmpi ne, %1, %c0_i32_0 : i32
    scf.if %2 {
      %cst_12 = arith.constant 0.000000e+00 : f32
      %15 = vector.broadcast %cst_12 : f32 to vector<16x128xf32>
      %c0_13 = arith.constant 0 : index
      %c0_14 = arith.constant 0 : index
      %16 = vector.load %arg7[%c0_13, %c0_14] : memref<16x128xf32, #tpu.memory_space<vmem>>, vector<16x128xf32>
      tpu.vector_store %arg7[%c0_13, %c0_14], %15 {strides = array<i32>} : memref<16x128xf32, #tpu.memory_space<vmem>>, vector<16x128xf32>,
    } else {
    }
    %c0_i32_1 = arith.constant 0 : i32
    %3 = arith.cmpi eq, %arg1, %c0_i32_1 : i32
    %4 = arith.extui %3 : i1 to i32
    %c0_i32_2 = arith.constant 0 : i32
    %5 = arith.cmpi ne, %4, %c0_i32_2 : i32
    scf.if %5 {
      %c0_12 = arith.constant 0 : index
      %c0_13 = arith.constant 0 : index
      %15 = vector.load %arg3[%c0_12, %c0_13] : memref<16x64xbf16, #tpu.memory_space<vmem>>, vector<16x64xbf16>
      %16 = arith.extf %15 : vector<16x64xbf16> to vector<16x64xf32>
      %17 = arith.negf %16 : vector<16x64xf32>
      %18 = math.exp %17 : vector<16x64xf32>
      %cst_14 = arith.constant 1.000000e+00 : f32
      %19 = vector.broadcast %cst_14 : f32 to vector<16x64xf32>
      %20 = arith.addf %19, %18 : vector<16x64xf32>
      %21 = arith.divf %19, %20 : vector<16x64xf32>
      %22 = arith.mulf %16, %21 : vector<16x64xf32>
      %23 = arith.truncf %22 : vector<16x64xf32> to vector<16x64xbf16>
      %c0_15 = arith.constant 0 : index
      %c0_16 = arith.constant 0 : index
      %24 = vector.load %arg8[%c0_15, %c0_16] : memref<16x64xbf16, #tpu.memory_space<vmem>>, vector<16x64xbf16>
      tpu.vector_store %arg8[%c0_15, %c0_16], %23 {strides = array<i32>} : memref<16x64xbf16, #tpu.memory_space<vmem>>, vector<16x64xbf16>,
    } else {
    }
    %c0 = arith.constant 0 : index
    %c0_3 = arith.constant 0 : index
    %6 = vector.load %arg8[%c0, %c0_3] : memref<16x64xbf16, #tpu.memory_space<vmem>>, vector<16x64xbf16>
    %c0_4 = arith.constant 0 : index
    %c0_5 = arith.constant 0 : index
    %7 = vector.load %arg7[%c0_4, %c0_5] : memref<16x128xf32, #tpu.memory_space<vmem>>, vector<16x128xf32>
    %c0_6 = arith.constant 0 : index
    %c0_7 = arith.constant 0 : index
    %8 = vector.load %arg4[%c0_6, %c0_7] : memref<64x128xbf16, #tpu.memory_space<vmem>>, vector<64x128xbf16>
    %cst = arith.constant dense<0.000000e+00> : vector<16x128xf32>
    %9 = tpu.matmul %6, %8, %cst {dimension_numbers = #tpu.dot_dimension_numbers<[1], [0], [0], [1], [0, 0, 1, 1], [], []>} : vector<16x64xbf16>, vector<64x128xbf16>, vector<16x128xf32> -> vector<16x128xf32>
    %10 = arith.addf %7, %9 : vector<16x128xf32>
    %c0_8 = arith.constant 0 : index
    %c0_9 = arith.constant 0 : index
    %11 = vector.load %arg7[%c0_8, %c0_9] : memref<16x128xf32, #tpu.memory_space<vmem>>, vector<16x128xf32>
    tpu.vector_store %arg7[%c0_8, %c0_9], %10 {strides = array<i32>} : memref<16x128xf32, #tpu.memory_space<vmem>>, vector<16x128xf32>,
    %c0_i32_10 = arith.constant 0 : i32
    %12 = arith.cmpi eq, %arg2, %c0_i32_10 : i32
    %13 = arith.extui %12 : i1 to i32
    %c0_i32_11 = arith.constant 0 : i32
    %14 = arith.cmpi ne, %13, %c0_i32_11 : i32
    scf.if %14 {
      %c0_12 = arith.constant 0 : index
      %c0_13 = arith.constant 0 : index
      %15 = vector.load %arg7[%c0_12, %c0_13] : memref<16x128xf32, #tpu.memory_space<vmem>>, vector<16x128xf32>
      %c0_14 = arith.constant 0 : index
      %c0_15 = arith.constant 0 : index
      %16 = vector.load %arg5[%c0_14, %c0_15] : memref<1x128xf32, #tpu.memory_space<vmem>>, vector<1x128xf32>
      %17 = vector.broadcast %16 : vector<1x128xf32> to vector<16x128xf32>
      %18 = arith.addf %15, %17 : vector<16x128xf32>
      %19 = arith.truncf %18 : vector<16x128xf32> to vector<16x128xbf16>
      %c0_16 = arith.constant 0 : index
      %c0_17 = arith.constant 0 : index
      %20 = vector.load %arg6[%c0_16, %c0_17] : memref<16x128xbf16, #tpu.memory_space<vmem>>, vector<16x128xbf16>
      tpu.vector_store %arg6[%c0_16, %c0_17], %19 {strides = array<i32>} : memref<16x128xbf16, #tpu.memory_space<vmem>>, vector<16x128xbf16>,
    } else {
    }
    return
  }
  func.func @transform_0(%arg0: i32, %arg1: i32, %arg2: i32) -> (i32, i32) {
    %c0_i32 = arith.constant 0 : i32
    return %arg0, %arg2 : i32, i32
  }
  func.func @transform_1(%arg0: i32, %arg1: i32, %arg2: i32) -> (i32, i32) {
    %c0_i32 = arith.constant 0 : i32
    return %arg2, %arg1 : i32, i32
  }
  func.func @transform_2(%arg0: i32, %arg1: i32, %arg2: i32) -> (i32, i32) {
    %c0_i32 = arith.constant 0 : i32
    %c0_i32_0 = arith.constant 0 : i32
    return %c0_i32, %arg1 : i32, i32
  }
  func.func @transform_3(%arg0: i32, %arg1: i32, %arg2: i32) -> (i32, i32) {
    %c0_i32 = arith.constant 0 : i32
    return %arg0, %arg1 : i32, i32
  }
}

module attributes {stable_mosaic.version = 11 : i64} {
  func.func @_fused_linear_kernel(%arg0: i32, %arg1: i32, %arg2: i32, %arg3: memref<16x64xbf16, #tpu.memory_space<vmem>>, %arg4: memref<64x16xbf16, #tpu.memory_space<vmem>>, %arg5: memref<1x16xf32, #tpu.memory_space<vmem>>, %arg6: memref<16x128xbf16, #tpu.memory_space<vmem>>, %arg7: memref<16x16xf32, #tpu.memory_space<vmem>>, %arg8: memref<16x16xf32, #tpu.memory_space<vmem>>, %arg9: memref<16x64xbf16, #tpu.memory_space<vmem>>) attributes {dimension_semantics = [#tpu.dimension_semantics<parallel>, #tpu.dimension_semantics<arbitrary>, #tpu.dimension_semantics<arbitrary>], iteration_bounds = array<i64: 1, 1, 1>, scalar_prefetch = 0 : i64, scratch_operands = 2 : i64, tpu.core_type = #tpu.core_type<tc>, window_params = [{transform_indices = @transform_0, window_bounds = array<i64: 16, 64>}, {transform_indices = @transform_1, window_bounds = array<i64: 64, 16>}, {transform_indices = @transform_2, window_bounds = array<i64: 1, 16>}, {transform_indices = @transform_3, window_bounds = array<i64: 16, 128>}, {transform_indices = @transform_4, window_bounds = array<i64: 16, 16>}]} {
    %c0_i32 = arith.constant 0 : i32
    %0 = arith.cmpi eq, %arg2, %c0_i32 : i32
    %1 = arith.extui %0 : i1 to i32
    %c0_i32_0 = arith.constant 0 : i32
    %2 = arith.cmpi ne, %1, %c0_i32_0 : i32
    scf.if %2 {
      %cst_12 = arith.constant 0.000000e+00 : f32
      %15 = vector.broadcast %cst_12 : f32 to vector<16x16xf32>
      %c0_13 = arith.constant 0 : index
      %c0_14 = arith.constant 0 : index
      %16 = vector.load %arg8[%c0_13, %c0_14] : memref<16x16xf32, #tpu.memory_space<vmem>>, vector<16x16xf32>
      tpu.vector_store %arg8[%c0_13, %c0_14], %15 {strides = array<i32>} : memref<16x16xf32, #tpu.memory_space<vmem>>, vector<16x16xf32>,
    } else {
    }
    %c0_i32_1 = arith.constant 0 : i32
    %3 = arith.cmpi eq, %arg1, %c0_i32_1 : i32
    %4 = arith.extui %3 : i1 to i32
    %c0_i32_2 = arith.constant 0 : i32
    %5 = arith.cmpi ne, %4, %c0_i32_2 : i32
    scf.if %5 {
      %c0_12 = arith.constant 0 : index
      %c0_13 = arith.constant 0 : index
      %15 = vector.load %arg3[%c0_12, %c0_13] : memref<16x64xbf16, #tpu.memory_space<vmem>>, vector<16x64xbf16>
      %16 = arith.extf %15 : vector<16x64xbf16> to vector<16x64xf32>
      %c0_14 = arith.constant 0 : index
      %c0_15 = arith.constant 0 : index
      %17 = vector.load %arg6[%c0_14, %c0_15] : memref<16x128xbf16, #tpu.memory_space<vmem>>, vector<16x128xbf16>
      %18 = arith.extf %17 : vector<16x128xbf16> to vector<16x128xf32>
      %19 = vector.extract_strided_slice %18 {offsets = [0, 0], sizes = [16, 64], strides = [1, 1]} : vector<16x128xf32> to vector<16x64xf32>
      %20 = vector.extract_strided_slice %18 {offsets = [0, 64], sizes = [16, 64], strides = [1, 1]} : vector<16x128xf32> to vector<16x64xf32>
      %cst_16 = arith.constant dense<0.000000e+00> : vector<16xf32>
      %21 = vector.multi_reduction <add>, %16, %cst_16 [1] : vector<16x64xf32> to vector<16xf32>
      %22 = vector.shape_cast %21 : vector<16xf32> to vector<16x1xf32>
      %cst_17 = arith.constant 6.400000e+01 : f32
      %23 = vector.broadcast %cst_17 : f32 to vector<16x1xf32>
      %24 = arith.divf %22, %23 : vector<16x1xf32>
      %25 = vector.broadcast %24 : vector<16x1xf32> to vector<16x64xf32>
      %26 = arith.subf %16, %25 : vector<16x64xf32>
      %27 = arith.mulf %26, %26 : vector<16x64xf32>
      %cst_18 = arith.constant dense<0.000000e+00> : vector<16xf32>
      %28 = vector.multi_reduction <add>, %27, %cst_18 [1] : vector<16x64xf32> to vector<16xf32>
      %29 = vector.shape_cast %28 : vector<16xf32> to vector<16x1xf32>
      %cst_19 = arith.constant 6.400000e+01 : f32
      %30 = vector.broadcast %cst_19 : f32 to vector<16x1xf32>
      %31 = arith.divf %29, %30 : vector<16x1xf32>
      %cst_20 = arith.constant 9.99999997E-7 : f32
      %32 = vector.broadcast %cst_20 : f32 to vector<16x1xf32>
      %33 = arith.addf %31, %32 : vector<16x1xf32>
      %34 = math.rsqrt %33 : vector<16x1xf32>
      %35 = vector.broadcast %34 : vector<16x1xf32> to vector<16x64xf32>
      %36 = arith.mulf %26, %35 : vector<16x64xf32>
      %cst_21 = arith.constant 1.000000e+00 : f32
      %37 = vector.broadcast %cst_21 : f32 to vector<16x64xf32>
      %38 = arith.addf %37, %20 : vector<16x64xf32>
      %39 = arith.mulf %36, %38 : vector<16x64xf32>
      %40 = arith.addf %39, %19 : vector<16x64xf32>
      %41 = arith.truncf %40 : vector<16x64xf32> to vector<16x64xbf16>
      %c0_22 = arith.constant 0 : index
      %c0_23 = arith.constant 0 : index
      %42 = vector.load %arg9[%c0_22, %c0_23] : memref<16x64xbf16, #tpu.memory_space<vmem>>, vector<16x64xbf16>
      tpu.vector_store %arg9[%c0_22, %c0_23], %41 {strides = array<i32>} : memref<16x64xbf16, #tpu.memory_space<vmem>>, vector<16x64xbf16>,
    } else {
    }
    %c0 = arith.constant 0 : index
    %c0_3 = arith.constant 0 : index
    %6 = vector.load %arg9[%c0, %c0_3] : memref<16x64xbf16, #tpu.memory_space<vmem>>, vector<16x64xbf16>
    %c0_4 = arith.constant 0 : index
    %c0_5 = arith.constant 0 : index
    %7 = vector.load %arg8[%c0_4, %c0_5] : memref<16x16xf32, #tpu.memory_space<vmem>>, vector<16x16xf32>
    %c0_6 = arith.constant 0 : index
    %c0_7 = arith.constant 0 : index
    %8 = vector.load %arg4[%c0_6, %c0_7] : memref<64x16xbf16, #tpu.memory_space<vmem>>, vector<64x16xbf16>
    %cst = arith.constant dense<0.000000e+00> : vector<16x16xf32>
    %9 = tpu.matmul %6, %8, %cst {dimension_numbers = #tpu.dot_dimension_numbers<[1], [0], [0], [1], [0, 0, 1, 1], [], []>} : vector<16x64xbf16>, vector<64x16xbf16>, vector<16x16xf32> -> vector<16x16xf32>
    %10 = arith.addf %7, %9 : vector<16x16xf32>
    %c0_8 = arith.constant 0 : index
    %c0_9 = arith.constant 0 : index
    %11 = vector.load %arg8[%c0_8, %c0_9] : memref<16x16xf32, #tpu.memory_space<vmem>>, vector<16x16xf32>
    tpu.vector_store %arg8[%c0_8, %c0_9], %10 {strides = array<i32>} : memref<16x16xf32, #tpu.memory_space<vmem>>, vector<16x16xf32>,
    %c0_i32_10 = arith.constant 0 : i32
    %12 = arith.cmpi eq, %arg2, %c0_i32_10 : i32
    %13 = arith.extui %12 : i1 to i32
    %c0_i32_11 = arith.constant 0 : i32
    %14 = arith.cmpi ne, %13, %c0_i32_11 : i32
    scf.if %14 {
      %c0_12 = arith.constant 0 : index
      %c0_13 = arith.constant 0 : index
      %15 = vector.load %arg8[%c0_12, %c0_13] : memref<16x16xf32, #tpu.memory_space<vmem>>, vector<16x16xf32>
      %c0_14 = arith.constant 0 : index
      %c0_15 = arith.constant 0 : index
      %16 = vector.load %arg5[%c0_14, %c0_15] : memref<1x16xf32, #tpu.memory_space<vmem>>, vector<1x16xf32>
      %17 = vector.broadcast %16 : vector<1x16xf32> to vector<16x16xf32>
      %18 = arith.addf %15, %17 : vector<16x16xf32>
      %c0_16 = arith.constant 0 : index
      %c0_17 = arith.constant 0 : index
      %19 = vector.load %arg7[%c0_16, %c0_17] : memref<16x16xf32, #tpu.memory_space<vmem>>, vector<16x16xf32>
      tpu.vector_store %arg7[%c0_16, %c0_17], %18 {strides = array<i32>} : memref<16x16xf32, #tpu.memory_space<vmem>>, vector<16x16xf32>,
    } else {
    }
    return
  }
  func.func @transform_0(%arg0: i32, %arg1: i32, %arg2: i32) -> (i32, i32) {
    %c0_i32 = arith.constant 0 : i32
    return %arg0, %arg2 : i32, i32
  }
  func.func @transform_1(%arg0: i32, %arg1: i32, %arg2: i32) -> (i32, i32) {
    %c0_i32 = arith.constant 0 : i32
    return %arg2, %arg1 : i32, i32
  }
  func.func @transform_2(%arg0: i32, %arg1: i32, %arg2: i32) -> (i32, i32) {
    %c0_i32 = arith.constant 0 : i32
    %c0_i32_0 = arith.constant 0 : i32
    return %c0_i32, %arg1 : i32, i32
  }
  func.func @transform_3(%arg0: i32, %arg1: i32, %arg2: i32) -> (i32, i32) {
    %c0_i32 = arith.constant 0 : i32
    %c0_i32_0 = arith.constant 0 : i32
    return %arg0, %c0_i32 : i32, i32
  }
  func.func @transform_4(%arg0: i32, %arg1: i32, %arg2: i32) -> (i32, i32) {
    %c0_i32 = arith.constant 0 : i32
    return %arg0, %arg1 : i32, i32
  }
}

</mosaic_0001>

<bundles_post_ra>
// kernel: _lambda_.21
= control target key start
LH: loop header
LB: loop body
LE: loop exit
PB: predicated region body
PF: predicated region fallthrough
CT: control target
= control target key end

     0   :  { %8 = vsyncpa [#allocation4], 0  ;;  %s333_s12 = smov [#allocation3]   ;;  %s421_s0 = inlined_call_operand.vmem [shape: f32[2,256], index: 0, kind: input, shape index: {}]   ;;  %s422_s1 = inlined_call_operand.vmem [shape: bf16[256,64], index: 1, kind: input, shape index: {}]   ;;  %s423_s2 = inlined_call_operand.hbm [shape: f32[1,64], index: 2, kind: input, shape index: {}]   ;;  %s424_s3 = inlined_call_operand.vmem [shape: bf16[2,64], index: 3, kind: output, shape index: {}]  }
   0x1   :  { %s19_s13 = sshll.u32 %s333_s12, 4  ;;  %s309_s16 = scalar_lea.hbm %s423_s2, 16  ;;  %s20_s13 = int_to_ptr.vmem [resolvable:$true] %s19_s13 }
   0x2   :  { %p310_p0 = scmp.ne.s32.totalorder %s423_s2, %s309_s16  ;;  %p313_p1 = scmp.lt.u32.totalorder %s309_s16, %s423_s2 }
   0x4   :  { %p315_p2 = pnand %p313_p1, %p310_p0 }
   0x6   :  { %318 = shalt.err (!%p315_p2)
}
   0x7   :  { %s319_s21 = scalar_lea.vmem %s20_s13, 16  ;;  %s323_s22 = scalar_lea.vmem %s20_s13, 32 }
   0x8   :  { %p320_p3 = scmp.ne.s32.totalorder %s20_s13, %s319_s21  ;;  %p324_p4 = scmp.lt.s32.totalorder %s20_s13, %s20_s13 }
   0x9   :  { %p325_p5 = scmp.lt.s32.totalorder %s323_s22, %s319_s21 }
   0xb   :  { %p326_p6 = por %p325_p5, %p324_p4 }
   0xd   :  { %p327_p7 = pnand %p326_p6, %p320_p3 }
   0xf   :  { %330 = shalt.err (!%p327_p7)
}
  0x10   :  { %22 = dma.hbm_to_vmem [thread:$0]  %s423_s2, 16, %s20_s13, [#allocation4]  }
  0x11   :  { %331 = dma.done.wait [#allocation4], 16  }
  0x12   :  { %332 = vsyncadd [#allocation4], 4294967280  ;;  %v289_v0 = vld [vmem:[%s422_s1 + $0x40] sm:$0xff]   ;;  %v291_v2 = vld [vmem:[%s422_s1 + $0x48] sm:$0xff]   ;;  %vm31_vm0 = vcmask 517120   ;;  %v334_v20 = vmov 0.0  }
  0x13   :  { %v290_v1 = vld [vmem:[%s422_s1] sm:$0xff]   ;;  %265 = vmatprep.subr.bf16.mxu0 %v289_v0  ;;  %v292_v3 = vld [vmem:[%s422_s1 + $0x8] sm:$0xff]   ;;  %v293_v4 = vld [vmem:[%s422_s1 + $0x50] sm:$0xff]   ;;  %32 = vst.msk [vmem:[#allocation2] sm:$0x3] %vm31_vm0, %v334_v20  ;;  %vm239_vm1 = vcmask 516096  }
  0x14   :  { %266 = vmatpush3.bf16.msra.mxu0 %v290_v1  ;;  %v294_v5 = vld [vmem:[%s422_s1 + $0x10] sm:$0xff]   ;;  %v295_v6 = vld [vmem:[%s422_s1 + $0x58] sm:$0xff]   ;;  %v297_v8 = vld [vmem:[%s422_s1 + $0x60] sm:$0xff]  }
  0x15   :  { %267 = vmatprep.subr.bf16.mxu0 %v291_v2  ;;  %v296_v7 = vld [vmem:[%s422_s1 + $0x18] sm:$0xff]   ;;  %v298_v9 = vld [vmem:[%s422_s1 + $0x20] sm:$0xff]   ;;  %v299_v10 = vld [vmem:[%s422_s1 + $0x68] sm:$0xff]  }
  0x16   :  { %v246_v11 = vld.sshfl [vmem:[%s421_s0] sm:$0x33 pattern:$0x76325410]  ;;  %v300_v13 = vld [vmem:[%s422_s1 + $0x28] sm:$0xff]   ;;  %v301_v15 = vld [vmem:[%s422_s1 + $0x70] sm:$0xff]  }
  0x17   :  { %v42_v12 = vcombine.high %v246_v11, %v246_v11  ;;  %v302_v16 = vld [vmem:[%s422_s1 + $0x30] sm:$0xff]   ;;  %v303_v17 = vld [vmem:[%s422_s1 + $0x78] sm:$0xff]   ;;  %v45_v19 = vpack.c.bf16 %v246_v11, %v246_v11  ;;  %v263_v28 = vld [vmem:[#allocation3] ss:$0 sm:$0xff] }
  0x18   :  { %268 = vmatpush3.bf16.msra.mxu0 %v292_v3  ;;  %v304_v18 = vld [vmem:[%s422_s1 + $0x38] sm:$0xff]  }
  0x19   :  { %269 = vmatprep.subr.bf16.mxu0 %v293_v4  ;;  %v46_v14 = vpack.c.bf16 %v42_v12, %v42_v12 }
  0x1a   :  { %v47_v22 = vld [vmem:[#allocation2] sm:$0x3] }
  0x1b   :  { %208 = vmatprep.mubr.bf16.mxu0 %v46_v14 }
  0x1c   :  { %270 = vmatpush3.bf16.msra.mxu0 %v294_v5 }
  0x1d   :  { %271 = vmatprep.subr.bf16.mxu0 %v295_v6 }
  0x20   :  { %272 = vmatpush3.bf16.msra.mxu0 %v296_v7 }
  0x21   :  { %273 = vmatprep.subr.bf16.mxu0 %v297_v8 }
  0x24   :  { %274 = vmatpush3.bf16.msra.mxu0 %v298_v9 }
  0x25   :  { %275 = vmatprep.subr.bf16.mxu0 %v299_v10 }
  0x28   :  { %276 = vmatpush3.bf16.msra.mxu0 %v300_v13 }
  0x29   :  { %277 = vmatprep.subr.bf16.mxu0 %v301_v15 }
  0x2c   :  { %278 = vmatpush3.bf16.msra.mxu0 %v302_v16 }
  0x2d   :  { %279 = vmatprep.subr.bf16.mxu0 %v303_v17 }
  0x30   :  { %280 = vmatpush3.bf16.msra.mxu0 %v304_v18 }
  0x33   :  { %209 = vmatmul.mubr.bf16.vlgmr.msra.gmra.mrb[0].mxu0 %v45_v19 }
 0x106   :  { %v281_v21 = vpop.f32.mrb[0].mxu0 }
 0x107   :  { %v282_v23 = vpop.f32.mrb[1].mxu0 }
 0x108   :  { %v283_v24 = vadd.f32 %v282_v23, %v281_v21  ;;  %v284_v25 = vpop.f32.mrb[2].mxu0 }
 0x109   :  { %v285_v26 = vpop.f32.mrb[3].mxu0 }
 0x10a   :  { %v216_v27 = vadd.f32 %v283_v24, %v47_v22 }
 0x10c   :  { %218 = vst.msk [vmem:[#allocation2] sm:$0x3] %vm31_vm0, %v216_v27 }
 0x113   :  { %v222_v29 = vld [vmem:[#allocation2] sm:$0x3] }
 0x114   :  { %v230_v30 = vadd.f32 %v263_v28, %v222_v29 }
 0x116   :  { %v264_v31 = vmul.f32 -1.442695, %v230_v30 }
 0x118   :  { %305 = vpow2.f32 %v264_v31 }
 0x122   :  { %v306_v32 = vpop.eup %305 }
 0x123   :  { %v234_v33 = vadd.f32 1.0, %v306_v32 }
 0x125   :  { %307 = vrcp.f32 %v234_v33 }
 0x12f   :  { %v308_v34 = vpop.eup %307 }
 0x130   :  { %v237_v35 = vmul.f32 %v308_v34, %v230_v30 }
 0x132   :  { %v238_v36 = vpack.c.bf16 %v237_v35, %v237_v35 }
 0x134   :  { %240 = vst.msk [vmem:[%s424_s3] sm:$0x1] %vm239_vm1, %v238_v36 }
 0x135   :  { %245 = vsyncpa [#allocation4], 1 }

// kernel: _lambda_.22
= control target key start
LH: loop header
LB: loop body
LE: loop exit
PB: predicated region body
PF: predicated region fallthrough
CT: control target
= control target key end

     0   :  { %8 = vsyncpa [#allocation4], 0  ;;  %s288_s0 = inlined_call_operand.vmem [shape: bf16[2,64], index: 0, kind: input, shape index: {}]   ;;  %s289_s1 = inlined_call_operand.hbm [shape: bf16[64,64], index: 1, kind: input, shape index: {}]   ;;  %s290_s2 = inlined_call_operand.hbm [shape: f32[1,64], index: 2, kind: input, shape index: {}]   ;;  %s291_s3 = inlined_call_operand.vmem [shape: bf16[2,64], index: 3, kind: output, shape index: {}]  }
   0x1   :  { %9 = vsyncpa [#allocation6], 0  ;;  %s230_s12 = smov [#allocation3]   ;;  %s182_s16 = scalar_lea.hbm %s289_s1, 512 }
   0x2   :  { %s17_s13 = sshll.u32 %s230_s12, 4  ;;  %p183_p0 = scmp.ne.s32.totalorder %s289_s1, %s182_s16  ;;  %s18_s13 = int_to_ptr.vmem [resolvable:$true] %s17_s13 }
   0x3   :  { %p186_p1 = scmp.lt.u32.totalorder %s182_s16, %s289_s1 }
   0x5   :  { %p188_p2 = pnand %p186_p1, %p183_p0 }
   0x7   :  { %191 = shalt.err (!%p188_p2)
}
   0x8   :  { %s192_s21 = scalar_lea.vmem %s18_s13, 512  ;;  %p197_p4 = scmp.lt.s32.totalorder %s18_s13, %s18_s13 }
   0x9   :  { %p193_p3 = scmp.ne.s32.totalorder %s18_s13, %s192_s21  ;;  %p198_p5 = scmp.lt.s32.totalorder %s192_s21, %s192_s21 }
   0xb   :  { %p199_p6 = por %p198_p5, %p197_p4 }
   0xd   :  { %p200_p7 = pnand %p199_p6, %p193_p3 }
   0xf   :  { %203 = shalt.err (!%p200_p7)
}
  0x10   :  { %s231_s22 = smov 64   ;;  %s232_s23 = smov 4  }
  0x11   :  { %23 = dma.hbm_to_vmem [thread:$0]  %s289_s1, 512, %s18_s13, [#allocation4], %s231_s22, %s231_s22, %s232_s23  }
  0x12   :  { %s233_s26 = smov [#allocation5]   ;;  %s204_s30 = scalar_lea.hbm %s290_s2, 16 }
  0x13   :  { %s30_s27 = sshll.u32 %s233_s26, 4  ;;  %p205_p8 = scmp.ne.s32.totalorder %s290_s2, %s204_s30  ;;  %s31_s27 = int_to_ptr.vmem [resolvable:$true] %s30_s27 }
  0x14   :  { %p208_p9 = scmp.lt.u32.totalorder %s204_s30, %s290_s2 }
  0x16   :  { %p210_p10 = pnand %p208_p9, %p205_p8 }
  0x18   :  { %213 = shalt.err (!%p210_p10)
}
  0x19   :  { %s214_s8 = scalar_lea.vmem %s31_s27, 16  ;;  %s218_s1 = scalar_lea.vmem %s31_s27, 32 }
  0x1a   :  { %p215_p11 = scmp.ne.s32.totalorder %s31_s27, %s214_s8  ;;  %p219_p12 = scmp.lt.s32.totalorder %s31_s27, %s31_s27 }
  0x1b   :  { %p220_p13 = scmp.lt.s32.totalorder %s218_s1, %s214_s8 }
  0x1d   :  { %p221_p0 = por %p220_p13, %p219_p12 }
  0x1f   :  { %p222_p1 = pnand %p221_p0, %p215_p11 }
  0x21   :  { %225 = shalt.err (!%p222_p1)
}
  0x22   :  { %33 = dma.hbm_to_vmem [thread:$0]  %s290_s2, 16, %s31_s27, [#allocation6]  }
  0x23   :  { %226 = dma.done.wait [#allocation4], 512  }
  0x24   :  { %227 = vsyncadd [#allocation4], 4294966784 }
  0x25   :  { %228 = dma.done.wait [#allocation6], 16  }
  0x26   :  { %229 = vsyncadd [#allocation6], 4294967280  ;;  %vm45_vm0 = vcmask 517120   ;;  %v234_v0 = vmov 0.0   ;;  %vm235_vm1 = vmmov 0   ;;  %v178_v1 = vld [vmem:[#allocation3] sm:$0xff]  }
  0x27   :  { %160 = vmatprep.subr.bf16.mxu0 %v234_v0  ;;  %168 = vmatprep.mubr.msk.bf16.mxu0 %vm235_vm1, %v234_v0  ;;  %46 = vst.msk [vmem:[#allocation2] sm:$0x3] %vm45_vm0, %v234_v0  ;;  %v179_v2 = vld [vmem:[#allocation3 + $0x8] sm:$0xff]   ;;  %v180_v3 = vld [vmem:[#allocation3 + $0x10] sm:$0xff]   ;;  %v181_v4 = vld [vmem:[#allocation3 + $0x18] sm:$0xff]   ;;  %vm81_vm2 = vcmask 523264  }
  0x28   :  { %161 = vmatpush3.bf16.msra.mxu0 %v178_v1  ;;  %v47_v5 = vld [vmem:[%s288_s0] sm:$0x1]  ;;  %v154_v12 = vld [vmem:[#allocation5] ss:$0 sm:$0xff]  ;;  %vm141_vm3 = vcmask 516096  }
  0x29   :  { %162 = vmatprep.subr.bf16.mxu0 %v234_v0 }
  0x2c   :  { %163 = vmatpush3.bf16.msra.mxu0 %v179_v2 }
  0x2d   :  { %164 = vmatprep.subr.bf16.mxu0 %v234_v0 }
  0x2e   :  { %v48_v6 = vld [vmem:[#allocation2] sm:$0x3] }
  0x30   :  { %165 = vmatpush3.bf16.msra.mxu0 %v180_v3 }
  0x31   :  { %166 = vmatprep.subr.bf16.mxu0 %v234_v0 }
  0x34   :  { %167 = vmatpush3.bf16.msra.mxu0 %v181_v4 }
  0x37   :  { %169 = vmatmul.mubr.msk.bf16.vlgmr.msra.gmra.mrb[0].mxu0 %vm81_vm2, %v47_v5 }
 0x10a   :  { %v119_v7 = vpop.f32.mrb[0].mxu0 }
 0x10b   :  { %v125_v8 = vadd.f32 %v119_v7, %v48_v6  ;;  %v170_v9 = vpop.f32.mrb[1].mxu0 }
 0x10c   :  { %v122_v10 = vpop.f32.mrb[2].mxu0 }
 0x10d   :  { %127 = vst.msk [vmem:[#allocation2] sm:$0x3] %vm45_vm0, %v125_v8  ;;  %v171_v11 = vpop.f32.mrb[3].mxu0 }
 0x114   :  { %v131_v13 = vld [vmem:[#allocation2] sm:$0x3] }
 0x115   :  { %v139_v14 = vadd.f32 %v154_v12, %v131_v13 }
 0x117   :  { %v140_v15 = vpack.c.bf16 %v139_v14, %v139_v14 }
 0x119   :  { %142 = vst.msk [vmem:[%s291_s3] sm:$0x1] %vm141_vm3, %v140_v15 }
 0x11a   :  { %147 = vsyncpa [#allocation4], 1 }
 0x11b   :  { %148 = vsyncpa [#allocation6], 1 }

// kernel: _lambda_.23
= control target key start
LH: loop header
LB: loop body
LE: loop exit
PB: predicated region body
PF: predicated region fallthrough
CT: control target
= control target key end

     0   :  { %s1084_s21 = smov 0   ;;  %s1086_s22 = smov 0   ;;  %s1197_s0 = inlined_call_operand.vmem [shape: bf16[2,2560,64], index: 0, kind: input, shape index: {}]   ;;  %s1198_s1 = inlined_call_operand.vmem [shape: bf16[8,2560], index: 1, kind: input, shape index: {}]   ;;  %s1199_s2 = inlined_call_operand.vmem [shape: f32[8,1], index: 2, kind: input, shape index: {}]   ;;  %s1200_s3 = inlined_call_operand.vmem [shape: bf16[8,8], index: 3, kind: input, shape index: {}]   ;;  %s1201_s4 = inlined_call_operand.vmem [shape: f32[8,1], index: 4, kind: input, shape index: {}]   ;;  %s1202_s5 = inlined_call_operand.vmem [shape: f32[1,8,64], index: 5, kind: input, shape index: {}]   ;;  %s1203_s6 = inlined_call_operand.vmem [shape: bf16[2,8,64], index: 6, kind: output, shape index: {}]  }
   0x1   :  { %s1088_s23 = smov 0   ;;  %s1090_s24 = smov 0  }
   0x2   :  { %s1092_s25 = smov 0  }
   0x3 LB: > { %s25_s26 = sadd.s32 1, %s1035_s23  ;;  %s28_s27 = sadd.s32 1, %s1039_s24  ;;  %s1043_s25 = sphi %s1092_s25, %s16_s25   ;;  %s1039_s24 = sphi %s1090_s24, %s1207_s24   ;;  %s1035_s23 = sphi %s1088_s23, %s1206_s23   ;;  %s1031_s22 = sphi %s1086_s22, %s1205_s22   ;;  %s1027_s21 = sphi %s1084_s21, %s1204_s21  }
   0x4   : > { %p26_p0 = scmp.ge.s32.totalorder %s25_s26, 5  ;;  %p824_p1 = scmp.ge.s32.totalorder %s1043_s25, 1 }
   0x5   : > { %p242_p2 = scmp.lt.s32.totalorder %s1043_s25, 11 }
   0x6   : > { %s1209_s26 = smov (%p26_p0, %s25_s26), 0  ;;  %s1211_s27 = smov (!%p26_p0, %s28_s27), %s1039_s24 }
   0x7   : > { %p243_p3 = pnand %p824_p1, %p242_p2  ;;  %p30_p4 = scmp.ge.s32.totalorder %s1211_s27, 2 }
   0x8   : > { %s825_s28 = sshll.u32 (!%p243_p3), %s1027_s21, 6  ;;  %p281_p5 = scmp.lt.s32.totalorder (!%p243_p3), %s1031_s22, 1 }
   0x9   : > { %s1213_s27 = smov (%p30_p4, %s1211_s27), 0  ;;  %246 = sbr.rel (%p243_p3) target bundleno = 521 (0x209), region = 44 }
   0xa   : > { %p283_p6 = scmp.lt.s32.totalorder (!%p243_p3), %s825_s28, 319  ;;  %s827_s29 = sshll.u32 (!%p243_p3), %s1027_s21, 2 }
   0xb   : > { %p291_p7 = scmp.lt.s32.totalorder (!%p243_p3), %s827_s29, 19  ;;  %p830_p8 = scmp.ne.s32.totalorder (!%p243_p3), %s1027_s21, 0 }
  0x10   : > { %s1215_s22 = smov (!%p281_p5, %s1031_s22), 1  ;;  %s1217_s28 = smov (!%p283_p6, %s825_s28), 319 }
  0x11   : > { %s923_s30 = smul.u32 320, %s1215_s22  ;;  %s829_s7 = sshll.u32 %s1215_s22, 2  ;;  %vm305_vm0 = vcmask (!%p830_p8), 523264   ;;  %v1045_v0 = vmov (!%p830_p8), 0.0  }
  0x12   : > { %s1121_s11 = scalar_lea.vmem %s1203_s6, %s829_s7  ;;  %s1219_s29 = smov (!%p291_p7, %s827_s29), 19  ;;  %306 = vst.msk [vmem:[#allocation2] sm:$0xff] (!%p830_p8), %vm305_vm0, %v1045_v0 }
  0x13   : > { %s286_s8 = sadd.s32 %s923_s30, %s1217_s28  ;;  %s828_s16 = sshll.u32 %s1219_s29, 2 }
  0x14   : > { %s826_s12 = sshll.u32 %s286_s8, 2  ;;  %s1131_s19 = scalar_lea.vmem %s1198_s1, %s828_s16 }
  0x15   : > { %s1126_s15 = scalar_lea.vmem %s1197_s0, %s826_s12  ;;  %304 = sbr.rel (%p830_p8) target bundleno = 28 (0x1c), region = 48 }
  0x1c PF: > { %v968_v1 = vld [vmem:[%s1126_s15 + $0x40] sm:$0xff]   ;;  %v972_v5 = vld [vmem:[%s1126_s15 + $0x48] sm:$0xff]   ;;  %v976_v9 = vld [vmem:[%s1126_s15 + $0x50] sm:$0xff]   ;;  %vm661_vm1 = vcmask 523264   ;;  %p867_p9 = scmp.ne.s32.totalorder %s1027_s21, 4 }
  0x1d   : > { %v969_v2 = vld [vmem:[%s1126_s15 + $0xc0] sm:$0xff]   ;;  %871 = vmatprep.subr.bf16.mxu0 %v968_v1  ;;  %v973_v6 = vld [vmem:[%s1126_s15 + $0xc8] sm:$0xff]   ;;  %v977_v10 = vld [vmem:[%s1126_s15 + $0xd0] sm:$0xff]   ;;  %v1046_v53 = vmov (!%p867_p9), 0   ;;  %v1047_v55 = vmov (!%p867_p9), 0.0   ;;  %vm1048_vm2 = vmmov (!%p867_p9), 0  }
  0x1e   : > { %v970_v3 = vld [vmem:[%s1126_s15] sm:$0xff]   ;;  %893 = vmatprep.subr.bf16.mxu1 %v969_v2  ;;  %v974_v7 = vld [vmem:[%s1126_s15 + $0x8] sm:$0xff]   ;;  %v978_v11 = vld [vmem:[%s1126_s15 + $0x10] sm:$0xff]   ;;  %1004 = vset.pattern.permute.xlu0 (!%p867_p9), %v1046_v53  ;;  %vm688_vm3 = vcmask (!%p867_p9), 1043456   ;;  %vm684_vm4 = vcmask (!%p867_p9), 64512   ;;  %vm736_vm5 = vcmask (!%p867_p9), 519168  }
  0x1f   : > { %v971_v4 = vld [vmem:[%s1126_s15 + $0x80] sm:$0xff]   ;;  %872 = vmatpush3.bf16.msra.mxu0 %v970_v3  ;;  %v975_v8 = vld [vmem:[%s1126_s15 + $0x88] sm:$0xff]   ;;  %v979_v12 = vld [vmem:[%s1126_s15 + $0x90] sm:$0xff]  }
  0x20   : > { %894 = vmatpush3.bf16.msra.mxu1 %v971_v4  ;;  %873 = vmatprep.subr.bf16.mxu0 %v972_v5  ;;  %v980_v13 = vld [vmem:[%s1126_s15 + $0x58] sm:$0xff]   ;;  %v984_v17 = vld [vmem:[%s1126_s15 + $0x60] sm:$0xff]   ;;  %v988_v21 = vld [vmem:[%s1126_s15 + $0x68] sm:$0xff]  }
  0x21   : > { %895 = vmatprep.subr.bf16.mxu1 %v973_v6  ;;  %v981_v14 = vld [vmem:[%s1126_s15 + $0xd8] sm:$0xff]   ;;  %v985_v18 = vld [vmem:[%s1126_s15 + $0xe0] sm:$0xff]   ;;  %v989_v22 = vld [vmem:[%s1126_s15 + $0xe8] sm:$0xff]  }
  0x22   : > { %v982_v15 = vld [vmem:[%s1126_s15 + $0x18] sm:$0xff]   ;;  %v986_v19 = vld [vmem:[%s1126_s15 + $0x20] sm:$0xff]   ;;  %v990_v23 = vld [vmem:[%s1126_s15 + $0x28] sm:$0xff]  }
  0x23   : > { %874 = vmatpush3.bf16.msra.mxu0 %v974_v7  ;;  %v983_v16 = vld [vmem:[%s1126_s15 + $0x98] sm:$0xff]   ;;  %v987_v20 = vld [vmem:[%s1126_s15 + $0xa0] sm:$0xff]   ;;  %v991_v24 = vld [vmem:[%s1126_s15 + $0xa8] sm:$0xff]  }
  0x24   : > { %896 = vmatpush3.bf16.msra.mxu1 %v975_v8  ;;  %875 = vmatprep.subr.bf16.mxu0 %v976_v9  ;;  %v992_v25 = vld [vmem:[%s1126_s15 + $0x70] sm:$0xff]   ;;  %v996_v29 = vld [vmem:[%s1126_s15 + $0x78] sm:$0xff]   ;;  %v308_v33 = vld [vmem:[%s1131_s19] sm:$0xff] }
  0x25   : > { %897 = vmatprep.subr.bf16.mxu1 %v977_v10  ;;  %v993_v26 = vld [vmem:[%s1126_s15 + $0xf0] sm:$0xff]   ;;  %v997_v30 = vld [vmem:[%s1126_s15 + $0xf8] sm:$0xff]   ;;  %v309_v34 = vld [vmem:[%s1131_s19 + $0x8] sm:$0xff]  ;;  %v831_v35 = vcombine.low %v308_v33, %v308_v33  ;;  %v832_v36 = vcombine.high %v308_v33, %v308_v33 }
  0x26   : > { %v994_v27 = vld [vmem:[%s1126_s15 + $0x30] sm:$0xff]   ;;  %v998_v31 = vld [vmem:[%s1126_s15 + $0x38] sm:$0xff]   ;;  %v833_v37 = vcombine.low %v309_v34, %v309_v34  ;;  %v834_v38 = vcombine.high %v309_v34, %v309_v34  ;;  %v307_v47 = vld [vmem:[#allocation2] sm:$0xff] }
  0x27   : > { %876 = vmatpush3.bf16.msra.mxu0 %v978_v11  ;;  %v995_v28 = vld [vmem:[%s1126_s15 + $0xb0] sm:$0xff]   ;;  %v999_v32 = vld [vmem:[%s1126_s15 + $0xb8] sm:$0xff]   ;;  %612 = vmatprep.mubr.bf16.mxu0 %v832_v36  ;;  %v668_v52 = vld [vmem:[%s1199_s2] sm:$0xff] (!%p867_p9) }
  0x28   : > { %898 = vmatpush3.bf16.msra.mxu1 %v979_v12  ;;  %877 = vmatprep.subr.bf16.mxu0 %v980_v13  ;;  %v678_v54 = vld [vmem:[%s1201_s4] sm:$0xff] (!%p867_p9) }
  0x29   : > { %899 = vmatprep.subr.bf16.mxu1 %v981_v14  ;;  %652 = vmatprep.mubr.bf16.mxu1 %v834_v38  ;;  %v676_v62 = vld [vmem:[%s1200_s3] sm:$0xf] (!%p867_p9) }
  0x2a   : > { %671 = vperm.xlu0 (!%p867_p9), %1004, %v668_v52   ;;  %v733_v3 = vld [vmem:[%s1202_s5] sm:$0xff] (!%p867_p9) }
  0x2b   : > { %878 = vmatpush3.bf16.msra.mxu0 %v982_v15 }
  0x2c   : > { %900 = vmatpush3.bf16.msra.mxu1 %v983_v16  ;;  %879 = vmatprep.subr.bf16.mxu0 %v984_v17 }
  0x2d   : > { %901 = vmatprep.subr.bf16.mxu1 %v985_v18 }
  0x2e   : > { %681 = vperm.xlu0 (!%p867_p9), %1004, %v678_v54  }
  0x2f   : > { %880 = vmatpush3.bf16.msra.mxu0 %v986_v19 }
  0x30   : > { %902 = vmatpush3.bf16.msra.mxu1 %v987_v20  ;;  %881 = vmatprep.subr.bf16.mxu0 %v988_v21 }
  0x31   : > { %903 = vmatprep.subr.bf16.mxu1 %v989_v22 }
  0x33   : > { %882 = vmatpush3.bf16.msra.mxu0 %v990_v23 }
  0x34   : > { %904 = vmatpush3.bf16.msra.mxu1 %v991_v24  ;;  %883 = vmatprep.subr.bf16.mxu0 %v992_v25 }
  0x35   : > { %905 = vmatprep.subr.bf16.mxu1 %v993_v26 }
  0x37   : > { %884 = vmatpush3.bf16.msra.mxu0 %v994_v27 }
  0x38   : > { %906 = vmatpush3.bf16.msra.mxu1 %v995_v28  ;;  %885 = vmatprep.subr.bf16.mxu0 %v996_v29 }
  0x39   : > { %907 = vmatprep.subr.bf16.mxu1 %v997_v30 }
  0x3b   : > { %886 = vmatpush3.bf16.msra.mxu0 %v998_v31 }
  0x3c   : > { %908 = vmatpush3.bf16.msra.mxu1 %v999_v32  ;;  %917 = vmatprep.subr.bf16.mxu0 (!%p867_p9), %v1047_v55 }
  0x3e   : > { %613 = vmatmul.mubr.bf16.vlgmr.msra.gmra.mrb[0].mxu0 %v831_v35 }
  0x3f   : > { %653 = vmatmul.mubr.bf16.vlgmr.msra.gmra.mrb[0].mxu1 %v833_v37  ;;  %919 = vmatprep.mubr.msk.bf16.mxu0 (!%p867_p9), %vm1048_vm2, %v1047_v55 }
  0xa9   : > { %v672_v57 = vpop.permute.xlu0 (!%p867_p9), %671 }
  0xad   : > { %v682_v63 = vpop.permute.xlu0 (!%p867_p9), %681 }
 0x111   : > { %v887_v39 = vpop.f32.mrb[0].mxu0 }
 0x112   : > { %v909_v40 = vpop.f32.mrb[0].mxu1  ;;  %v888_v41 = vpop.f32.mrb[1].mxu0 }
 0x113   : > { %v910_v42 = vpop.f32.mrb[1].mxu1  ;;  %v889_v43 = vadd.f32 %v888_v41, %v887_v39  ;;  %v890_v45 = vpop.f32.mrb[2].mxu0 }
 0x114   : > { %v911_v44 = vadd.f32 %v910_v42, %v909_v40  ;;  %v912_v46 = vpop.f32.mrb[2].mxu1  ;;  %v891_v48 = vpop.f32.mrb[3].mxu0  ;;  %666 = sbr.rel (%p867_p9) target bundleno = 521 (0x209), region = 52 }
 0x115   : > { %v913_v49 = vpop.f32.mrb[3].mxu1 }
 0x116   : > { %v655_v50 = vadd.f32 %v911_v44, %v889_v43 }
 0x118   : > { %v660_v51 = vadd.f32 %v655_v50, %v307_v47 }
 0x11a   : > { %662 = vst.msk [vmem:[#allocation2] sm:$0xff] %vm661_vm1, %v660_v51 }
 0x121   : > { %v667_v56 = vld [vmem:[#allocation2] sm:$0xff] }
 0x122   : > { %v674_v58 = vadd.f32 %v672_v57, %v667_v56 }
 0x124   : > { %v675_v59 = vmax.f32 %v674_v58, 0.0 }
 0x126   : > { %v677_v60 = vpack.c.bf16 %v675_v59, %v675_v59 }
 0x128   : > { %v690_v61 = vsel %vm688_vm3, %v677_v60, 0 }
 0x129   : > { %918 = vmatpush3.bf16.msra.mxu0 %v690_v61 }
 0x12c   : > { %920 = vmatmul.mubr.msk.bf16.vlgmr.msra.gmra.mrb[0].mxu0 %vm684_vm4, %v676_v62 }
 0x1ff   : > { %v726_v0 = vpop.f32.mrb[0].mxu0 }
 0x200   : > { %v727_v1 = vadd.f32 %v726_v0, %v682_v63  ;;  %v921_v2 = vpop.f32.mrb[1].mxu0 }
 0x201   : > { %v729_v4 = vpop.f32.mrb[2].mxu0 }
 0x202   : > { %v732_v5 = vmax.f32 %v727_v1, 0.0  ;;  %v922_v6 = vpop.f32.mrb[3].mxu0 }
 0x204   : > { %v734_v7 = vadd.f32 %v733_v3, %v732_v5 }
 0x206   : > { %v735_v8 = vpack.c.bf16 %v734_v7, %v734_v7 }
 0x208   : > { %737 = vst.msk [vmem:[%s1121_s11] sm:$0xf] %vm736_vm5, %v735_v8 }
 0x209 PF: > { %s16_s25 = sadd.s32 1, %s1043_s25   ;;  %s1204_s21 = smov %s1035_s23 }
 0x20a   : > { %p13_p10 = scmp.ge.s32.totalorder %s16_s25, 12   ;;  %s1205_s22 = smov %s1039_s24 }
 0x20b   : > { %s1206_s23 = smov %s1209_s26  ;;  %s1207_s24 = smov %s1213_s27 }
 0x20c   :  { %15 = sbr.rel (!%p13_p10) target bundleno = 3 (0x3), region = 85 }

// kernel: _lambda_.27
= control target key start
LH: loop header
LB: loop body
LE: loop exit
PB: predicated region body
PF: predicated region fallthrough
CT: control target
= control target key end

     0   :  { %8 = vsyncpa [#allocation4], 0  ;;  %s214_s12 = smov [#allocation3]   ;;  %s275_s0 = inlined_call_operand.vmem [shape: bf16[16,64], index: 0, kind: input, shape index: {}]   ;;  %s276_s1 = inlined_call_operand.vmem [shape: bf16[64,64], index: 1, kind: input, shape index: {}]   ;;  %s277_s2 = inlined_call_operand.hbm [shape: f32[1,64], index: 2, kind: input, shape index: {}]   ;;  %s278_s3 = inlined_call_operand.vmem [shape: bf16[16,64], index: 3, kind: output, shape index: {}]  }
   0x1   :  { %s19_s13 = sshll.u32 %s214_s12, 4  ;;  %s190_s16 = scalar_lea.hbm %s277_s2, 16  ;;  %s20_s13 = int_to_ptr.vmem [resolvable:$true] %s19_s13 }
   0x2   :  { %p191_p0 = scmp.ne.s32.totalorder %s277_s2, %s190_s16  ;;  %p194_p1 = scmp.lt.u32.totalorder %s190_s16, %s277_s2 }
   0x4   :  { %p196_p2 = pnand %p194_p1, %p191_p0 }
   0x6   :  { %199 = shalt.err (!%p196_p2)
}
   0x7   :  { %s200_s21 = scalar_lea.vmem %s20_s13, 16  ;;  %s204_s22 = scalar_lea.vmem %s20_s13, 32 }
   0x8   :  { %p201_p3 = scmp.ne.s32.totalorder %s20_s13, %s200_s21  ;;  %p205_p4 = scmp.lt.s32.totalorder %s20_s13, %s20_s13 }
   0x9   :  { %p206_p5 = scmp.lt.s32.totalorder %s204_s22, %s200_s21 }
   0xb   :  { %p207_p6 = por %p206_p5, %p205_p4 }
   0xd   :  { %p208_p7 = pnand %p207_p6, %p201_p3 }
   0xf   :  { %211 = shalt.err (!%p208_p7)
}
  0x10   :  { %22 = dma.hbm_to_vmem [thread:$0]  %s277_s2, 16, %s20_s13, [#allocation4]  }
  0x11   :  { %212 = dma.done.wait [#allocation4], 16  }
  0x12   :  { %213 = vsyncadd [#allocation4], 4294967280  ;;  %vm31_vm0 = vcmask 523264   ;;  %v215_v0 = vmov 0.0   ;;  %vm216_vm1 = vmmov 0   ;;  %v185_v1 = vld [vmem:[%s276_s1] sm:$0xff]  }
  0x13   :  { %170 = vmatprep.subr.bf16.mxu0 %v215_v0  ;;  %178 = vmatprep.mubr.msk.bf16.mxu0 %vm216_vm1, %v215_v0  ;;  %32 = vst.msk [vmem:[#allocation2] sm:$0xff] %vm31_vm0, %v215_v0  ;;  %33 = vst.msk [vmem:[#allocation2 + $0x8] sm:$0xff] %vm31_vm0, %v215_v0  ;;  %v186_v2 = vld [vmem:[%s276_s1 + $0x8] sm:$0xff]   ;;  %v187_v3 = vld [vmem:[%s276_s1 + $0x10] sm:$0xff]   ;;  %vm146_vm2 = vcmask 519168  }
  0x14   :  { %171 = vmatpush3.bf16.msra.mxu0 %v185_v1  ;;  %v188_v4 = vld [vmem:[%s276_s1 + $0x18] sm:$0xff]   ;;  %v189_v5 = vld [vmem:[%s275_s0] sm:$0xff]   ;;  %v160_v14 = vld [vmem:[#allocation3] ss:$0 sm:$0xff] }
  0x15   :  { %172 = vmatprep.subr.bf16.mxu0 %v215_v0 }
  0x18   :  { %173 = vmatpush3.bf16.msra.mxu0 %v186_v2 }
  0x19   :  { %174 = vmatprep.subr.bf16.mxu0 %v215_v0 }
  0x1a   :  { %v36_v6 = vld [vmem:[#allocation2] sm:$0xff]  ;;  %v37_v8 = vld [vmem:[#allocation2 + $0x8] sm:$0xff] }
  0x1c   :  { %175 = vmatpush3.bf16.msra.mxu0 %v187_v3 }
  0x1d   :  { %176 = vmatprep.subr.bf16.mxu0 %v215_v0 }
  0x20   :  { %177 = vmatpush3.bf16.msra.mxu0 %v188_v4 }
  0x23   :  { %179 = vmatmul.mubr.msk.bf16.vlgmr.msra.gmra.mrb[0].mxu0 %vm31_vm0, %v189_v5 }
  0xf6   :  { %v113_v7 = vpop.f32.mrb[0].mxu0 }
  0xf7   :  { %v120_v9 = vadd.f32 %v113_v7, %v36_v6  ;;  %v180_v10 = vpop.f32.mrb[1].mxu0 }
  0xf8   :  { %v116_v11 = vpop.f32.mrb[2].mxu0 }
  0xf9   :  { %122 = vst.msk [vmem:[#allocation2] sm:$0xff] %vm31_vm0, %v120_v9  ;;  %v121_v12 = vadd.f32 %v116_v11, %v37_v8  ;;  %v181_v13 = vpop.f32.mrb[3].mxu0 }
  0xfb   :  { %123 = vst.msk [vmem:[#allocation2 + $0x8] sm:$0xff] %vm31_vm0, %v121_v12 }
 0x100   :  { %v127_v15 = vld [vmem:[#allocation2] sm:$0xff] }
 0x101   :  { %v136_v16 = vadd.f32 %v160_v14, %v127_v15 }
 0x102   :  { %v128_v17 = vld [vmem:[#allocation2 + $0x8] sm:$0xff] }
 0x103   :  { %v163_v18 = vpack.c.bf16 %v136_v16, %v136_v16  ;;  %v137_v19 = vadd.f32 %v160_v14, %v128_v17 }
 0x105   :  { %147 = vst.msk [vmem:[%s278_s3] sm:$0xf] %vm146_vm2, %v163_v18  ;;  %v164_v20 = vpack.c.bf16 %v137_v19, %v137_v19 }
 0x107   :  { %148 = vst.msk [vmem:[%s278_s3 + $0x4] sm:$0xf] %vm146_vm2, %v164_v20 }
 0x108   :  { %153 = vsyncpa [#allocation4], 1 }

// kernel: _lambda_.20
= control target key start
LH: loop header
LB: loop body
LE: loop exit
PB: predicated region body
PF: predicated region fallthrough
CT: control target
= control target key end

     0   :  { %8 = vsyncpa [#allocation4], 0  ;;  %s165_s12 = smov [#allocation3]   ;;  %s219_s0 = inlined_call_operand.vmem [shape: f32[16,8], index: 0, kind: input, shape index: {}]   ;;  %s220_s1 = inlined_call_operand.vmem [shape: bf16[8,64], index: 1, kind: input, shape index: {}]   ;;  %s221_s2 = inlined_call_operand.hbm [shape: f32[1,64], index: 2, kind: input, shape index: {}]   ;;  %s222_s3 = inlined_call_operand.vmem [shape: bf16[16,64], index: 3, kind: output, shape index: {}]  }
   0x1   :  { %s19_s13 = sshll.u32 %s165_s12, 4  ;;  %s141_s16 = scalar_lea.hbm %s221_s2, 16  ;;  %s20_s13 = int_to_ptr.vmem [resolvable:$true] %s19_s13 }
   0x2   :  { %p142_p0 = scmp.ne.s32.totalorder %s221_s2, %s141_s16  ;;  %p145_p1 = scmp.lt.u32.totalorder %s141_s16, %s221_s2 }
   0x4   :  { %p147_p2 = pnand %p145_p1, %p142_p0 }
   0x6   :  { %150 = shalt.err (!%p147_p2)
}
   0x7   :  { %s151_s21 = scalar_lea.vmem %s20_s13, 16  ;;  %s155_s22 = scalar_lea.vmem %s20_s13, 32 }
   0x8   :  { %p152_p3 = scmp.ne.s32.totalorder %s20_s13, %s151_s21  ;;  %p156_p4 = scmp.lt.s32.totalorder %s20_s13, %s20_s13 }
   0x9   :  { %p157_p5 = scmp.lt.s32.totalorder %s155_s22, %s151_s21 }
   0xb   :  { %p158_p6 = por %p157_p5, %p156_p4 }
   0xd   :  { %p159_p7 = pnand %p158_p6, %p152_p3 }
   0xf   :  { %162 = shalt.err (!%p159_p7)
}
  0x10   :  { %22 = dma.hbm_to_vmem [thread:$0]  %s221_s2, 16, %s20_s13, [#allocation4]  }
  0x11   :  { %163 = dma.done.wait [#allocation4], 16  }
  0x12   :  { %164 = vsyncadd [#allocation4], 4294967280  ;;  %vm31_vm0 = vcmask 523264   ;;  %v166_v0 = vmov 0.0   ;;  %vm167_vm1 = vmmov 0   ;;  %vm44_vm2 = vcmask 1043456  }
  0x13   :  { %32 = vst.msk [vmem:[#allocation2] sm:$0xff] %vm31_vm0, %v166_v0  ;;  %33 = vst.msk [vmem:[#allocation2 + $0x8] sm:$0xff] %vm31_vm0, %v166_v0  ;;  %132 = vmatprep.subr.bf16.mxu0 %v166_v0  ;;  %134 = vmatprep.mubr.msk.bf16.mxu0 %vm167_vm1, %v166_v0  ;;  %v39_v1 = vld [vmem:[%s220_s1] sm:$0xf]  ;;  %v35_v3 = vld [vmem:[%s219_s0 + $0x8] sm:$0xff]  ;;  %vm40_vm3 = vcmask 64512  }
  0x14   :  { %v34_v2 = vld [vmem:[%s219_s0] sm:$0xff]  ;;  %v46_v4 = vsel %vm44_vm2, %v39_v1, 0  ;;  %v125_v14 = vld [vmem:[#allocation3] ss:$0 sm:$0xff]  ;;  %vm116_vm4 = vcmask 519168  }
  0x15   :  { %v36_v5 = vpack.c.bf16 %v35_v3, %v34_v2  ;;  %133 = vmatpush3.bf16.msra.mxu0 %v46_v4 }
  0x18   :  { %135 = vmatmul.mubr.msk.bf16.vlgmr.msra.gmra.mrb[0].mxu0 %vm40_vm3, %v36_v5 }
  0x1a   :  { %v37_v6 = vld [vmem:[#allocation2] sm:$0xff]  ;;  %v38_v8 = vld [vmem:[#allocation2 + $0x8] sm:$0xff] }
  0xeb   :  { %v82_v7 = vpop.f32.mrb[0].mxu0 }
  0xec   :  { %v89_v9 = vadd.f32 %v82_v7, %v37_v6  ;;  %v136_v10 = vpop.f32.mrb[1].mxu0 }
  0xed   :  { %v85_v11 = vpop.f32.mrb[2].mxu0 }
  0xee   :  { %92 = vst.msk [vmem:[#allocation2] sm:$0xff] %vm31_vm0, %v89_v9  ;;  %v90_v12 = vadd.f32 %v85_v11, %v38_v8  ;;  %v137_v13 = vpop.f32.mrb[3].mxu0 }
  0xf0   :  { %93 = vst.msk [vmem:[#allocation2 + $0x8] sm:$0xff] %vm31_vm0, %v90_v12 }
  0xf5   :  { %v97_v15 = vld [vmem:[#allocation2] sm:$0xff] }
  0xf6   :  { %v106_v16 = vadd.f32 %v125_v14, %v97_v15 }
  0xf7   :  { %v98_v17 = vld [vmem:[#allocation2 + $0x8] sm:$0xff] }
  0xf8   :  { %v128_v18 = vpack.c.bf16 %v106_v16, %v106_v16  ;;  %v107_v19 = vadd.f32 %v125_v14, %v98_v17 }
  0xfa   :  { %117 = vst.msk [vmem:[%s222_s3] sm:$0xf] %vm116_vm4, %v128_v18  ;;  %v129_v20 = vpack.c.bf16 %v107_v19, %v107_v19 }
  0xfc   :  { %118 = vst.msk [vmem:[%s222_s3 + $0x4] sm:$0xf] %vm116_vm4, %v129_v20 }
  0xfd   :  { %123 = vsyncpa [#allocation4], 1 }

// kernel: _lambda_.24
= control target key start
LH: loop header
LB: loop body
LE: loop exit
PB: predicated region body
PF: predicated region fallthrough
CT: control target
= control target key end

     0   :  { %vm26_vm0 = vcmask 523264   ;;  %v275_v23 = vmov 0   ;;  %v276_v24 = vmov 0.0   ;;  %v203_v43 = vlaneseq  ;;  %s359_s0 = inlined_call_operand.vmem [shape: bf16[16,64], index: 0, kind: input, shape index: {}]   ;;  %s360_s1 = inlined_call_operand.vmem [shape: bf16[64,192], index: 1, kind: input, shape index: {}]   ;;  %s361_s3 = inlined_call_operand.vmem [shape: f32[1,64], index: 3, kind: input, shape index: {}]   ;;  %s362_s4 = inlined_call_operand.vmem [shape: f32[1,64], index: 4, kind: input, shape index: {}]   ;;  %s363_s2 = inlined_call_operand.vmem [shape: f32[1,192], index: 2, kind: input, shape index: {}]   ;;  %s364_s5 = inlined_call_operand.vmem [shape: bf16[16,192], index: 5, kind: output, shape index: {}]  }
   0x1   :  { %v254_v0 = vld [vmem:[%s359_s0] sm:$0xff]   ;;  %v262_v17 = vld [vmem:[%s360_s1 + $0x14] ss:$8 sps:$4 sm:$0xff]   ;;  %v264_v18 = vld [vmem:[%s360_s1 + $0x10] ss:$8 sps:$4 sm:$0xff]   ;;  %175 = vmatprep.mubr.bf16.mxu0 %v275_v23  ;;  %27 = vst.msk [vmem:[#allocation2 + $0x8] sm:$0xff] %vm26_vm0, %v276_v24 }
   0x2   :  { %v255_v1 = vunpack.c.l.bf16 %v254_v0  ;;  %v256_v2 = vunpack.c.h.bf16 %v254_v0  ;;  %v259_v15 = vld [vmem:[%s360_s1 + $0x4] ss:$8 sps:$4 sm:$0xff]   ;;  %v261_v16 = vld [vmem:[%s360_s1] ss:$8 sps:$4 sm:$0xff]   ;;  %v268_v21 = vld [vmem:[%s360_s1 + $0x34] ss:$8 sps:$4 sm:$0xff]  }
   0x3   :  { %143 = vmatprep.subr.bf16.mxu0 %v259_v15  ;;  %v265_v19 = vld [vmem:[%s360_s1 + $0x24] ss:$8 sps:$4 sm:$0xff]   ;;  %v267_v20 = vld [vmem:[%s360_s1 + $0x20] ss:$8 sps:$4 sm:$0xff]   ;;  %v270_v22 = vld [vmem:[%s360_s1 + $0x30] ss:$8 sps:$4 sm:$0xff]  }
   0x4   :  { %v41_v3 = vsel %vm26_vm0, %v255_v1, 0.0  ;;  %v44_v4 = vsel %vm26_vm0, %v256_v2, 0.0  ;;  %144 = vmatpush1.bf16.msra.mxu0 %v261_v16  ;;  %29 = vst.msk [vmem:[#allocation2 + $0x18] sm:$0xff] %vm26_vm0, %v276_v24  ;;  %v238_v33 = vld [vmem:[%s361_s3] ss:$0 sm:$0xff]  ;;  %v204_v46 = vshrl.u32 %v203_v43, 7 }
   0x5   :  { %42 = vadd.xlane.f32.xlu0 %v41_v3  ;;  %145 = vmatprep.subr.bf16.mxu0 %v262_v17  ;;  %v239_v37 = vld [vmem:[%s362_s4] ss:$0 sm:$0xff]  ;;  %vm229_vm1 = vcmask 1043456   ;;  %vm230_vm2 = vcmask 523268  }
   0x6   :  { %v205_v52 = vsub.s32 0, %v204_v46  ;;  %v209_v53 = vsub.s32 1, %v204_v46  ;;  %v201_v55 = vld [vmem:[%s363_s2] sm:$0x3]  ;;  %vm231_vm3 = vmor %vm230_vm2, %vm229_vm1 }
   0x8   :  { %146 = vmatpush1.bf16.msra.mxu0 %v264_v18  ;;  %v88_v44 = vld [vmem:[#allocation2 + $0x8] sm:$0xff]  ;;  %v206_v56 = vrot.slane %v201_v55, %v205_v52  ;;  %v210_v57 = vrot.slane %v201_v55, %v209_v53 }
   0x9   :  { %45 = vadd.xlane.f32.xlu0 %v44_v4  ;;  %147 = vmatprep.subr.bf16.mxu0 %v265_v19 }
   0xb   :  { %v90_v48 = vld [vmem:[#allocation2 + $0x18] sm:$0xff] }
   0xc   :  { %148 = vmatpush1.bf16.msra.mxu0 %v267_v20 }
   0xd   :  { %149 = vmatprep.subr.bf16.mxu0 %v268_v21 }
  0x10   :  { %150 = vmatpush1.bf16.msra.mxu0 %v270_v22 }
  0x92   :  { %v43_v5 = vpop.xlane.xlu0 %42 }
  0x93   :  { %v48_v6 = vmul.f32 0.015625, %v43_v5 }
  0x95   :  { %v50_v7 = vsub.f32 %v255_v1, %v48_v6 }
  0x96   :  { %v46_v8 = vpop.xlane.xlu0 %45 }
  0x97   :  { %v49_v9 = vmul.f32 0.015625, %v46_v8  ;;  %v52_v10 = vmul.f32 %v50_v7, %v50_v7 }
  0x99   :  { %v51_v11 = vsub.f32 %v256_v2, %v49_v9  ;;  %v54_v12 = vsel %vm26_vm0, %v52_v10, 0.0 }
  0x9a   :  { %55 = vadd.xlane.f32.xlu1 %v54_v12 }
  0x9b   :  { %v53_v13 = vmul.f32 %v51_v11, %v51_v11 }
  0x9d   :  { %v57_v14 = vsel %vm26_vm0, %v53_v13, 0.0 }
  0x9e   :  { %58 = vadd.xlane.f32.xlu1 %v57_v14 }
 0x127   :  { %v56_v25 = vpop.xlane.xlu1 %55 }
 0x128   :  { %v60_v26 = vmul.f32 0.015625, %v56_v25 }
 0x12a   :  { %v62_v27 = vadd.f32 1e-06, %v60_v26 }
 0x12b   :  { %v59_v28 = vpop.xlane.xlu1 %58 }
 0x12c   :  { %271 = vrsqrt.f32 %v62_v27  ;;  %v61_v29 = vmul.f32 0.015625, %v59_v28 }
 0x12e   :  { %v63_v30 = vadd.f32 1e-06, %v61_v29 }
 0x130   :  { %273 = vrsqrt.f32 %v63_v30 }
 0x136   :  { %v272_v31 = vpop.eup %271 }
 0x137   :  { %v66_v32 = vmul.f32 %v272_v31, %v50_v7 }
 0x139   :  { %v74_v35 = vmul.f32 %v238_v33, %v66_v32 }
 0x13a   :  { %v274_v34 = vpop.eup %273 }
 0x13b   :  { %v67_v36 = vmul.f32 %v274_v34, %v51_v11  ;;  %v82_v39 = vadd.f32 %v239_v37, %v74_v35 }
 0x13d   :  { %v75_v38 = vmul.f32 %v238_v33, %v67_v36 }
 0x13f   :  { %v83_v40 = vadd.f32 %v239_v37, %v75_v38 }
 0x141   :  { %v84_v41 = vpack.c.bf16 %v83_v40, %v82_v39 }
 0x143   :  { %85 = vst.msk [vmem:[#allocation3] sm:$0xff] %vm26_vm0, %v84_v41 }
 0x14a   :  { %v86_v42 = vld [vmem:[#allocation3] sm:$0xff] }
 0x14b   :  { %248 = vmatmul.mubr.msk.bf16.vlgmr.msra.gmra.mrb[0].mxu0 %vm26_vm0, %v86_v42 }
 0x21e   :  { %v177_v45 = vpop.f32.mrb[0].mxu0 }
 0x21f   :  { %v179_v47 = vpop.f32.mrb[1].mxu0  ;;  %v213_v59 = vadd.f32 %v206_v56, %v177_v45 }
 0x220   :  { %v187_v49 = vadd.f32 %v179_v47, %v88_v44  ;;  %v181_v50 = vpop.f32.mrb[2].mxu0 }
 0x221   :  { %v183_v51 = vpop.f32.mrb[3].mxu0  ;;  %v215_v63 = vadd.f32 %v206_v56, %v181_v50 }
 0x222   :  { %191 = vst.msk [vmem:[#allocation2 + $0x8] sm:$0xff] %vm26_vm0, %v187_v49  ;;  %v189_v54 = vadd.f32 %v183_v51, %v90_v48 }
 0x224   :  { %193 = vst.msk [vmem:[#allocation2 + $0x18] sm:$0xff] %vm26_vm0, %v189_v54 }
 0x229   :  { %v198_v58 = vld [vmem:[#allocation2 + $0x8] sm:$0xff] }
 0x22a   :  { %v214_v60 = vadd.f32 %v210_v57, %v198_v58 }
 0x22b   :  { %v200_v61 = vld [vmem:[#allocation2 + $0x18] sm:$0xff] }
 0x22c   :  { %v251_v62 = vpack.c.bf16 %v214_v60, %v213_v59  ;;  %v216_v0 = vadd.f32 %v210_v57, %v200_v61 }
 0x22e   :  { %232 = vst.msk [vmem:[%s364_s5] sm:$0xff] %vm231_vm3, %v251_v62  ;;  %v252_v1 = vpack.c.bf16 %v216_v0, %v215_v63 }
 0x230   :  { %233 = vst.msk [vmem:[%s364_s5 + $0x8] sm:$0xff] %vm231_vm3, %v252_v1 }

// kernel: _lambda_.25
= control target key start
LH: loop header
LB: loop body
LE: loop exit
PB: predicated region body
PF: predicated region fallthrough
CT: control target
= control target key end

     0   :  { %s1021_s15 = smov 0   ;;  %s1134_s0 = inlined_call_operand.vmem [shape: bf16[2,8,192], index: 0, kind: input, shape index: {}]   ;;  %s1135_s1 = inlined_call_operand.vmem [shape: bf16[64,64], index: 1, kind: input, shape index: {}]   ;;  %s1136_s2 = inlined_call_operand.vmem [shape: f32[1,64], index: 2, kind: input, shape index: {}]   ;;  %s1137_s3 = inlined_call_operand.vmem [shape: bf16[2,8,64], index: 3, kind: input, shape index: {}]   ;;  %s1138_s4 = inlined_call_operand.vmem [shape: bf16[2,8,64], index: 4, kind: output, shape index: {}]  }
   0x1 LB: > { %s831_s16 = sadd.s32 4294967295, %s985_s15   ;;  %p835_p0 = scmp.ge.s32.totalorder %s985_s15, 1  ;;  %s985_s15 = sphi %s1021_s15, %s14_s15  }
   0x2   : > { %p171_p1 = scmp.lt.s32.totalorder %s985_s15, 3 }
   0x4   : > { %p172_p2 = pnand %p835_p0, %p171_p1 }
   0x5   : > { %p200_p3 = scmp.lt.s32.totalorder (!%p172_p2), %s831_s16, 1  ;;  %v987_v0 = vmov (!%p172_p2), 0.0   ;;  %vm988_vm0 = vmmov (!%p172_p2), 0   ;;  %s989_s21 = smov (!%p172_p2), 64   ;;  %vm220_vm1 = vcmask (!%p172_p2), 130048   ;;  %vm267_vm2 = vcmask (!%p172_p2), 64512  }
   0x6   : > { %175 = sbr.rel (%p172_p2) target bundleno = 1276 (0x4fc), region = 36  ;;  %880 = vmatprep.subr.bf16.mxu0 (!%p172_p2), %v987_v0  ;;  %892 = vmatprep.subr.bf16.mxu1 (!%p172_p2), %v987_v0  ;;  %s990_s22 = smov (!%p172_p2), 112   ;;  %vm285_vm3 = vcmask (!%p172_p2), 1043456   ;;  %vm672_vm4 = vcmask (!%p172_p2), 261120   ;;  %vm674_vm5 = vcmask (!%p172_p2), 392192   ;;  %vm716_vm6 = vcmask (!%p172_p2), 523264  }
   0x7   : > { %882 = vmatprep.mubr.msk.bf16.mxu0 (!%p172_p2), %vm988_vm0, %v987_v0  ;;  %894 = vmatprep.mubr.msk.bf16.mxu1 (!%p172_p2), %vm988_vm0, %v987_v0  ;;  %s991_s23 = smov (!%p172_p2), 48   ;;  %s992_s24 = smov (!%p172_p2), 32   ;;  %vm764_vm7 = vcmask (!%p172_p2), 519168  }
   0x8   : > { %s993_s25 = smov (!%p172_p2), 16   ;;  %s994_s26 = smov (!%p172_p2), 96  }
   0x9   : > { %s995_s27 = smov (!%p172_p2), 80  }
   0xd   : > { %s1140_s16 = smov (!%p200_p3, %s831_s16), 1 }
   0xe   : > { %s858_s17 = sshll.u32 %s1140_s16, 3  ;;  %s838_s10 = sshll.u32 %s1140_s16, 2 }
   0xf   : > { %s204_s20 = scalar_lea.vmem %s1134_s0, %s858_s17  ;;  %s208_s13 = scalar_lea.vmem %s1137_s3, %s838_s10 }
  0x10   : > { %v1041_v1 = vld [vmem:[%s204_s20] sm:$0xff]  ;;  %s212_s16 = scalar_lea.vmem %s1138_s4, %s838_s10 }
  0x11   : > { %v840_v2 = vcombine.low %v1041_v1, %v1041_v1  ;;  %v842_v49 = vcombine.high %v1041_v1, %v1041_v1 }
  0x13   : > { %218 = vrot.lane.b32.xlu0 %v840_v2, %s989_s21  ;;  %329 = vrot.lane.b32.xlu1 %v840_v2, %s990_s22  ;;  %v287_v50 = vsel %vm285_vm3, %v842_v49, 0 }
  0x17   : > { %331 = vrot.lane.b32.xlu0 %v840_v2, %s991_s23  ;;  %441 = vrot.lane.b32.xlu1 %v840_v2, %s992_s24 }
  0x1b   : > { %551 = vrot.lane.b32.xlu1 %v840_v2, %s993_s25  ;;  %439 = vrot.lane.b32.xlu0 %v840_v2, %s994_s26 }
  0x1f   : > { %549 = vrot.lane.b32.xlu0 %v840_v2, %s995_s27 }
  0x85   : > { %v219_v3 = vpop.permute.xlu0 %218  ;;  %v330_v5 = vpop.permute.xlu1 %329 }
  0x86   : > { %v225_v4 = vsel %vm220_vm1, %v219_v3, 0 }
  0x87   : > { %881 = vmatpush3.bf16.xpose.msra.mxu0 %v225_v4 }
  0x88   : > { %886 = vmatprep.subr.bf16.mxu0 %v987_v0 }
  0x89   : > { %v332_v6 = vpop.permute.xlu0 %331  ;;  %v442_v8 = vpop.permute.xlu1 %441 }
  0x8a   : > { %v337_v7 = vsel %vm220_vm1, %v332_v6, 0  ;;  %v447_v9 = vsel %vm220_vm1, %v442_v8, 0 }
  0x8b   : > { %893 = vmatpush3.bf16.xpose.msra.mxu1 %v337_v7 }
  0x8c   : > { %904 = vmatprep.subr.bf16.mxu1 %v987_v0 }
  0x8d   : > { %v552_v10 = vpop.permute.xlu1 %551  ;;  %v440_v11 = vpop.permute.xlu0 %439 }
  0x8e   : > { %883 = vmatmul.mubr.msk.bf16.vlgmr.msra.gmra.mrb[0].mxu0 %vm220_vm1, %v1041_v1  ;;  %v557_v12 = vsel %vm220_vm1, %v552_v10, 0 }
  0x8f   : > { %888 = vmatprep.mubr.msk.bf16.mxu0 %vm988_vm0, %v987_v0  ;;  %887 = vmatpush3.bf16.msra.mxu0 %v287_v50 }
  0x90   : > { %898 = vmatprep.subr.bf16.mxu0 %v987_v0 }
  0x91   : > { %v550_v13 = vpop.permute.xlu0 %549 }
  0x92   : > { %895 = vmatmul.mubr.msk.bf16.vlgmr.msra.gmra.mrb[0].mxu1 %vm220_vm1, %v330_v5 }
  0x93   : > { %905 = vmatpush3.bf16.xpose.msra.mxu1 %v447_v9  ;;  %906 = vmatprep.mubr.msk.bf16.mxu1 %vm988_vm0, %v987_v0 }
  0x94   : > { %916 = vmatprep.subr.bf16.mxu1 %v987_v0 }
  0x9a   : > { %907 = vmatmul.mubr.msk.bf16.vlgmr.msra.gmra.mrb[4].mxu1 %vm220_vm1, %v440_v11 }
  0x9b   : > { %917 = vmatpush3.bf16.xpose.msra.mxu1 %v557_v12  ;;  %918 = vmatprep.mubr.msk.bf16.mxu1 %vm988_vm0, %v987_v0 }
  0x9c   : > { %928 = vmatprep.subr.bf16.mxu1 %v987_v0 }
  0xa2   : > { %919 = vmatmul.mubr.msk.bf16.vlgmr.msra.gmra.mrb[8].mxu1 %vm220_vm1, %v550_v13 }
  0xa3   : > { %936 = vmatprep.mubr.msk.bf16.mxu1 %vm988_vm0, %v987_v0 }
 0x161   : > { %v261_v14 = vpop.f32.mrb[0].mxu0 }
 0x162   : > { %v268_v15 = vsel %vm267_vm2, %v261_v14, -inf  ;;  %v884_v16 = vpop.f32.mrb[1].mxu0 }
 0x163   : > { %269 = vmax.xlane.f32.xlu1 %v268_v15  ;;  %v264_v17 = vpop.f32.mrb[2].mxu0 }
 0x164   : > { %v885_v18 = vpop.f32.mrb[3].mxu0 }
 0x165   : > { %v373_v19 = vpop.f32.mrb[0].mxu1 }
 0x166   : > { %v896_v20 = vpop.f32.mrb[1].mxu1  ;;  %v379_v21 = vsel %vm267_vm2, %v373_v19, -inf }
 0x167   : > { %380 = vmax.xlane.f32.xlu0 %v379_v21  ;;  %v376_v22 = vpop.f32.mrb[2].mxu1  ;;  %v960_v20 = vld [vmem:[%s1135_s1 + $0x8] sm:$0xff]  }
 0x168   : > { %v897_v23 = vpop.f32.mrb[3].mxu1 }
 0x16d   : > { %v483_v24 = vpop.f32.mrb[4].mxu1 }
 0x16e   : > { %v489_v25 = vsel %vm267_vm2, %v483_v24, -inf  ;;  %v908_v26 = vpop.f32.mrb[5].mxu1 }
 0x16f   : > { %490 = vmax.xlane.f32.xlu0 %v489_v25  ;;  %v486_v27 = vpop.f32.mrb[6].mxu1 }
 0x170   : > { %v909_v28 = vpop.f32.mrb[7].mxu1 }
 0x175   : > { %v593_v29 = vpop.f32.mrb[8].mxu1 }
 0x176   : > { %v599_v30 = vsel %vm267_vm2, %v593_v29, -inf  ;;  %v920_v31 = vpop.f32.mrb[9].mxu1 }
 0x177   : > { %600 = vmax.xlane.f32.xlu1 %v599_v30  ;;  %v596_v32 = vpop.f32.mrb[10].mxu1  ;;  %v962_v30 = vld [vmem:[%s1135_s1 + $0x18] sm:$0xff]  }
 0x178   : > { %v921_v33 = vpop.f32.mrb[11].mxu1 }
 0x1f0   : > { %v270_v34 = vpop.xlane.xlu1 %269 }
 0x1f1   : > { %v271_v35 = vsub.f32 %v261_v14, %v270_v34 }
 0x1f3   : > { %v272_v36 = vmul.f32 1.442695, %v271_v35 }
 0x1f4   : > { %v381_v37 = vpop.xlane.xlu0 %380 }
 0x1f5   : > { %963 = vpow2.f32 %v272_v36  ;;  %v382_v38 = vsub.f32 %v373_v19, %v381_v37  ;;  %v959_v19 = vld [vmem:[%s1135_s1] sm:$0xff]  }
 0x1f6   : > { %929 = vmatpush3.bf16.msra.mxu1 %v959_v19 }
 0x1f7   : > { %v383_v39 = vmul.f32 1.442695, %v382_v38  ;;  %930 = vmatprep.subr.bf16.mxu1 %v987_v0 }
 0x1f9   : > { %965 = vpow2.f32 %v383_v39 }
 0x1fa   : > { %931 = vmatpush3.bf16.msra.mxu1 %v960_v20 }
 0x1fb   : > { %932 = vmatprep.subr.bf16.mxu1 %v987_v0 }
 0x1fc   : > { %v491_v40 = vpop.xlane.xlu0 %490 }
 0x1fd   : > { %v492_v41 = vsub.f32 %v483_v24, %v491_v40  ;;  %v961_v24 = vld [vmem:[%s1135_s1 + $0x10] sm:$0xff]  }
 0x1fe   : > { %933 = vmatpush3.bf16.msra.mxu1 %v961_v24 }
 0x1ff   : > { %v964_v42 = vpop.eup %963  ;;  %v493_v43 = vmul.f32 1.442695, %v492_v41  ;;  %934 = vmatprep.subr.bf16.mxu1 %v987_v0  ;;  %v760_v41 = vld [vmem:[%s208_s13] sm:$0xf] }
 0x200   : > { %v274_v44 = vsel %vm267_vm2, %v964_v42, 0.0 }
 0x201   : > { %967 = vpow2.f32 %v493_v43  ;;  %275 = vadd.xlane.f32.xlu0 %v274_v44  ;;  %v761_v43 = vunpack.c.l.bf16 %v760_v41 }
 0x202   : > { %935 = vmatpush3.bf16.msra.mxu1 %v962_v30 }
 0x203   : > { %v966_v45 = vpop.eup %965 }
 0x204   : > { %v385_v46 = vsel %vm267_vm2, %v966_v45, 0.0  ;;  %v601_v51 = vpop.xlane.xlu1 %600 }
 0x205   : > { %386 = vadd.xlane.f32.xlu1 %v385_v46  ;;  %v602_v52 = vsub.f32 %v593_v29, %v601_v51 }
 0x207   : > { %v603_v53 = vmul.f32 1.442695, %v602_v52 }
 0x209   : > { %969 = vpow2.f32 %v603_v53 }
 0x20b   : > { %v968_v47 = vpop.eup %967 }
 0x20c   : > { %v495_v48 = vsel %vm267_vm2, %v968_v47, 0.0 }
 0x20d   : > { %496 = vadd.xlane.f32.xlu0 %v495_v48 }
 0x213   : > { %v970_v54 = vpop.eup %969 }
 0x214   : > { %v605_v55 = vsel %vm267_vm2, %v970_v54, 0.0 }
 0x216   : > { %501 = vrot.lane.b32.xlu1 %v842_v49, %s994_s26 }
 0x223   : > { %391 = vrot.lane.b32.xlu0 %v842_v49, %s990_s22 }
 0x23a   : > { %606 = vadd.xlane.f32.xlu1 %v605_v55 }
 0x24b   : > { %611 = vrot.lane.b32.xlu1 %v842_v49, %s995_s27 }
 0x28e   : > { %v276_v56 = vpop.xlane.xlu0 %275 }
 0x28f   : > { %971 = vrcp.f32 %v276_v56 }
 0x292   : > { %v387_v57 = vpop.xlane.xlu1 %386 }
 0x293   : > { %973 = vrcp.f32 %v387_v57 }
 0x296   : > { %v502_v3 = vpop.permute.xlu1 %501 }
 0x297   : > { %v507_v6 = vsel %vm285_vm3, %v502_v3, 0 }
 0x299   : > { %v972_v58 = vpop.eup %971 }
 0x29a   : > { %v278_v59 = vmul.f32 %v972_v58, %v964_v42  ;;  %v497_v60 = vpop.xlane.xlu0 %496  ;;  %v850_v42 = vld [vmem:[%s1136_s2] ss:$0 sm:$0xff] }
 0x29b   : > { %975 = vrcp.f32 %v497_v60 }
 0x29c   : > { %v279_v61 = vpack.c.bf16 %v278_v59, %v278_v59 }
 0x29d   : > { %v974_v62 = vpop.eup %973 }
 0x29e   : > { %889 = vmatmul.mubr.msk.bf16.vlgmr.msra.gmra.mrb[4].mxu0 %vm267_vm2, %v279_v61  ;;  %v392_v63 = vpop.permute.xlu0 %391  ;;  %v389_v2 = vmul.f32 %v974_v62, %v966_v45 }
 0x29f   : > { %v397_v1 = vsel %vm285_vm3, %v392_v63, 0  ;;  %900 = vmatprep.mubr.msk.bf16.mxu0 %vm988_vm0, %v987_v0 }
 0x2a0   : > { %899 = vmatpush3.bf16.msra.mxu0 %v397_v1  ;;  %v390_v4 = vpack.c.bf16 %v389_v2, %v389_v2 }
 0x2a1   : > { %910 = vmatprep.subr.bf16.mxu0 %v987_v0 }
 0x2a5   : > { %v976_v5 = vpop.eup %975 }
 0x2a6   : > { %901 = vmatmul.mubr.msk.bf16.vlgmr.msra.gmra.mrb[8].mxu0 %vm267_vm2, %v390_v4  ;;  %v499_v7 = vmul.f32 %v976_v5, %v968_v47 }
 0x2a7   : > { %911 = vmatpush3.bf16.msra.mxu0 %v507_v6  ;;  %912 = vmatprep.mubr.msk.bf16.mxu0 %vm988_vm0, %v987_v0 }
 0x2a8   : > { %922 = vmatprep.subr.bf16.mxu0 %v987_v0  ;;  %v500_v8 = vpack.c.bf16 %v499_v7, %v499_v7 }
 0x2ae   : > { %913 = vmatmul.mubr.msk.bf16.vlgmr.msra.gmra.mrb[12].mxu0 %vm267_vm2, %v500_v8 }
 0x2af   : > { %924 = vmatprep.mubr.msk.bf16.mxu0 %vm988_vm0, %v987_v0 }
 0x2c7   : > { %v607_v9 = vpop.xlane.xlu1 %606 }
 0x2c8   : > { %977 = vrcp.f32 %v607_v9 }
 0x2cb   : > { %v612_v10 = vpop.permute.xlu1 %611 }
 0x2cc   : > { %v617_v11 = vsel %vm285_vm3, %v612_v10, 0 }
 0x2cd   : > { %923 = vmatpush3.bf16.msra.mxu0 %v617_v11 }
 0x2d2   : > { %v978_v12 = vpop.eup %977 }
 0x2d3   : > { %v609_v13 = vmul.f32 %v978_v12, %v970_v54 }
 0x2d5   : > { %v610_v14 = vpack.c.bf16 %v609_v13, %v609_v13 }
 0x2d7   : > { %925 = vmatmul.mubr.msk.bf16.vlgmr.msra.gmra.mrb[16].mxu0 %vm267_vm2, %v610_v14 }
 0x371   : > { %v323_v15 = vpop.f32.mrb[4].mxu0 }
 0x372   : > { %v890_v16 = vpop.f32.mrb[5].mxu0 }
 0x373   : > { %v326_v17 = vpop.f32.mrb[6].mxu0 }
 0x374   : > { %v891_v18 = vpop.f32.mrb[7].mxu0 }
 0x379   : > { %v433_v21 = vpop.f32.mrb[8].mxu0 }
 0x37a   : > { %660 = vrot.lane.b32.xlu0 %v433_v21, %s993_s25  ;;  %v902_v22 = vpop.f32.mrb[9].mxu0 }
 0x37b   : > { %v436_v23 = vpop.f32.mrb[10].mxu0 }
 0x37c   : > { %v903_v25 = vpop.f32.mrb[11].mxu0 }
 0x381   : > { %v543_v26 = vpop.f32.mrb[12].mxu0 }
 0x382   : > { %664 = vrot.lane.b32.xlu1 %v543_v26, %s992_s24  ;;  %v914_v27 = vpop.f32.mrb[13].mxu0 }
 0x383   : > { %v546_v28 = vpop.f32.mrb[14].mxu0 }
 0x384   : > { %v915_v29 = vpop.f32.mrb[15].mxu0 }
 0x3aa   : > { %v653_v31 = vpop.f32.mrb[16].mxu0 }
 0x3ab   : > { %668 = vrot.lane.b32.xlu0 %v653_v31, %s991_s23  ;;  %v926_v32 = vpop.f32.mrb[17].mxu0 }
 0x3ac   : > { %v656_v33 = vpop.f32.mrb[18].mxu0 }
 0x3ad   : > { %v927_v34 = vpop.f32.mrb[19].mxu0 }
 0x3ec   : > { %v661_v35 = vpop.permute.xlu0 %660 }
 0x3ed   : > { %v671_v36 = vsel %vm220_vm1, %v323_v15, %v661_v35 }
 0x3f4   : > { %v665_v0 = vpop.permute.xlu1 %664 }
 0x3f5   : > { %v673_v37 = vsel %vm672_vm4, %v671_v36, %v665_v0 }
 0x41d   : > { %v669_v38 = vpop.permute.xlu0 %668 }
 0x41e   : > { %v675_v39 = vsel %vm674_vm5, %v673_v37, %v669_v38 }
 0x41f   : > { %v676_v40 = vpack.c.bf16 %v675_v39, %v675_v39 }
 0x421   : > { %937 = vmatmul.mubr.msk.bf16.vlgmr.msra.gmra.mrb[12].mxu1 %vm716_vm6, %v676_v40 }
 0x4f4   : > { %v754_v44 = vpop.f32.mrb[12].mxu1 }
 0x4f5   : > { %v755_v45 = vadd.f32 %v850_v42, %v754_v44  ;;  %v938_v46 = vpop.f32.mrb[13].mxu1 }
 0x4f6   : > { %v757_v47 = vpop.f32.mrb[14].mxu1 }
 0x4f7   : > { %v762_v48 = vadd.f32 %v761_v43, %v755_v45  ;;  %v939_v49 = vpop.f32.mrb[15].mxu1 }
 0x4f9   : > { %v763_v50 = vpack.c.bf16 %v762_v48, %v762_v48 }
 0x4fb   : > { %765 = vst.msk [vmem:[%s212_s16] sm:$0xf] %vm764_vm7, %v763_v50 }
 0x4fc PF: > { %s14_s15 = sadd.s32 1, %s985_s15  }
 0x4fd   : > { %p11_p4 = scmp.ge.s32.totalorder %s14_s15, 4  }
 0x4ff   :  { %13 = sbr.rel (!%p11_p4) target bundleno = 1 (0x1), region = 69 }

// kernel: _lambda_.26
= control target key start
LH: loop header
LB: loop body
LE: loop exit
PB: predicated region body
PF: predicated region fallthrough
CT: control target
= control target key end

     0   :  { %10 = vsyncpa [#allocation5], 0  ;;  %s278_s18 = smov [#allocation4]   ;;  %s360_s0 = inlined_call_operand.vmem [shape: bf16[16,64], index: 0, kind: input, shape index: {}]   ;;  %s361_s1 = inlined_call_operand.vmem [shape: bf16[64,64], index: 1, kind: input, shape index: {}]   ;;  %s362_s2 = inlined_call_operand.hbm [shape: f32[1,64], index: 2, kind: input, shape index: {}]   ;;  %s363_s3 = inlined_call_operand.vmem [shape: f32[1,64], index: 3, kind: input, shape index: {}]   ;;  %s364_s4 = inlined_call_operand.vmem [shape: f32[1,64], index: 4, kind: input, shape index: {}]   ;;  %s365_s5 = inlined_call_operand.vmem [shape: bf16[16,64], index: 5, kind: output, shape index: {}]  }
   0x1   :  { %s21_s19 = sshll.u32 %s278_s18, 4  ;;  %s254_s22 = scalar_lea.hbm %s362_s2, 16  ;;  %s22_s19 = int_to_ptr.vmem [resolvable:$true] %s21_s19 }
   0x2   :  { %p255_p0 = scmp.ne.s32.totalorder %s362_s2, %s254_s22  ;;  %p258_p1 = scmp.lt.u32.totalorder %s254_s22, %s362_s2 }
   0x4   :  { %p260_p2 = pnand %p258_p1, %p255_p0 }
   0x6   :  { %263 = shalt.err (!%p260_p2)
}
   0x7   :  { %s264_s27 = scalar_lea.vmem %s22_s19, 16  ;;  %s268_s28 = scalar_lea.vmem %s22_s19, 32 }
   0x8   :  { %p265_p3 = scmp.ne.s32.totalorder %s22_s19, %s264_s27  ;;  %p269_p4 = scmp.lt.s32.totalorder %s22_s19, %s22_s19 }
   0x9   :  { %p270_p5 = scmp.lt.s32.totalorder %s268_s28, %s264_s27 }
   0xb   :  { %p271_p6 = por %p270_p5, %p269_p4 }
   0xd   :  { %p272_p7 = pnand %p271_p6, %p265_p3 }
   0xf   :  { %275 = shalt.err (!%p272_p7)
}
  0x10   :  { %24 = dma.hbm_to_vmem [thread:$0]  %s362_s2, 16, %s22_s19, [#allocation5]  }
  0x11   :  { %276 = dma.done.wait [#allocation5], 16  }
  0x12   :  { %277 = vsyncadd [#allocation5], 4294967280  ;;  %vm37_vm0 = vcmask 523264   ;;  %v223_v0 = vld [vmem:[%s360_s0] sm:$0xff]   ;;  %v279_v16 = vmov 0.0   ;;  %v247_v17 = vld [vmem:[%s361_s1 + $0x8] sm:$0xff]  }
  0x13   :  { %v224_v1 = vunpack.c.l.bf16 %v223_v0  ;;  %v225_v2 = vunpack.c.h.bf16 %v223_v0  ;;  %v246_v15 = vld [vmem:[%s361_s1] sm:$0xff]   ;;  %231 = vmatprep.subr.bf16.mxu0 %v279_v16  ;;  %38 = vst.msk [vmem:[#allocation2] sm:$0xff] %vm37_vm0, %v279_v16  ;;  %39 = vst.msk [vmem:[#allocation2 + $0x8] sm:$0xff] %vm37_vm0, %v279_v16  ;;  %v248_v18 = vld [vmem:[%s361_s1 + $0x10] sm:$0xff]   ;;  %vm280_vm1 = vmmov 0   ;;  %vm202_vm2 = vcmask 519168  }
  0x14   :  { %232 = vmatpush3.bf16.msra.mxu0 %v246_v15  ;;  %v249_v19 = vld [vmem:[%s361_s1 + $0x18] sm:$0xff]   ;;  %239 = vmatprep.mubr.msk.bf16.mxu0 %vm280_vm1, %v279_v16  ;;  %v210_v28 = vld [vmem:[%s363_s3] ss:$0 sm:$0xff] }
  0x15   :  { %v51_v3 = vsel %vm37_vm0, %v224_v1, 0.0  ;;  %v54_v4 = vsel %vm37_vm0, %v225_v2, 0.0  ;;  %233 = vmatprep.subr.bf16.mxu0 %v279_v16  ;;  %v211_v32 = vld [vmem:[%s364_s4] ss:$0 sm:$0xff]  ;;  %v217_v46 = vld [vmem:[#allocation4] ss:$0 sm:$0xff] }
  0x16   :  { %52 = vadd.xlane.f32.xlu0 %v51_v3 }
  0x18   :  { %234 = vmatpush3.bf16.msra.mxu0 %v247_v17 }
  0x19   :  { %235 = vmatprep.subr.bf16.mxu0 %v279_v16 }
  0x1a   :  { %55 = vadd.xlane.f32.xlu0 %v54_v4  ;;  %v97_v38 = vld [vmem:[#allocation2] sm:$0xff]  ;;  %v98_v40 = vld [vmem:[#allocation2 + $0x8] sm:$0xff] }
  0x1c   :  { %236 = vmatpush3.bf16.msra.mxu0 %v248_v18 }
  0x1d   :  { %237 = vmatprep.subr.bf16.mxu0 %v279_v16 }
  0x20   :  { %238 = vmatpush3.bf16.msra.mxu0 %v249_v19 }
  0xa3   :  { %v53_v5 = vpop.xlane.xlu0 %52 }
  0xa4   :  { %v58_v6 = vmul.f32 0.015625, %v53_v5 }
  0xa6   :  { %v60_v7 = vsub.f32 %v224_v1, %v58_v6 }
  0xa7   :  { %v56_v8 = vpop.xlane.xlu0 %55 }
  0xa8   :  { %v59_v9 = vmul.f32 0.015625, %v56_v8  ;;  %v62_v10 = vmul.f32 %v60_v7, %v60_v7 }
  0xaa   :  { %v61_v11 = vsub.f32 %v225_v2, %v59_v9  ;;  %v64_v12 = vsel %vm37_vm0, %v62_v10, 0.0 }
  0xab   :  { %65 = vadd.xlane.f32.xlu1 %v64_v12 }
  0xac   :  { %v63_v13 = vmul.f32 %v61_v11, %v61_v11 }
  0xae   :  { %v67_v14 = vsel %vm37_vm0, %v63_v13, 0.0 }
  0xaf   :  { %68 = vadd.xlane.f32.xlu1 %v67_v14 }
 0x138   :  { %v66_v20 = vpop.xlane.xlu1 %65 }
 0x139   :  { %v70_v21 = vmul.f32 0.015625, %v66_v20 }
 0x13b   :  { %v72_v22 = vadd.f32 1e-06, %v70_v21 }
 0x13c   :  { %v69_v23 = vpop.xlane.xlu1 %68 }
 0x13d   :  { %250 = vrsqrt.f32 %v72_v22  ;;  %v71_v24 = vmul.f32 0.015625, %v69_v23 }
 0x13f   :  { %v73_v25 = vadd.f32 1e-06, %v71_v24 }
 0x141   :  { %252 = vrsqrt.f32 %v73_v25 }
 0x147   :  { %v251_v26 = vpop.eup %250 }
 0x148   :  { %v76_v27 = vmul.f32 %v251_v26, %v60_v7 }
 0x14a   :  { %v84_v30 = vmul.f32 %v210_v28, %v76_v27 }
 0x14b   :  { %v253_v29 = vpop.eup %252 }
 0x14c   :  { %v77_v31 = vmul.f32 %v253_v29, %v61_v11  ;;  %v92_v34 = vadd.f32 %v211_v32, %v84_v30 }
 0x14e   :  { %v85_v33 = vmul.f32 %v210_v28, %v77_v31 }
 0x150   :  { %v93_v35 = vadd.f32 %v211_v32, %v85_v33 }
 0x152   :  { %v94_v36 = vpack.c.bf16 %v93_v35, %v92_v34 }
 0x154   :  { %95 = vst.msk [vmem:[#allocation3] sm:$0xff] %vm37_vm0, %v94_v36 }
 0x15b   :  { %v96_v37 = vld [vmem:[#allocation3] sm:$0xff] }
 0x15c   :  { %240 = vmatmul.mubr.msk.bf16.vlgmr.msra.gmra.mrb[0].mxu0 %vm37_vm0, %v96_v37 }
 0x22f   :  { %v169_v39 = vpop.f32.mrb[0].mxu0 }
 0x230   :  { %v176_v41 = vadd.f32 %v169_v39, %v97_v38  ;;  %v241_v42 = vpop.f32.mrb[1].mxu0 }
 0x231   :  { %v172_v43 = vpop.f32.mrb[2].mxu0 }
 0x232   :  { %178 = vst.msk [vmem:[#allocation2] sm:$0xff] %vm37_vm0, %v176_v41  ;;  %v177_v44 = vadd.f32 %v172_v43, %v98_v40  ;;  %v242_v45 = vpop.f32.mrb[3].mxu0 }
 0x234   :  { %179 = vst.msk [vmem:[#allocation2 + $0x8] sm:$0xff] %vm37_vm0, %v177_v44 }
 0x239   :  { %v183_v47 = vld [vmem:[#allocation2] sm:$0xff] }
 0x23a   :  { %v192_v48 = vadd.f32 %v217_v46, %v183_v47 }
 0x23b   :  { %v184_v49 = vld [vmem:[#allocation2 + $0x8] sm:$0xff] }
 0x23c   :  { %v220_v50 = vpack.c.bf16 %v192_v48, %v192_v48  ;;  %v193_v51 = vadd.f32 %v217_v46, %v184_v49 }
 0x23e   :  { %203 = vst.msk [vmem:[%s365_s5] sm:$0xf] %vm202_vm2, %v220_v50  ;;  %v221_v52 = vpack.c.bf16 %v193_v51, %v193_v51 }
 0x240   :  { %204 = vst.msk [vmem:[%s365_s5 + $0x4] sm:$0xf] %vm202_vm2, %v221_v52 }
 0x241   :  { %209 = vsyncpa [#allocation5], 1 }

// kernel: _lambda_.28
= control target key start
LH: loop header
LB: loop body
LE: loop exit
PB: predicated region body
PF: predicated region fallthrough
CT: control target
= control target key end

     0   :  { %s1251_s27 = smov 0   ;;  %s1382_s0 = inlined_call_operand.vmem [shape: bf16[2,8,64], index: 0, kind: input, shape index: {}]   ;;  %s1383_s1 = inlined_call_operand.vmem [shape: bf16[2,4,64], index: 1, kind: input, shape index: {}]   ;;  %s1384_s2 = inlined_call_operand.vmem [shape: bf16[2,4,64], index: 2, kind: input, shape index: {}]   ;;  %s1385_s3 = inlined_call_operand.vmem [shape: bf16[64,64], index: 3, kind: input, shape index: {}]   ;;  %s1386_s4 = inlined_call_operand.vmem [shape: f32[1,64], index: 4, kind: input, shape index: {}]   ;;  %s1387_s5 = inlined_call_operand.vmem [shape: bf16[2,8,64], index: 5, kind: input, shape index: {}]   ;;  %s1388_s6 = inlined_call_operand.vmem [shape: f32[1,64], index: 6, kind: input, shape index: {}]   ;;  %s1389_s7 = inlined_call_operand.vmem [shape: f32[1,64], index: 7, kind: input, shape index: {}]   ;;  %s1390_s8 = inlined_call_operand.vmem [shape: bf16[2,8,64], index: 8, kind: output, shape index: {}]  }
   0x1 LB: > { %s1039_s28 = sadd.s32 4294967295, %s1195_s27   ;;  %p1043_p0 = scmp.ge.s32.totalorder %s1195_s27, 1  ;;  %s1195_s27 = sphi %s1251_s27, %s18_s27  }
   0x2   : > { %p288_p1 = scmp.lt.s32.totalorder %s1195_s27, 3 }
   0x4   : > { %p289_p2 = pnand %p1043_p0, %p288_p1 }
   0x5   : > { %p332_p3 = scmp.lt.s32.totalorder (!%p289_p2), %s1039_s28, 1  ;;  %v505_v0 = vlaneseq (!%p289_p2)  ;;  %v1197_v1 = vmov (!%p289_p2), 0.0   ;;  %vm389_vm0 = vcmask (!%p289_p2), 130048   ;;  %v1198_v2 = vmov (!%p289_p2), 1983009808   ;;  %s1200_s15 = smov (!%p289_p2), 112  }
   0x6   : > { %292 = sbr.rel (%p289_p2) target bundleno = 1239 (0x4d7), region = 52  ;;  %1089 = vmatprep.subr.bf16.mxu0 (!%p289_p2), %v1197_v1  ;;  %v503_v3 = vunpack.c.l.s4 (!%p289_p2), %v1198_v2  ;;  %1101 = vmatprep.subr.bf16.mxu1 (!%p289_p2), %v1197_v1  ;;  %vm1199_vm1 = vmmov (!%p289_p2), 0   ;;  %s1201_s16 = smov (!%p289_p2), 96   ;;  %vm436_vm2 = vcmask (!%p289_p2), 31744   ;;  %vm452_vm3 = vcmask (!%p289_p2), 1041408  }
   0x7   : > { %v506_v4 = vshrl.u32 (!%p289_p2), %v505_v0, 7  ;;  %1091 = vmatprep.mubr.msk.bf16.mxu0 (!%p289_p2), %vm1199_vm1, %v1197_v1  ;;  %1103 = vmatprep.mubr.msk.bf16.mxu1 (!%p289_p2), %vm1199_vm1, %v1197_v1  ;;  %s1202_s17 = smov (!%p289_p2), 80   ;;  %s1204_s10 = smov (!%p289_p2), 32   ;;  %vm357_vm4 = vcmask (!%p289_p2), 523264   ;;  %vm858_vm5 = vcmask (!%p289_p2), 261120   ;;  %vm860_vm6 = vcmask (!%p289_p2), 392192  }
   0x8   : > { %v504_v5 = vunpack.c.0.s8 (!%p289_p2), %v503_v3  ;;  %vm948_vm7 = vcmask (!%p289_p2), 519168  }
   0xa   : > { %v1276_v6 = vsub.s32 (!%p289_p2), %v504_v5, %v506_v4 }
   0xd   : > { %s1392_s28 = smov (!%p332_p3, %s1039_s28), 1 }
   0xe   : > { %s1045_s29 = sshll.u32 %s1392_s28, 1  ;;  %s1269_s30 = sshll.u32 %s1392_s28, 2 }
   0xf   : > { %s339_s11 = scalar_lea.vmem %s1383_s1, %s1045_s29  ;;  %s335_s14 = scalar_lea.vmem %s1382_s0, %s1269_s30 }
  0x10   : > { %v387_v7 = vld [vmem:[%s339_s11] sm:$0x3]  ;;  %s343_s20 = scalar_lea.vmem %s1384_s2, %s1045_s29  ;;  %s1203_s28 = smov 16  }
  0x11   : > { %v394_v8 = vsel %vm389_vm0, %v387_v7, 0  ;;  %v508_v9 = vrot.slane %v387_v7, %v1276_v6  ;;  %v386_v10 = vld [vmem:[%s335_s14] sm:$0xf]  ;;  %s1205_s11 = smov 48   ;;  %s347_s14 = scalar_lea.vmem %s1387_s5, %s1269_s30 }
  0x12   : > { %1090 = vmatpush3.bf16.xpose.msra.mxu0 %v394_v8  ;;  %v1053_v11 = vcombine.low %v386_v10, %v386_v10  ;;  %v388_v46 = vld [vmem:[%s343_s20] sm:$0x3]  ;;  %s351_s23 = scalar_lea.vmem %s1390_s8, %s1269_s30 }
  0x13   : > { %509 = vrot.lane.b32.xlu0 %v508_v9, %s1200_s15  ;;  %627 = vrot.lane.b32.xlu1 %v508_v9, %s1201_s16  ;;  %v576_v47 = vrot.slane %v388_v46, %v1276_v6  ;;  %v454_v48 = vsel %vm452_vm3, %v388_v46, 0 }
  0x14   : > { %1095 = vmatprep.subr.bf16.mxu0 %v1197_v1 }
  0x17   : > { %499 = vrot.lane.b32.xlu0 %v1053_v11, %s1200_s15  ;;  %625 = vrot.lane.b32.xlu1 %v1053_v11, %s1201_s16 }
  0x19   : > { %1092 = vmatmul.mubr.msk.bf16.vlgmr.msra.gmra.mrb[0].mxu0 %vm389_vm0, %v386_v10 }
  0x1a   : > { %1097 = vmatprep.mubr.msk.bf16.mxu0 %vm1199_vm1, %v1197_v1  ;;  %1096 = vmatpush3.bf16.msra.mxu0 %v454_v48 }
  0x1b   : > { %737 = vrot.lane.b32.xlu0 %v508_v9, %s1202_s17  ;;  %735 = vrot.lane.b32.xlu1 %v1053_v11, %s1202_s17 }
  0x1c   : > { %1107 = vmatprep.subr.bf16.mxu0 %v1197_v1 }
  0x85   : > { %v510_v12 = vpop.permute.xlu0 %509  ;;  %v628_v14 = vpop.permute.xlu1 %627 }
  0x86   : > { %v515_v13 = vsel %vm389_vm0, %v510_v12, 0  ;;  %v633_v16 = vsel %vm389_vm0, %v628_v14, 0 }
  0x87   : > { %1102 = vmatpush3.bf16.xpose.msra.mxu1 %v515_v13 }
  0x88   : > { %1113 = vmatprep.subr.bf16.mxu1 %v1197_v1 }
  0x89   : > { %v500_v15 = vpop.permute.xlu0 %499  ;;  %v626_v18 = vpop.permute.xlu1 %625 }
  0x8d   : > { %v738_v17 = vpop.permute.xlu0 %737  ;;  %v736_v20 = vpop.permute.xlu1 %735 }
  0x8e   : > { %1104 = vmatmul.mubr.msk.bf16.vlgmr.msra.gmra.mrb[0].mxu1 %vm389_vm0, %v500_v15  ;;  %v743_v19 = vsel %vm389_vm0, %v738_v17, 0 }
  0x8f   : > { %1114 = vmatpush3.bf16.xpose.msra.mxu1 %v633_v16  ;;  %1115 = vmatprep.mubr.msk.bf16.mxu1 %vm1199_vm1, %v1197_v1 }
  0x90   : > { %1125 = vmatprep.subr.bf16.mxu1 %v1197_v1 }
  0x96   : > { %1116 = vmatmul.mubr.msk.bf16.vlgmr.msra.gmra.mrb[4].mxu1 %vm389_vm0, %v626_v18 }
  0x97   : > { %1126 = vmatpush3.bf16.xpose.msra.mxu1 %v743_v19  ;;  %1127 = vmatprep.mubr.msk.bf16.mxu1 %vm1199_vm1, %v1197_v1 }
  0x98   : > { %1137 = vmatprep.subr.bf16.mxu1 %v1197_v1 }
  0x9e   : > { %1128 = vmatmul.mubr.msk.bf16.vlgmr.msra.gmra.mrb[8].mxu1 %vm389_vm0, %v736_v20 }
  0x9f   : > { %1145 = vmatprep.mubr.msk.bf16.mxu1 %vm1199_vm1, %v1197_v1 }
  0xec   : > { %v430_v21 = vpop.f32.mrb[0].mxu0 }
  0xed   : > { %v437_v22 = vsel %vm436_vm2, %v430_v21, -inf  ;;  %v1093_v23 = vpop.f32.mrb[1].mxu0 }
  0xee   : > { %438 = vmax.xlane.f32.xlu0 %v437_v22  ;;  %v433_v24 = vpop.f32.mrb[2].mxu0 }
  0xef   : > { %v1094_v25 = vpop.f32.mrb[3].mxu0 }
 0x161   : > { %v551_v26 = vpop.f32.mrb[0].mxu1 }
 0x162   : > { %v1105_v27 = vpop.f32.mrb[1].mxu1  ;;  %v557_v28 = vsel %vm436_vm2, %v551_v26, -inf }
 0x163   : > { %558 = vmax.xlane.f32.xlu1 %v557_v28  ;;  %v554_v29 = vpop.f32.mrb[2].mxu1  ;;  %v1167_v27 = vld [vmem:[%s1385_s3] sm:$0xff]   ;;  %v1168_v28 = vld [vmem:[%s1385_s3 + $0x8] sm:$0xff]  }
 0x164   : > { %v1106_v30 = vpop.f32.mrb[3].mxu1  ;;  %1138 = vmatpush3.bf16.msra.mxu1 %v1167_v27  ;;  %v1169_v29 = vld [vmem:[%s1385_s3 + $0x10] sm:$0xff]  }
 0x165   : > { %1139 = vmatprep.subr.bf16.mxu1 %v1197_v1 }
 0x168   : > { %1140 = vmatpush3.bf16.msra.mxu1 %v1168_v28 }
 0x169   : > { %v669_v31 = vpop.f32.mrb[4].mxu1  ;;  %1141 = vmatprep.subr.bf16.mxu1 %v1197_v1 }
 0x16a   : > { %v1117_v32 = vpop.f32.mrb[5].mxu1  ;;  %v675_v33 = vsel %vm436_vm2, %v669_v31, -inf }
 0x16b   : > { %v672_v34 = vpop.f32.mrb[6].mxu1  ;;  %676 = vmax.xlane.f32.xlu0 %v675_v33 }
 0x16c   : > { %v1118_v35 = vpop.f32.mrb[7].mxu1  ;;  %1142 = vmatpush3.bf16.msra.mxu1 %v1169_v29  ;;  %v1170_v34 = vld [vmem:[%s1385_s3 + $0x18] sm:$0xff]  }
 0x16d   : > { %1143 = vmatprep.subr.bf16.mxu1 %v1197_v1 }
 0x170   : > { %1144 = vmatpush3.bf16.msra.mxu1 %v1170_v34 }
 0x171   : > { %v779_v36 = vpop.f32.mrb[8].mxu1 }
 0x172   : > { %v1129_v37 = vpop.f32.mrb[9].mxu1  ;;  %v785_v38 = vsel %vm436_vm2, %v779_v36, -inf }
 0x173   : > { %v782_v39 = vpop.f32.mrb[10].mxu1  ;;  %786 = vmax.xlane.f32.xlu0 %v785_v38 }
 0x174   : > { %v1130_v40 = vpop.f32.mrb[11].mxu1 }
 0x17b   : > { %v439_v41 = vpop.xlane.xlu0 %438 }
 0x17c   : > { %v440_v42 = vsub.f32 %v430_v21, %v439_v41 }
 0x17e   : > { %v441_v43 = vmul.f32 1.442695, %v440_v42 }
 0x180   : > { %1171 = vpow2.f32 %v441_v43 }
 0x18a   : > { %v1172_v44 = vpop.eup %1171 }
 0x18b   : > { %v443_v45 = vsel %vm436_vm2, %v1172_v44, 0.0 }
 0x18c   : > { %444 = vadd.xlane.f32.xlu1 %v443_v45 }
 0x19d   : > { %577 = vrot.lane.b32.xlu1 %v576_v47, %s1200_s15 }
 0x1f0   : > { %v559_v49 = vpop.xlane.xlu1 %558 }
 0x1f1   : > { %v560_v50 = vsub.f32 %v551_v26, %v559_v49 }
 0x1f3   : > { %v561_v51 = vmul.f32 1.442695, %v560_v50 }
 0x1f5   : > { %1173 = vpow2.f32 %v561_v51 }
 0x1f8   : > { %v677_v52 = vpop.xlane.xlu0 %676 }
 0x1f9   : > { %v678_v53 = vsub.f32 %v669_v31, %v677_v52 }
 0x1fb   : > { %v679_v54 = vmul.f32 1.442695, %v678_v53 }
 0x1fd   : > { %1175 = vpow2.f32 %v679_v54 }
 0x1ff   : > { %v1174_v55 = vpop.eup %1173 }
 0x200   : > { %v787_v56 = vpop.xlane.xlu0 %786  ;;  %v563_v57 = vsel %vm436_vm2, %v1174_v55, 0.0 }
 0x201   : > { %v788_v58 = vsub.f32 %v779_v36, %v787_v56  ;;  %564 = vadd.xlane.f32.xlu0 %v563_v57 }
 0x203   : > { %v789_v59 = vmul.f32 1.442695, %v788_v58 }
 0x205   : > { %1177 = vpow2.f32 %v789_v59 }
 0x207   : > { %v1176_v60 = vpop.eup %1175 }
 0x208   : > { %v681_v61 = vsel %vm436_vm2, %v1176_v60, 0.0 }
 0x209   : > { %682 = vadd.xlane.f32.xlu1 %v681_v61 }
 0x20f   : > { %v1178_v62 = vpop.eup %1177 }
 0x210   : > { %v791_v63 = vsel %vm436_vm2, %v1178_v62, 0.0 }
 0x211   : > { %792 = vadd.xlane.f32.xlu0 %v791_v63 }
 0x219   : > { %v445_v0 = vpop.xlane.xlu1 %444 }
 0x21a   : > { %1179 = vrcp.f32 %v445_v0  ;;  %797 = vrot.lane.b32.xlu1 %v576_v47, %s1202_s17 }
 0x21d   : > { %v578_v3 = vpop.permute.xlu1 %577 }
 0x21e   : > { %v583_v6 = vsel %vm452_vm3, %v578_v3, 0 }
 0x224   : > { %v1180_v2 = vpop.eup %1179 }
 0x225   : > { %v447_v4 = vmul.f32 %v1180_v2, %v1172_v44  ;;  %v1050_v2 = vld [vmem:[%s1389_s7] ss:$0 sm:$0xff] }
 0x227   : > { %v448_v5 = vpack.c.bf16 %v447_v4, %v447_v4  ;;  %687 = vrot.lane.b32.xlu0 %v576_v47, %s1201_s16 }
 0x229   : > { %1098 = vmatmul.mubr.msk.bf16.vlgmr.msra.gmra.mrb[4].mxu0 %vm436_vm2, %v448_v5 }
 0x22a   : > { %1108 = vmatpush3.bf16.msra.mxu0 %v583_v6  ;;  %1109 = vmatprep.mubr.msk.bf16.mxu0 %vm1199_vm1, %v1197_v1 }
 0x22b   : > { %1119 = vmatprep.subr.bf16.mxu0 %v1197_v1 }
 0x28e   : > { %v565_v7 = vpop.xlane.xlu0 %564 }
 0x28f   : > { %1181 = vrcp.f32 %v565_v7 }
 0x296   : > { %v683_v8 = vpop.xlane.xlu1 %682 }
 0x297   : > { %1183 = vrcp.f32 %v683_v8 }
 0x299   : > { %v1182_v9 = vpop.eup %1181 }
 0x29a   : > { %v567_v10 = vmul.f32 %v1182_v9, %v1174_v55  ;;  %v798_v16 = vpop.permute.xlu1 %797 }
 0x29b   : > { %v803_v19 = vsel %vm452_vm3, %v798_v16, 0 }
 0x29c   : > { %v568_v11 = vpack.c.bf16 %v567_v10, %v567_v10 }
 0x29e   : > { %1110 = vmatmul.mubr.msk.bf16.vlgmr.msra.gmra.mrb[8].mxu0 %vm436_vm2, %v568_v11  ;;  %v793_v12 = vpop.xlane.xlu0 %792 }
 0x29f   : > { %1185 = vrcp.f32 %v793_v12  ;;  %1121 = vmatprep.mubr.msk.bf16.mxu0 %vm1199_vm1, %v1197_v1 }
 0x2a1   : > { %v1184_v13 = vpop.eup %1183 }
 0x2a2   : > { %v685_v14 = vmul.f32 %v1184_v13, %v1176_v60  ;;  %v688_v15 = vpop.permute.xlu0 %687  ;;  %v1060_v60 = vld [vmem:[%s1386_s4] ss:$0 sm:$0xff] }
 0x2a3   : > { %v693_v17 = vsel %vm452_vm3, %v688_v15, 0 }
 0x2a4   : > { %1120 = vmatpush3.bf16.msra.mxu0 %v693_v17  ;;  %v686_v18 = vpack.c.bf16 %v685_v14, %v685_v14 }
 0x2a5   : > { %1131 = vmatprep.subr.bf16.mxu0 %v1197_v1 }
 0x2a7   : > { %1122 = vmatmul.mubr.msk.bf16.vlgmr.msra.gmra.mrb[12].mxu0 %vm436_vm2, %v686_v18 }
 0x2a8   : > { %1132 = vmatpush3.bf16.msra.mxu0 %v803_v19  ;;  %1133 = vmatprep.mubr.msk.bf16.mxu0 %vm1199_vm1, %v1197_v1  ;;  %v353_v1 = vld [vmem:[%s347_s14] sm:$0xf] }
 0x2a9   : > { %v1186_v20 = vpop.eup %1185  ;;  %v354_v43 = vunpack.c.l.bf16 %v353_v1 }
 0x2aa   : > { %v795_v21 = vmul.f32 %v1186_v20, %v1178_v62  ;;  %v1049_v62 = vld [vmem:[%s1388_s6] ss:$0 sm:$0xff] }
 0x2ab   : > { %v358_v44 = vsel %vm357_vm4, %v354_v43, 0.0 }
 0x2ac   : > { %v796_v22 = vpack.c.bf16 %v795_v21, %v795_v21 }
 0x2af   : > { %1134 = vmatmul.mubr.msk.bf16.vlgmr.msra.gmra.mrb[16].mxu0 %vm436_vm2, %v796_v22 }
 0x2fc   : > { %v490_v23 = vpop.f32.mrb[4].mxu0 }
 0x2fd   : > { %v1099_v24 = vpop.f32.mrb[5].mxu0 }
 0x2fe   : > { %v493_v25 = vpop.f32.mrb[6].mxu0 }
 0x2ff   : > { %v1100_v26 = vpop.f32.mrb[7].mxu0 }
 0x371   : > { %v619_v30 = vpop.f32.mrb[8].mxu0 }
 0x372   : > { %846 = vrot.lane.b32.xlu1 %v619_v30, %s1203_s28  ;;  %v1111_v31 = vpop.f32.mrb[9].mxu0 }
 0x373   : > { %v622_v32 = vpop.f32.mrb[10].mxu0 }
 0x374   : > { %v1112_v33 = vpop.f32.mrb[11].mxu0 }
 0x37a   : > { %v729_v35 = vpop.f32.mrb[12].mxu0 }
 0x37b   : > { %850 = vrot.lane.b32.xlu0 %v729_v35, %s1204_s10  ;;  %v1123_v36 = vpop.f32.mrb[13].mxu0 }
 0x37c   : > { %v732_v37 = vpop.f32.mrb[14].mxu0 }
 0x37d   : > { %v1124_v38 = vpop.f32.mrb[15].mxu0 }
 0x382   : > { %v839_v39 = vpop.f32.mrb[16].mxu0 }
 0x383   : > { %854 = vrot.lane.b32.xlu1 %v839_v39, %s1205_s11  ;;  %v1135_v40 = vpop.f32.mrb[17].mxu0 }
 0x384   : > { %v842_v41 = vpop.f32.mrb[18].mxu0 }
 0x385   : > { %v1136_v42 = vpop.f32.mrb[19].mxu0 }
 0x39a   : > { %359 = vadd.xlane.f32.xlu0 %v358_v44 }
 0x3e4   : > { %v847_v45 = vpop.permute.xlu1 %846 }
 0x3e5   : > { %v857_v47 = vsel %vm389_vm0, %v490_v23, %v847_v45 }
 0x3ed   : > { %v851_v46 = vpop.permute.xlu0 %850 }
 0x3ee   : > { %v859_v48 = vsel %vm858_vm5, %v857_v47, %v851_v46 }
 0x3f5   : > { %v855_v49 = vpop.permute.xlu1 %854 }
 0x3f6   : > { %v861_v50 = vsel %vm860_vm6, %v859_v48, %v855_v49 }
 0x3f7   : > { %v862_v51 = vpack.c.bf16 %v861_v50, %v861_v50 }
 0x3f9   : > { %1146 = vmatmul.mubr.msk.bf16.vlgmr.msra.gmra.mrb[12].mxu1 %vm357_vm4, %v862_v51 }
 0x427   : > { %v360_v52 = vpop.xlane.xlu0 %359 }
 0x428   : > { %v362_v53 = vmul.f32 0.015625, %v360_v52 }
 0x42a   : > { %v363_v54 = vsub.f32 %v354_v43, %v362_v53 }
 0x42c   : > { %v364_v55 = vmul.f32 %v363_v54, %v363_v54 }
 0x42e   : > { %v365_v56 = vsel %vm357_vm4, %v364_v55, 0.0 }
 0x42f   : > { %366 = vadd.xlane.f32.xlu1 %v365_v56 }
 0x4bc   : > { %v367_v57 = vpop.xlane.xlu1 %366 }
 0x4bd   : > { %v368_v58 = vmul.f32 0.015625, %v367_v57 }
 0x4bf   : > { %v369_v59 = vadd.f32 1e-06, %v368_v58 }
 0x4c1   : > { %1187 = vrsqrt.f32 %v369_v59 }
 0x4cb   : > { %v1188_v61 = vpop.eup %1187 }
 0x4cc   : > { %v371_v63 = vmul.f32 %v1188_v61, %v363_v54  ;;  %v939_v0 = vpop.f32.mrb[12].mxu1 }
 0x4cd   : > { %v940_v3 = vadd.f32 %v1060_v60, %v939_v0  ;;  %v1147_v4 = vpop.f32.mrb[13].mxu1 }
 0x4ce   : > { %v378_v5 = vmul.f32 %v1049_v62, %v371_v63  ;;  %v942_v6 = vpop.f32.mrb[14].mxu1 }
 0x4cf   : > { %v945_v7 = vadd.f32 %v940_v3, %v354_v43  ;;  %v1148_v8 = vpop.f32.mrb[15].mxu1 }
 0x4d0   : > { %v385_v9 = vadd.f32 %v1050_v2, %v378_v5 }
 0x4d2   : > { %v946_v10 = vadd.f32 %v945_v7, %v385_v9 }
 0x4d4   : > { %v947_v11 = vpack.c.bf16 %v946_v10, %v946_v10 }
 0x4d6   : > { %949 = vst.msk [vmem:[%s351_s23] sm:$0xf] %vm948_vm7, %v947_v11 }
 0x4d7 PF: > { %s18_s27 = sadd.s32 1, %s1195_s27  }
 0x4d8   : > { %p15_p4 = scmp.ge.s32.totalorder %s18_s27, 4  }
 0x4da   :  { %17 = sbr.rel (!%p15_p4) target bundleno = 1 (0x1), region = 91 }

// kernel: _lambda_.29
= control target key start
LH: loop header
LB: loop body
LE: loop exit
PB: predicated region body
PF: predicated region fallthrough
CT: control target
= control target key end

     0   :  { %s939_s18 = smov 0   ;;  %s941_s19 = smov 0   ;;  %s1050_s0 = inlined_call_operand.vmem [shape: bf16[16,64], index: 0, kind: input, shape index: {}]   ;;  %s1051_s1 = inlined_call_operand.vmem [shape: bf16[64,256], index: 1, kind: input, shape index: {}]   ;;  %s1052_s2 = inlined_call_operand.vmem [shape: f32[1,256], index: 2, kind: input, shape index: {}]   ;;  %s1053_s3 = inlined_call_operand.vmem [shape: f32[1,64], index: 3, kind: input, shape index: {}]   ;;  %s1054_s4 = inlined_call_operand.vmem [shape: f32[1,64], index: 4, kind: input, shape index: {}]   ;;  %s1055_s5 = inlined_call_operand.vmem [shape: bf16[16,256], index: 5, kind: output, shape index: {}]  }
   0x1   :  { %s943_s20 = smov 0   ;;  %s945_s21 = smov 0  }
   0x2   :  { %s947_s22 = smov 0  }
   0x3 LB: > { %s30_s23 = sadd.s32 1, %s901_s21  ;;  %s758_s24 = sadd.s32 4294967295, %s905_s22   ;;  %s905_s22 = sphi %s947_s22, %s15_s22   ;;  %s901_s21 = sphi %s945_s21, %s1060_s21   ;;  %s897_s20 = sphi %s943_s20, %s1059_s20   ;;  %s893_s19 = sphi %s941_s19, %s1058_s19   ;;  %s889_s18 = sphi %s939_s18, %s1057_s18  }
   0x4   : > { %p32_p0 = scmp.ge.s32.totalorder %s30_s23, 2  ;;  %p78_p1 = scmp.ne.s32.totalorder %s893_s19, %s889_s18 }
   0x5   : > { %p79_p2 = scmp.eq.s32.totalorder %s905_s22, 0  ;;  %p188_p4 = scmp.eq.s32.totalorder %s758_s24, 1 }
   0x6   : > { %s1062_s23 = smov (%p32_p0, %s30_s23), 0  ;;  %s71_s26 = sadd.s32 1, %s893_s19 }
   0x7   : > { %p80_p3 = por %p79_p2, %p78_p1  ;;  %s67_s25 = ssub.s32 %s901_s21, %s1062_s23 }
   0x8   : > { %p69_p5 = scmp.eq.s32.totalorder %s67_s25, 0  ;;  %p974_p6 = por %p188_p4, %p78_p1 }
   0x9   : > { %p764_p7 = scmp.ge.s32.totalorder %s905_s22, 2 }
   0xa   : > { %s979_s28 = scalar_select %p69_p5, %s893_s19, %s71_s26  }
   0xb   : > { %234 = sbr.rel (%p764_p7) target bundleno = 27 (0x1b), region = 28 }
  0x12   : > { %237 = sbr.rel (!%p80_p3) target bundleno = 27 (0x1b), region = 32  ;;  %s239_s29 = sand.u32 (%p80_p3), 1, %s893_s19  }
  0x13   : > { %s766_s30 = sshll.u32 (%p80_p3), %s901_s21, 2  ;;  %s765_s6 = sshll.u32 (%p80_p3), %s239_s29, 5 }
  0x14   : > { %s246_s9 = scalar_lea.vmem (%p80_p3), %s1051_s1, %s766_s30  ;;  %s241_s10 = scalar_lea.vmem (%p80_p3), [#allocation4], %s765_s6 }
  0x15   : > { %v262_v0 = vld [vmem:[%s246_s9] sm:$0xf] (%p80_p3)  ;;  %v264_v1 = vld [vmem:[%s246_s9 + $0x8] sm:$0xf] (%p80_p3)  ;;  %v266_v2 = vld [vmem:[%s246_s9 + $0x10] sm:$0xf] (%p80_p3) }
  0x16   : > { %263 = vst [vmem:[%s241_s10] sm:$0xf] (%p80_p3), %v262_v0  ;;  %265 = vst [vmem:[%s241_s10 + $0x4] sm:$0xf] (%p80_p3), %v264_v1  ;;  %v268_v3 = vld [vmem:[%s246_s9 + $0x18] sm:$0xf] (%p80_p3) }
  0x17   : > { %v270_v4 = vld [vmem:[%s246_s9 + $0x20] sm:$0xf] (%p80_p3)  ;;  %267 = vst [vmem:[%s241_s10 + $0x8] sm:$0xf] (%p80_p3), %v266_v2  ;;  %269 = vst [vmem:[%s241_s10 + $0xc] sm:$0xf] (%p80_p3), %v268_v3 }
  0x18   : > { %271 = vst [vmem:[%s241_s10 + $0x10] sm:$0xf] (%p80_p3), %v270_v4  ;;  %v272_v5 = vld [vmem:[%s246_s9 + $0x28] sm:$0xf] (%p80_p3)  ;;  %v274_v6 = vld [vmem:[%s246_s9 + $0x30] sm:$0xf] (%p80_p3) }
  0x19   : > { %v276_v7 = vld [vmem:[%s246_s9 + $0x38] sm:$0xf]  ;;  %273 = vst [vmem:[%s241_s10 + $0x14] sm:$0xf] %v272_v5  ;;  %275 = vst [vmem:[%s241_s10 + $0x18] sm:$0xf] %v274_v6 }
  0x1a   : > { %277 = vst [vmem:[%s241_s10 + $0x1c] sm:$0xf] %v276_v7 }
  0x1b PF: > { %p767_p8 = scmp.ge.s32.totalorder %s905_s22, 1  ;;  %p321_p9 = scmp.lt.s32.totalorder %s905_s22, 3 }
  0x1d   : > { %p322_p10 = pnand %p767_p8, %p321_p9 }
  0x1e   : > { %s328_s11 = sand.u32 (!%p322_p10), 1, %s889_s18   ;;  %p381_p11 = scmp.lt.s32.totalorder (!%p322_p10), %s897_s20, 1  ;;  %v907_v8 = vmov (!%p322_p10), 0.0  }
  0x1f   : > { %325 = sbr.rel (%p322_p10) target bundleno = 632 (0x278), region = 77  ;;  %s768_s12 = sshll.u32 (!%p322_p10), %s328_s11, 5  ;;  %396 = vst [vmem:[#allocation2] sm:$0xff] (!%p322_p10), %v907_v8  ;;  %397 = vst [vmem:[#allocation2 + $0x8] sm:$0xff] (!%p322_p10), %v907_v8 }
  0x20   : > { %s769_s13 = sshll.u32 (!%p322_p10), %s328_s11, 3  ;;  %s998_s24 = scalar_lea.vmem (!%p322_p10), [#allocation4], %s768_s12 }
  0x21   : > { %s1000_s25 = scalar_lea.vmem (!%p322_p10), [#allocation5], %s769_s13  ;;  %p770_p12 = scmp.ne.s32.totalorder (!%p322_p10), %s897_s20, 0 }
  0x26   : > { %s992_s14 = scalar_select %p381_p11, %s897_s20, 1 }
  0x27   : > { %401 = sbr.rel (%p770_p12) target bundleno = 362 (0x16a), region = 89  ;;  %v788_v9 = vld [vmem:[%s1050_s0] sm:$0xff] (!%p770_p12)   ;;  %vm408_vm0 = vcmask (!%p770_p12), 523264  }
  0x28   : > { %s383_s17 = scalar_lea.vmem %s1052_s2, %s992_s14  ;;  %v789_v10 = vunpack.c.l.bf16 (!%p770_p12), %v788_v9  ;;  %v790_v11 = vunpack.c.h.bf16 (!%p770_p12), %v788_v9  ;;  %v771_v32 = vld [vmem:[%s1053_s3] ss:$0 sm:$0xff] (!%p770_p12) }
  0x29   : > { %v772_v36 = vld [vmem:[%s1054_s4] ss:$0 sm:$0xff] (!%p770_p12) }
  0x2a   : > { %v409_v12 = vsel (!%p770_p12), %vm408_vm0, %v789_v10, 0.0  ;;  %v412_v13 = vsel (!%p770_p12), %vm408_vm0, %v790_v11, 0.0 }
  0x2b   : > { %410 = vadd.xlane.f32.xlu0 (!%p770_p12), %v409_v12 }
  0x2f   : > { %413 = vadd.xlane.f32.xlu0 %v412_v13 }
  0xb8   : > { %v411_v14 = vpop.xlane.xlu0 %410 }
  0xb9   : > { %v416_v15 = vmul.f32 0.015625, %v411_v14 }
  0xbb   : > { %v418_v16 = vsub.f32 %v789_v10, %v416_v15 }
  0xbc   : > { %v414_v17 = vpop.xlane.xlu0 %413 }
  0xbd   : > { %v417_v18 = vmul.f32 0.015625, %v414_v17  ;;  %v420_v19 = vmul.f32 %v418_v16, %v418_v16 }
  0xbf   : > { %v419_v20 = vsub.f32 %v790_v11, %v417_v18  ;;  %v422_v21 = vsel %vm408_vm0, %v420_v19, 0.0 }
  0xc0   : > { %423 = vadd.xlane.f32.xlu1 %v422_v21 }
  0xc1   : > { %v421_v22 = vmul.f32 %v419_v20, %v419_v20 }
  0xc3   : > { %v425_v23 = vsel %vm408_vm0, %v421_v22, 0.0 }
  0xc4   : > { %426 = vadd.xlane.f32.xlu1 %v425_v23 }
 0x14d   : > { %v424_v24 = vpop.xlane.xlu1 %423 }
 0x14e   : > { %v428_v25 = vmul.f32 0.015625, %v424_v24 }
 0x150   : > { %v430_v26 = vadd.f32 1e-06, %v428_v25 }
 0x151   : > { %v427_v27 = vpop.xlane.xlu1 %426 }
 0x152   : > { %855 = vrsqrt.f32 %v430_v26  ;;  %v429_v28 = vmul.f32 0.015625, %v427_v27 }
 0x154   : > { %v431_v29 = vadd.f32 1e-06, %v429_v28 }
 0x156   : > { %857 = vrsqrt.f32 %v431_v29 }
 0x15c   : > { %v856_v30 = vpop.eup %855 }
 0x15d   : > { %v434_v31 = vmul.f32 %v856_v30, %v418_v16 }
 0x15f   : > { %v442_v34 = vmul.f32 %v771_v32, %v434_v31 }
 0x160   : > { %v858_v33 = vpop.eup %857 }
 0x161   : > { %v435_v35 = vmul.f32 %v858_v33, %v419_v20  ;;  %v450_v38 = vadd.f32 %v772_v36, %v442_v34 }
 0x163   : > { %v443_v37 = vmul.f32 %v771_v32, %v435_v35 }
 0x165   : > { %v451_v39 = vadd.f32 %v772_v36, %v443_v37 }
 0x167   : > { %v452_v40 = vpack.c.bf16 %v451_v39, %v450_v38 }
 0x169   : > { %453 = vst.msk [vmem:[#allocation3] sm:$0xff] %vm408_vm0, %v452_v40 }
 0x16a PF: > { %801 = vmatprep.subr.bf16.mxu0 %v907_v8  ;;  %v859_v41 = vld [vmem:[%s998_s24] sm:$0xff]   ;;  %vm908_vm1 = vmmov 0   ;;  %v860_v42 = vld [vmem:[%s998_s24 + $0x8] sm:$0xff]   ;;  %v861_v43 = vld [vmem:[%s998_s24 + $0x10] sm:$0xff]   ;;  %vm489_vm2 = vcmask 523264   ;;  %s782_s10 = sshll.u32 (%p974_p6), %s897_s20, 2 }
 0x16b   : > { %809 = vmatprep.mubr.msk.bf16.mxu0 %vm908_vm1, %v907_v8  ;;  %802 = vmatpush3.bf16.msra.mxu0 %v859_v41  ;;  %v862_v44 = vld [vmem:[%s998_s24 + $0x18] sm:$0xff]   ;;  %v455_v46 = vld [vmem:[#allocation2] sm:$0xff]  ;;  %v456_v49 = vld [vmem:[#allocation2 + $0x8] sm:$0xff]  ;;  %s591_s13 = scalar_lea.vmem (%p974_p6), %s1055_s5, %s782_s10 }
 0x16c   : > { %803 = vmatprep.subr.bf16.mxu0 %v907_v8  ;;  %v778_v48 = vld [vmem:[%s383_s17] ss:$0 sm:$0xff] }
 0x16f   : > { %804 = vmatpush3.bf16.msra.mxu0 %v860_v42 }
 0x170   : > { %805 = vmatprep.subr.bf16.mxu0 %v907_v8  ;;  %v454_v45 = vld [vmem:[#allocation3] sm:$0xff] }
 0x173   : > { %806 = vmatpush3.bf16.msra.mxu0 %v861_v43 }
 0x174   : > { %807 = vmatprep.subr.bf16.mxu0 %v907_v8 }
 0x177   : > { %808 = vmatpush3.bf16.msra.mxu0 %v862_v44 }
 0x17a   : > { %810 = vmatmul.mubr.msk.bf16.vlgmr.msra.gmra.mrb[0].mxu0 %vm489_vm2, %v454_v45 }
 0x24d   : > { %v527_v47 = vpop.f32.mrb[0].mxu0 }
 0x24e   : > { %v534_v50 = vadd.f32 %v527_v47, %v455_v46  ;;  %v811_v51 = vpop.f32.mrb[1].mxu0 }
 0x24f   : > { %v530_v52 = vpop.f32.mrb[2].mxu0 }
 0x250   : > { %536 = vst [vmem:[#allocation2] sm:$0xff] %v534_v50  ;;  %v550_v53 = vadd.f32 %v778_v48, %v534_v50  ;;  %v535_v54 = vadd.f32 %v530_v52, %v456_v49  ;;  %v812_v55 = vpop.f32.mrb[3].mxu0 }
 0x252   : > { %v554_v56 = vmul.f32 0.044715, %v550_v53  ;;  %537 = vst [vmem:[#allocation2 + $0x8] sm:$0xff] %v535_v54  ;;  %v551_v57 = vadd.f32 %v778_v48, %v535_v54  ;;  %v552_v6 = vmul.f32 0.5, %v550_v53 }
 0x254   : > { %v556_v58 = vmul.f32 %v554_v56, %v550_v53  ;;  %v555_v59 = vmul.f32 0.044715, %v551_v57  ;;  %v553_v7 = vmul.f32 0.5, %v551_v57 }
 0x256   : > { %v558_v60 = vmul.f32 %v556_v58, %v550_v53  ;;  %v557_v61 = vmul.f32 %v555_v59, %v551_v57 }
 0x258   : > { %v560_v62 = vadd.f32 %v558_v60, %v550_v53  ;;  %v559_v63 = vmul.f32 %v557_v61, %v551_v57 }
 0x25a   : > { %v562_v0 = vmul.f32 0.7978846, %v560_v62  ;;  %v561_v1 = vadd.f32 %v559_v63, %v551_v57 }
 0x25c   : > { %863 = vtanh.f32 %v562_v0  ;;  %v563_v2 = vmul.f32 0.7978846, %v561_v1 }
 0x25e   : > { %865 = vtanh.f32 %v563_v2 }
 0x266   : > { %v864_v3 = vpop.eup %863 }
 0x267   : > { %v566_v4 = vadd.f32 1.0, %v864_v3 }
 0x268   : > { %v866_v5 = vpop.eup %865 }
 0x269   : > { %v567_v8 = vadd.f32 1.0, %v866_v5  ;;  %v568_v9 = vmul.f32 %v566_v4, %v552_v6  ;;  %586 = sbr.rel (!%p974_p6) target bundleno = 632 (0x278), region = 97 }
 0x26b   : > { %v569_v10 = vmul.f32 %v567_v8, %v553_v7 }
 0x26d   : > { %v794_v11 = vpack.c.bf16 %v569_v10, %v568_v9 }
 0x26f   : > { %795 = vst [vmem:[%s1000_s25] sm:$0xff] %v794_v11  }
 0x276   : > { %v607_v12 = vld [vmem:[%s1000_s25] sm:$0xf]  ;;  %v609_v13 = vld [vmem:[%s1000_s25 + $0x4] sm:$0xf] }
 0x277   : > { %608 = vst [vmem:[%s591_s13] sm:$0xf] %v607_v12  ;;  %610 = vst [vmem:[%s591_s13 + $0x8] sm:$0xf] %v609_v13 }
 0x278 PF: > { %s15_s22 = sadd.s32 1, %s905_s22   ;;  %s1057_s18 = smov %s893_s19 }
 0x279   : > { %p12_p13 = scmp.ge.s32.totalorder %s15_s22, 4   ;;  %s1058_s19 = smov %s979_s28 }
 0x27a   : > { %s1059_s20 = smov %s901_s21  ;;  %s1060_s21 = smov %s1062_s23 }
 0x27b   :  { %14 = sbr.rel (!%p12_p13) target bundleno = 3 (0x3), region = 181 }

// kernel: _lambda_.30
= control target key start
LH: loop header
LB: loop body
LE: loop exit
PB: predicated region body
PF: predicated region fallthrough
CT: control target
= control target key end

     0   :  { %vm22_vm0 = vcmask 523264   ;;  %v317_v18 = vmov 0.0   ;;  %vm241_vm1 = vcmask 519168   ;;  %s413_s1 = inlined_call_operand.vmem [shape: bf16[256,64], index: 1, kind: input, shape index: {}]   ;;  %s414_s0 = inlined_call_operand.vmem [shape: bf16[16,256], index: 0, kind: input, shape index: {}]   ;;  %s415_s3 = inlined_call_operand.vmem [shape: bf16[16,64], index: 3, kind: input, shape index: {}]   ;;  %s416_s2 = inlined_call_operand.vmem [shape: f32[1,64], index: 2, kind: input, shape index: {}]   ;;  %s417_s4 = inlined_call_operand.vmem [shape: bf16[16,64], index: 4, kind: output, shape index: {}]  }
   0x1   :  { %v298_v0 = vld [vmem:[%s413_s1 + $0x40] sm:$0xff]   ;;  %v300_v2 = vld [vmem:[%s413_s1 + $0x48] sm:$0xff]   ;;  %v302_v4 = vld [vmem:[%s413_s1 + $0x50] sm:$0xff]   ;;  %23 = vst.msk [vmem:[#allocation2] sm:$0xff] %vm22_vm0, %v317_v18 }
   0x2   :  { %v299_v1 = vld [vmem:[%s413_s1] sm:$0xff]   ;;  %275 = vmatprep.subr.bf16.mxu0 %v298_v0  ;;  %v301_v3 = vld [vmem:[%s413_s1 + $0x8] sm:$0xff]   ;;  %v303_v5 = vld [vmem:[%s413_s1 + $0x10] sm:$0xff]   ;;  %24 = vst.msk [vmem:[#allocation2 + $0x8] sm:$0xff] %vm22_vm0, %v317_v18 }
   0x3   :  { %276 = vmatpush3.bf16.msra.mxu0 %v299_v1  ;;  %v304_v6 = vld [vmem:[%s413_s1 + $0x58] sm:$0xff]   ;;  %v306_v8 = vld [vmem:[%s413_s1 + $0x60] sm:$0xff]   ;;  %v308_v10 = vld [vmem:[%s413_s1 + $0x68] sm:$0xff]  }
   0x4   :  { %277 = vmatprep.subr.bf16.mxu0 %v300_v2  ;;  %v305_v7 = vld [vmem:[%s413_s1 + $0x18] sm:$0xff]   ;;  %v307_v9 = vld [vmem:[%s413_s1 + $0x20] sm:$0xff]   ;;  %v309_v12 = vld [vmem:[%s413_s1 + $0x28] sm:$0xff]  }
   0x5   :  { %v316_v11 = vld [vmem:[%s414_s0 + $0x4] ss:$8 sps:$4 sm:$0xff]   ;;  %v310_v13 = vld [vmem:[%s413_s1 + $0x70] sm:$0xff]   ;;  %v312_v15 = vld [vmem:[%s413_s1 + $0x78] sm:$0xff]  }
   0x6   :  { %199 = vmatprep.mubr.bf16.mxu0 %v316_v11  ;;  %v311_v14 = vld [vmem:[%s413_s1 + $0x30] sm:$0xff]   ;;  %v313_v16 = vld [vmem:[%s413_s1 + $0x38] sm:$0xff]   ;;  %v314_v17 = vld [vmem:[%s414_s0] ss:$8 sps:$4 sm:$0xff]  }
   0x7   :  { %278 = vmatpush3.bf16.msra.mxu0 %v301_v3  ;;  %v272_v29 = vld [vmem:[%s415_s3] sm:$0xff]  }
   0x8   :  { %279 = vmatprep.subr.bf16.mxu0 %v302_v4  ;;  %v27_v20 = vld [vmem:[#allocation2] sm:$0xff]  ;;  %v273_v31 = vunpack.c.l.bf16 %v272_v29  ;;  %v274_v34 = vunpack.c.h.bf16 %v272_v29 }
   0x9   :  { %v28_v24 = vld [vmem:[#allocation2 + $0x8] sm:$0xff]  ;;  %v266_v30 = vld [vmem:[%s416_s2] ss:$0 sm:$0xff] }
   0xb   :  { %280 = vmatpush3.bf16.msra.mxu0 %v303_v5 }
   0xc   :  { %281 = vmatprep.subr.bf16.mxu0 %v304_v6 }
   0xf   :  { %282 = vmatpush3.bf16.msra.mxu0 %v305_v7 }
  0x10   :  { %283 = vmatprep.subr.bf16.mxu0 %v306_v8 }
  0x13   :  { %284 = vmatpush3.bf16.msra.mxu0 %v307_v9 }
  0x14   :  { %285 = vmatprep.subr.bf16.mxu0 %v308_v10 }
  0x17   :  { %286 = vmatpush3.bf16.msra.mxu0 %v309_v12 }
  0x18   :  { %287 = vmatprep.subr.bf16.mxu0 %v310_v13 }
  0x1b   :  { %288 = vmatpush3.bf16.msra.mxu0 %v311_v14 }
  0x1c   :  { %289 = vmatprep.subr.bf16.mxu0 %v312_v15 }
  0x1f   :  { %290 = vmatpush3.bf16.msra.mxu0 %v313_v16 }
  0x22   :  { %200 = vmatmul.mubr.bf16.vlgmr.msra.gmra.mrb[0].mxu0 %v314_v17 }
  0xf5   :  { %v291_v19 = vpop.f32.mrb[0].mxu0 }
  0xf6   :  { %v292_v21 = vpop.f32.mrb[1].mxu0 }
  0xf7   :  { %v293_v22 = vadd.f32 %v292_v21, %v291_v19  ;;  %v294_v23 = vpop.f32.mrb[2].mxu0 }
  0xf8   :  { %v295_v25 = vpop.f32.mrb[3].mxu0 }
  0xf9   :  { %v208_v26 = vadd.f32 %v293_v22, %v27_v20  ;;  %v296_v27 = vadd.f32 %v295_v25, %v294_v23 }
  0xfb   :  { %211 = vst.msk [vmem:[#allocation2] sm:$0xff] %vm22_vm0, %v208_v26  ;;  %v209_v28 = vadd.f32 %v296_v27, %v28_v24 }
  0xfd   :  { %212 = vst.msk [vmem:[#allocation2 + $0x8] sm:$0xff] %vm22_vm0, %v209_v28 }
 0x102   :  { %v216_v32 = vld [vmem:[#allocation2] sm:$0xff] }
 0x103   :  { %v225_v33 = vadd.f32 %v266_v30, %v216_v32 }
 0x104   :  { %v217_v35 = vld [vmem:[#allocation2 + $0x8] sm:$0xff] }
 0x105   :  { %v231_v36 = vadd.f32 %v273_v31, %v225_v33  ;;  %v226_v37 = vadd.f32 %v266_v30, %v217_v35 }
 0x107   :  { %v269_v38 = vpack.c.bf16 %v231_v36, %v231_v36  ;;  %v232_v39 = vadd.f32 %v274_v34, %v226_v37 }
 0x109   :  { %242 = vst.msk [vmem:[%s417_s4] sm:$0xf] %vm241_vm1, %v269_v38  ;;  %v270_v40 = vpack.c.bf16 %v232_v39, %v232_v39 }
 0x10b   :  { %243 = vst.msk [vmem:[%s417_s4 + $0x4] sm:$0xf] %vm241_vm1, %v270_v40 }

// kernel: _lambda_.36
= control target key start
LH: loop header
LB: loop body
LE: loop exit
PB: predicated region body
PF: predicated region fallthrough
CT: control target
= control target key end

     0   :  { %10 = vsyncpa [#allocation6], 0  ;;  %s1229_s0 = inlined_call_operand.vmem [shape: bf16[16,64], index: 0, kind: input, shape index: {}]   ;;  %s1230_s1 = inlined_call_operand.vmem [shape: bf16[64,256], index: 1, kind: input, shape index: {}]   ;;  %s1231_s2 = inlined_call_operand.vmem [shape: f32[1,256], index: 2, kind: input, shape index: {}]   ;;  %s1232_s3 = inlined_call_operand.hbm [shape: f32[1,64], index: 3, kind: input, shape index: {}]   ;;  %s1233_s4 = inlined_call_operand.hbm [shape: f32[1,64], index: 4, kind: input, shape index: {}]   ;;  %s1234_s5 = inlined_call_operand.vmem [shape: bf16[16,256], index: 5, kind: output, shape index: {}]  }
   0x1   :  { %11 = vsyncpa [#allocation8], 0  ;;  %s1042_s18 = smov 0   ;;  %s1044_s19 = smov 0  }
   0x2   :  { %s1046_s20 = smov 0   ;;  %s1048_s21 = smov 0  }
   0x3   :  { %s1050_s22 = smov 0  }
   0x4 LB: > { %s772_s23 = sadd.s32 4294967295, %s1006_s22   ;;  %s32_s24 = sadd.s32 1, %s1002_s21  ;;  %s1006_s22 = sphi %s1050_s22, %s17_s22   ;;  %s1002_s21 = sphi %s1048_s21, %s1250_s21   ;;  %s998_s20 = sphi %s1046_s20, %s1249_s20   ;;  %s994_s19 = sphi %s1044_s19, %s1248_s19   ;;  %s990_s18 = sphi %s1042_s18, %s1247_s18  }
   0x5   : > { %p34_p0 = scmp.ge.s32.totalorder %s32_s24, 2  ;;  %s73_s25 = sadd.s32 1, %s994_s19 }
   0x6   : > { %p80_p1 = scmp.ne.s32.totalorder %s994_s19, %s990_s18  ;;  %p81_p2 = scmp.eq.s32.totalorder %s1006_s22, 0 }
   0x7   : > { %s1252_s24 = smov (%p34_p0, %s32_s24), 0  ;;  %p190_p4 = scmp.eq.s32.totalorder %s772_s23, 1 }
   0x8   : > { %p1075_p3 = por %p81_p2, %p80_p1  ;;  %s69_s27 = ssub.s32 %s1002_s21, %s1252_s24 }
   0x9   : > { %p774_p5 = scmp.ge.s32.totalorder %s1006_s22, 1  ;;  %p71_p6 = scmp.eq.s32.totalorder %s69_s27, 0 }
   0xa   : > { %s1238_s26 = scalar_select %p1075_p3, 1, 0 }
   0xb   : > { %p1082_p7 = por %p190_p4, %p80_p1  ;;  %p203_p8 = scmp.lt.s32.totalorder %s1006_s22, 3 }
   0xc   : > { %s1088_s29 = scalar_select %p71_p6, %s994_s19, %s73_s25  }
   0xd   : > { %s1239_s28 = scalar_select %p1082_p7, 1, 0 }
   0xe   : > { %p1090_p9 = pnand %p774_p5, %p203_p8  ;;  %p1094_p10 = scmp.eq.s32.totalorder %s772_s23, 0 }
   0xf   : > { %s1008_s7 = smov [#allocation5]   ;;  %s1009_s9 = smov [#allocation7]  }
  0x10   : > { %s1240_s30 = scalar_select %p1090_p9, 1, 0 }
  0x11   : > { %s1241_s6 = scalar_select %p1094_p10, 1, 0 }
  0x12   : > { %p837_p11 = pneg %p1090_p9  ;;  %s230_s8 = sshll.u32 %s1008_s7, 4  ;;  %s231_s8 = int_to_ptr.vmem [resolvable:$true] %s230_s8 }
  0x13   : > { %s243_s10 = sshll.u32 %s1009_s9, 4  ;;  %s904_s14 = scalar_lea.hbm %s1232_s3, 16  ;;  %s1106_s10 = int_to_ptr.vmem [resolvable:$true] %s243_s10 }
  0x14   : > { %p1102_p12 = pnand %p1094_p10, %p837_p11  ;;  %p905_p13 = scmp.ne.s32.totalorder %s1232_s3, %s904_s14 }
  0x15   : > { %p911_p4 = scmp.lt.u32.totalorder %s904_s14, %s1232_s3 }
  0x16   : > { %p906_p0 = pneg %p1102_p12 }
  0x18   : > { %p907_p1 = pnand %p906_p0, %p905_p13 }
  0x1a   : > { %p908_p2 = pneg %p907_p1 }
  0x1c   : > { %p913_p5 = pnand %p911_p4, %p908_p2 }
  0x1e   : > { %916 = shalt.err (!%p913_p5)
}
  0x1f   : > { %s917_s25 = scalar_lea.vmem %s231_s8, 16  ;;  %s924_s27 = scalar_lea.vmem %s231_s8, 32 }
  0x20   : > { %p918_p6 = scmp.ne.s32.totalorder %s231_s8, %s917_s25  ;;  %p925_p7 = scmp.lt.s32.totalorder %s231_s8, %s231_s8 }
  0x21   : > { %p926_p10 = scmp.lt.s32.totalorder %s924_s27, %s917_s25 }
  0x22   : > { %p920_p8 = pnand %p918_p6, %p906_p0 }
  0x23   : > { %p927_p9 = por %p926_p10, %p925_p7 }
  0x24   : > { %p921_p11 = pneg %p920_p8 }
  0x26   : > { %p928_p3 = pnand %p927_p9, %p921_p11 }
  0x28   : > { %931 = shalt.err (!%p928_p3)
}
  0x29   : > { %840 = dma.hbm_to_vmem [thread:$0]  (!%p1102_p12), %s1232_s3, 16, %s231_s8, [#allocation6]  }
  0x2a   : > { %s932_s14 = scalar_lea.hbm %s1233_s4, 16 }
  0x2b   : > { %p933_p13 = scmp.ne.s32.totalorder %s1233_s4, %s932_s14  ;;  %p939_p3 = scmp.lt.u32.totalorder %s932_s14, %s1233_s4 }
  0x2d   : > { %p935_p7 = pnand %p933_p13, %p906_p0 }
  0x2f   : > { %p936_p9 = pneg %p935_p7 }
  0x31   : > { %p941_p10 = pnand %p939_p3, %p936_p9 }
  0x33   : > { %944 = shalt.err (!%p941_p10)
}
  0x34   : > { %s945_s8 = scalar_lea.vmem %s1106_s10, 16  ;;  %s952_s25 = scalar_lea.vmem %s1106_s10, 32 }
  0x35   : > { %p946_p1 = scmp.ne.s32.totalorder %s1106_s10, %s945_s8  ;;  %p953_p5 = scmp.lt.s32.totalorder %s1106_s10, %s1106_s10 }
  0x36   : > { %p954_p6 = scmp.lt.s32.totalorder %s952_s25, %s945_s8 }
  0x37   : > { %p948_p2 = pnand %p946_p1, %p906_p0 }
  0x38   : > { %p955_p8 = por %p954_p6, %p953_p5 }
  0x39   : > { %p949_p4 = pneg %p948_p2 }
  0x3b   : > { %p956_p11 = pnand %p955_p8, %p949_p4 }
  0x3d   : > { %959 = shalt.err (!%p956_p11)
}
  0x3e   : > { %843 = dma.hbm_to_vmem [thread:$0]  (!%p1102_p12), %s1233_s4, 16, %s1106_s10, [#allocation8]  }
  0x3f   : > { %p778_p13 = scmp.ge.s32.totalorder %s1006_s22, 2 }
  0x40   : > { %p1243_p0 = scmp.ne.s32.totalorder (!%p778_p13), %s1238_s26, 0 }
  0x41   : > { %250 = sbr.rel (%p778_p13) target bundleno = 81 (0x51), region = 28 }
  0x48   : > { %253 = sbr.rel (!%p1243_p0) target bundleno = 81 (0x51), region = 32  ;;  %s255_s9 = sand.u32 (%p1243_p0), 1, %s994_s19  }
  0x49   : > { %s780_s12 = sshll.u32 (%p1243_p0), %s1002_s21, 2  ;;  %s779_s13 = sshll.u32 (%p1243_p0), %s255_s9, 5 }
  0x4a   : > { %s262_s11 = scalar_lea.vmem (%p1243_p0), %s1230_s1, %s780_s12  ;;  %s257_s16 = scalar_lea.vmem (%p1243_p0), [#allocation4], %s779_s13 }
  0x4b   : > { %v278_v0 = vld [vmem:[%s262_s11] sm:$0xf] (%p1243_p0)  ;;  %v280_v1 = vld [vmem:[%s262_s11 + $0x8] sm:$0xf] (%p1243_p0)  ;;  %v282_v2 = vld [vmem:[%s262_s11 + $0x10] sm:$0xf] (%p1243_p0) }
  0x4c   : > { %279 = vst [vmem:[%s257_s16] sm:$0xf] (%p1243_p0), %v278_v0  ;;  %281 = vst [vmem:[%s257_s16 + $0x4] sm:$0xf] (%p1243_p0), %v280_v1  ;;  %v284_v3 = vld [vmem:[%s262_s11 + $0x18] sm:$0xf] (%p1243_p0) }
  0x4d   : > { %v286_v4 = vld [vmem:[%s262_s11 + $0x20] sm:$0xf] (%p1243_p0)  ;;  %283 = vst [vmem:[%s257_s16 + $0x8] sm:$0xf] (%p1243_p0), %v282_v2  ;;  %285 = vst [vmem:[%s257_s16 + $0xc] sm:$0xf] (%p1243_p0), %v284_v3 }
  0x4e   : > { %287 = vst [vmem:[%s257_s16 + $0x10] sm:$0xf] (%p1243_p0), %v286_v4  ;;  %v288_v5 = vld [vmem:[%s262_s11 + $0x28] sm:$0xf] (%p1243_p0)  ;;  %v290_v6 = vld [vmem:[%s262_s11 + $0x30] sm:$0xf] (%p1243_p0) }
  0x4f   : > { %v292_v7 = vld [vmem:[%s262_s11 + $0x38] sm:$0xf]  ;;  %289 = vst [vmem:[%s257_s16 + $0x14] sm:$0xf] %v288_v5  ;;  %291 = vst [vmem:[%s257_s16 + $0x18] sm:$0xf] %v290_v6 }
  0x50   : > { %293 = vst [vmem:[%s257_s16 + $0x1c] sm:$0xf] %v292_v7 }
  0x51 PF: > { %p1244_p12 = scmp.ne.s32.totalorder %s1240_s30, 0 }
  0x52   : > { %s344_s26 = sand.u32 (!%p1244_p12), 1, %s990_s18   ;;  %p1245_p7 = scmp.ne.s32.totalorder (!%p1244_p12), %s1241_s6, 0 }
  0x53   : > { %341 = sbr.rel (%p1244_p12) target bundleno = 689 (0x2b1), region = 77  ;;  %s782_s10 = sshll.u32 (!%p1244_p12), %s344_s26, 5 }
  0x54   : > { %s1167_s17 = scalar_lea.vmem (!%p1244_p12), [#allocation4], %s782_s10 }
  0x5a   : > { %981 = dma.done.wait (%p1245_p7), [#allocation6], 16  }
  0x5b   : > { %983 = vsyncadd (%p1245_p7), [#allocation6], 4294967280 }
  0x5c   : > { %985 = dma.done.wait (%p1245_p7), [#allocation8], 16  }
  0x5d   : > { %987 = vsyncadd (%p1245_p7), [#allocation8], 4294967280  ;;  %s785_s30 = sshll.u32 %s344_s26, 3  ;;  %p399_p9 = scmp.lt.s32.totalorder %s998_s20, 1  ;;  %v1010_v8 = vmov 0.0  }
  0x5e   : > { %408 = vst [vmem:[#allocation2] sm:$0xff] %v1010_v8  ;;  %409 = vst [vmem:[#allocation2 + $0x8] sm:$0xff] %v1010_v8  ;;  %s1185_s27 = scalar_lea.vmem [#allocation9], %s785_s30  ;;  %p786_p3 = scmp.ne.s32.totalorder %s998_s20, 0 }
  0x5f   : > { %s1179_s18 = scalar_select %p399_p9, %s998_s20, 1 }
  0x60   : > { %413 = sbr.rel (%p786_p3) target bundleno = 419 (0x1a3), region = 97  ;;  %v804_v9 = vld [vmem:[%s1229_s0] sm:$0xff] (!%p786_p3)   ;;  %vm420_vm0 = vcmask (!%p786_p3), 523264   ;;  %v787_v32 = vld [vmem:[#allocation5] ss:$0 sm:$0xff] (!%p786_p3) }
  0x61   : > { %s401_s25 = scalar_lea.vmem %s1231_s2, %s1179_s18  ;;  %v805_v10 = vunpack.c.l.bf16 (!%p786_p3), %v804_v9  ;;  %v806_v11 = vunpack.c.h.bf16 (!%p786_p3), %v804_v9  ;;  %v788_v36 = vld [vmem:[#allocation7] ss:$0 sm:$0xff] (!%p786_p3) }
  0x63   : > { %v421_v12 = vsel (!%p786_p3), %vm420_vm0, %v805_v10, 0.0  ;;  %v424_v13 = vsel (!%p786_p3), %vm420_vm0, %v806_v11, 0.0 }
  0x64   : > { %422 = vadd.xlane.f32.xlu0 (!%p786_p3), %v421_v12 }
  0x68   : > { %425 = vadd.xlane.f32.xlu0 %v424_v13 }
  0xf1   : > { %v423_v14 = vpop.xlane.xlu0 %422 }
  0xf2   : > { %v428_v15 = vmul.f32 0.015625, %v423_v14 }
  0xf4   : > { %v430_v16 = vsub.f32 %v805_v10, %v428_v15 }
  0xf5   : > { %v426_v17 = vpop.xlane.xlu0 %425 }
  0xf6   : > { %v429_v18 = vmul.f32 0.015625, %v426_v17  ;;  %v432_v19 = vmul.f32 %v430_v16, %v430_v16 }
  0xf8   : > { %v431_v20 = vsub.f32 %v806_v11, %v429_v18  ;;  %v434_v21 = vsel %vm420_vm0, %v432_v19, 0.0 }
  0xf9   : > { %435 = vadd.xlane.f32.xlu1 %v434_v21 }
  0xfa   : > { %v433_v22 = vmul.f32 %v431_v20, %v431_v20 }
  0xfc   : > { %v437_v23 = vsel %vm420_vm0, %v433_v22, 0.0 }
  0xfd   : > { %438 = vadd.xlane.f32.xlu1 %v437_v23 }
 0x186   : > { %v436_v24 = vpop.xlane.xlu1 %435 }
 0x187   : > { %v440_v25 = vmul.f32 0.015625, %v436_v24 }
 0x189   : > { %v442_v26 = vadd.f32 1e-06, %v440_v25 }
 0x18a   : > { %v439_v27 = vpop.xlane.xlu1 %438 }
 0x18b   : > { %892 = vrsqrt.f32 %v442_v26  ;;  %v441_v28 = vmul.f32 0.015625, %v439_v27 }
 0x18d   : > { %v443_v29 = vadd.f32 1e-06, %v441_v28 }
 0x18f   : > { %894 = vrsqrt.f32 %v443_v29 }
 0x195   : > { %v893_v30 = vpop.eup %892 }
 0x196   : > { %v446_v31 = vmul.f32 %v893_v30, %v430_v16 }
 0x198   : > { %v454_v34 = vmul.f32 %v787_v32, %v446_v31 }
 0x199   : > { %v895_v33 = vpop.eup %894 }
 0x19a   : > { %v447_v35 = vmul.f32 %v895_v33, %v431_v20  ;;  %v462_v38 = vadd.f32 %v788_v36, %v454_v34 }
 0x19c   : > { %v455_v37 = vmul.f32 %v787_v32, %v447_v35 }
 0x19e   : > { %v463_v39 = vadd.f32 %v788_v36, %v455_v37 }
 0x1a0   : > { %v464_v40 = vpack.c.bf16 %v463_v39, %v462_v38 }
 0x1a2   : > { %465 = vst.msk [vmem:[#allocation3] sm:$0xff] %vm420_vm0, %v464_v40 }
 0x1a3 PF: > { %817 = vmatprep.subr.bf16.mxu0 %v1010_v8  ;;  %v896_v41 = vld [vmem:[%s1167_s17] sm:$0xff]   ;;  %vm1011_vm1 = vmmov 0   ;;  %v897_v42 = vld [vmem:[%s1167_s17 + $0x8] sm:$0xff]   ;;  %v898_v43 = vld [vmem:[%s1167_s17 + $0x10] sm:$0xff]   ;;  %vm501_vm2 = vcmask 523264   ;;  %p1246_p10 = scmp.ne.s32.totalorder %s1239_s28, 0 }
 0x1a4   : > { %825 = vmatprep.mubr.msk.bf16.mxu0 %vm1011_vm1, %v1010_v8  ;;  %818 = vmatpush3.bf16.msra.mxu0 %v896_v41  ;;  %v899_v44 = vld [vmem:[%s1167_s17 + $0x18] sm:$0xff]   ;;  %v467_v46 = vld [vmem:[#allocation2] sm:$0xff]  ;;  %v468_v49 = vld [vmem:[#allocation2 + $0x8] sm:$0xff]  ;;  %s798_s13 = sshll.u32 (%p1246_p10), %s998_s20, 2 }
 0x1a5   : > { %819 = vmatprep.subr.bf16.mxu0 %v1010_v8  ;;  %v794_v48 = vld [vmem:[%s401_s25] ss:$0 sm:$0xff]  ;;  %s603_s11 = scalar_lea.vmem (%p1246_p10), %s1234_s5, %s798_s13 }
 0x1a8   : > { %820 = vmatpush3.bf16.msra.mxu0 %v897_v42 }
 0x1a9   : > { %821 = vmatprep.subr.bf16.mxu0 %v1010_v8  ;;  %v466_v45 = vld [vmem:[#allocation3] sm:$0xff] }
 0x1ac   : > { %822 = vmatpush3.bf16.msra.mxu0 %v898_v43 }
 0x1ad   : > { %823 = vmatprep.subr.bf16.mxu0 %v1010_v8 }
 0x1b0   : > { %824 = vmatpush3.bf16.msra.mxu0 %v899_v44 }
 0x1b3   : > { %826 = vmatmul.mubr.msk.bf16.vlgmr.msra.gmra.mrb[0].mxu0 %vm501_vm2, %v466_v45 }
 0x286   : > { %v539_v47 = vpop.f32.mrb[0].mxu0 }
 0x287   : > { %v546_v50 = vadd.f32 %v539_v47, %v467_v46  ;;  %v827_v51 = vpop.f32.mrb[1].mxu0 }
 0x288   : > { %v542_v52 = vpop.f32.mrb[2].mxu0 }
 0x289   : > { %548 = vst [vmem:[#allocation2] sm:$0xff] %v546_v50  ;;  %v562_v53 = vadd.f32 %v794_v48, %v546_v50  ;;  %v547_v54 = vadd.f32 %v542_v52, %v468_v49  ;;  %v828_v55 = vpop.f32.mrb[3].mxu0 }
 0x28b   : > { %v566_v56 = vmul.f32 0.044715, %v562_v53  ;;  %549 = vst [vmem:[#allocation2 + $0x8] sm:$0xff] %v547_v54  ;;  %v563_v57 = vadd.f32 %v794_v48, %v547_v54  ;;  %v564_v6 = vmul.f32 0.5, %v562_v53 }
 0x28d   : > { %v568_v58 = vmul.f32 %v566_v56, %v562_v53  ;;  %v567_v59 = vmul.f32 0.044715, %v563_v57  ;;  %v565_v7 = vmul.f32 0.5, %v563_v57 }
 0x28f   : > { %v570_v60 = vmul.f32 %v568_v58, %v562_v53  ;;  %v569_v61 = vmul.f32 %v567_v59, %v563_v57 }
 0x291   : > { %v572_v62 = vadd.f32 %v570_v60, %v562_v53  ;;  %v571_v63 = vmul.f32 %v569_v61, %v563_v57 }
 0x293   : > { %v574_v0 = vmul.f32 0.7978846, %v572_v62  ;;  %v573_v1 = vadd.f32 %v571_v63, %v563_v57 }
 0x295   : > { %900 = vtanh.f32 %v574_v0  ;;  %v575_v2 = vmul.f32 0.7978846, %v573_v1 }
 0x297   : > { %902 = vtanh.f32 %v575_v2 }
 0x29f   : > { %v901_v3 = vpop.eup %900 }
 0x2a0   : > { %v578_v4 = vadd.f32 1.0, %v901_v3 }
 0x2a1   : > { %v903_v5 = vpop.eup %902 }
 0x2a2   : > { %v579_v8 = vadd.f32 1.0, %v903_v5  ;;  %v580_v9 = vmul.f32 %v578_v4, %v564_v6  ;;  %598 = sbr.rel (!%p1246_p10) target bundleno = 689 (0x2b1), region = 105 }
 0x2a4   : > { %v581_v10 = vmul.f32 %v579_v8, %v565_v7 }
 0x2a6   : > { %v810_v11 = vpack.c.bf16 %v581_v10, %v580_v9 }
 0x2a8   : > { %811 = vst [vmem:[%s1185_s27] sm:$0xff] %v810_v11  }
 0x2af   : > { %v619_v12 = vld [vmem:[%s1185_s27] sm:$0xf]  ;;  %v621_v13 = vld [vmem:[%s1185_s27 + $0x4] sm:$0xf] }
 0x2b0   : > { %620 = vst [vmem:[%s603_s11] sm:$0xf] %v619_v12  ;;  %622 = vst [vmem:[%s603_s11 + $0x8] sm:$0xf] %v621_v13 }
 0x2b1 PF: > { %s17_s22 = sadd.s32 1, %s1006_s22   ;;  %s1247_s18 = smov %s994_s19 }
 0x2b2   : > { %p14_p1 = scmp.ge.s32.totalorder %s17_s22, 4   ;;  %s1248_s19 = smov %s1088_s29 }
 0x2b3   : > { %s1249_s20 = smov %s1002_s21  ;;  %s1250_s21 = smov %s1252_s24 }
 0x2b4   :  { %16 = sbr.rel (!%p14_p1) target bundleno = 4 (0x4), region = 186 }
 0x2bb   :  { %659 = vsyncpa [#allocation6], 1 }
 0x2bc   :  { %661 = vsyncpa [#allocation6 + $0x1], 1 }
 0x2bd   :  { %662 = vsyncpa [#allocation8], 1 }

// kernel: _lambda_.38
= control target key start
LH: loop header
LB: loop body
LE: loop exit
PB: predicated region body
PF: predicated region fallthrough
CT: control target
= control target key end

     0   :  { %8 = vsyncpa [#allocation5], 0  ;;  %s248_s12 = smov [#allocation4]   ;;  %s301_s0 = inlined_call_operand.vmem [shape: bf16[16,64], index: 0, kind: input, shape index: {}]   ;;  %s302_s1 = inlined_call_operand.vmem [shape: bf16[64,128], index: 1, kind: input, shape index: {}]   ;;  %s303_s2 = inlined_call_operand.hbm [shape: f32[1,128], index: 2, kind: input, shape index: {}]   ;;  %s304_s3 = inlined_call_operand.vmem [shape: bf16[16,128], index: 3, kind: output, shape index: {}]  }
   0x1   :  { %s19_s13 = sshll.u32 %s248_s12, 4  ;;  %s224_s16 = scalar_lea.hbm %s303_s2, 16  ;;  %s20_s13 = int_to_ptr.vmem [resolvable:$true] %s19_s13 }
   0x2   :  { %p225_p0 = scmp.ne.s32.totalorder %s303_s2, %s224_s16  ;;  %p228_p1 = scmp.lt.u32.totalorder %s224_s16, %s303_s2 }
   0x4   :  { %p230_p2 = pnand %p228_p1, %p225_p0 }
   0x6   :  { %233 = shalt.err (!%p230_p2)
}
   0x7   :  { %s234_s21 = scalar_lea.vmem %s20_s13, 16  ;;  %s238_s22 = scalar_lea.vmem %s20_s13, 32 }
   0x8   :  { %p235_p3 = scmp.ne.s32.totalorder %s20_s13, %s234_s21  ;;  %p239_p4 = scmp.lt.s32.totalorder %s20_s13, %s20_s13 }
   0x9   :  { %p240_p5 = scmp.lt.s32.totalorder %s238_s22, %s234_s21 }
   0xb   :  { %p241_p6 = por %p240_p5, %p239_p4 }
   0xd   :  { %p242_p7 = pnand %p241_p6, %p235_p3 }
   0xf   :  { %245 = shalt.err (!%p242_p7)
}
  0x10   :  { %22 = dma.hbm_to_vmem [thread:$0]  %s303_s2, 16, %s20_s13, [#allocation5]  }
  0x11   :  { %246 = dma.done.wait [#allocation5], 16  }
  0x12   :  { %247 = vsyncadd [#allocation5], 4294967280  ;;  %v249_v0 = vmov 0.0   ;;  %vm250_vm0 = vmmov 0   ;;  %v212_v1 = vld [vmem:[%s302_s1] sm:$0xff]   ;;  %v213_v2 = vld [vmem:[%s302_s1 + $0x8] sm:$0xff]  }
  0x13   :  { %197 = vmatprep.subr.bf16.mxu0 %v249_v0  ;;  %205 = vmatprep.mubr.msk.bf16.mxu0 %vm250_vm0, %v249_v0  ;;  %v184_v3 = vld [vmem:[%s301_s0] sm:$0xff]   ;;  %v214_v6 = vld [vmem:[%s302_s1 + $0x10] sm:$0xff]   ;;  %v215_v9 = vld [vmem:[%s302_s1 + $0x18] sm:$0xff]   ;;  %vm56_vm1 = vcmask 523264  }
  0x14   :  { %198 = vmatpush3.bf16.msra.mxu0 %v212_v1  ;;  %v185_v4 = vunpack.c.l.bf16 %v184_v3  ;;  %v186_v5 = vunpack.c.h.bf16 %v184_v3  ;;  %v178_v21 = vld [vmem:[#allocation4] ss:$0 sm:$0xff] }
  0x15   :  { %199 = vmatprep.subr.bf16.mxu0 %v249_v0 }
  0x16   :  { %v171_v7 = vmul.f32 -1.442695, %v185_v4  ;;  %v172_v8 = vmul.f32 -1.442695, %v186_v5 }
  0x18   :  { %200 = vmatpush3.bf16.msra.mxu0 %v213_v2  ;;  %216 = vpow2.f32 %v171_v7 }
  0x19   :  { %201 = vmatprep.subr.bf16.mxu0 %v249_v0  ;;  %218 = vpow2.f32 %v172_v8 }
  0x1c   :  { %202 = vmatpush3.bf16.msra.mxu0 %v214_v6 }
  0x1d   :  { %203 = vmatprep.subr.bf16.mxu0 %v249_v0 }
  0x20   :  { %204 = vmatpush3.bf16.msra.mxu0 %v215_v9 }
  0x22   :  { %v217_v10 = vpop.eup %216 }
  0x23   :  { %v219_v11 = vpop.eup %218  ;;  %v47_v12 = vadd.f32 1.0, %v217_v10 }
  0x24   :  { %v48_v13 = vadd.f32 1.0, %v219_v11 }
  0x25   :  { %220 = vrcp.f32 %v47_v12 }
  0x26   :  { %222 = vrcp.f32 %v48_v13 }
  0x2f   :  { %v221_v14 = vpop.eup %220 }
  0x30   :  { %v223_v15 = vpop.eup %222  ;;  %v53_v16 = vmul.f32 %v221_v14, %v185_v4 }
  0x31   :  { %v54_v17 = vmul.f32 %v223_v15, %v186_v5 }
  0x33   :  { %v55_v18 = vpack.c.bf16 %v54_v17, %v53_v16 }
  0x35   :  { %57 = vst.msk [vmem:[#allocation3] sm:$0xff] %vm56_vm1, %v55_v18 }
  0x3c   :  { %v58_v19 = vld [vmem:[#allocation3] sm:$0xff] }
  0x3d   :  { %206 = vmatmul.mubr.msk.bf16.vlgmr.msra.gmra.mrb[0].mxu0 %vm56_vm1, %v58_v19 }
 0x110   :  { %v131_v20 = vpop.f32.mrb[0].mxu0 }
 0x111   :  { %v207_v22 = vpop.f32.mrb[1].mxu0  ;;  %v154_v24 = vadd.f32 %v178_v21, %v131_v20 }
 0x112   :  { %v134_v23 = vpop.f32.mrb[2].mxu0 }
 0x113   :  { %v155_v25 = vadd.f32 %v178_v21, %v134_v23  ;;  %v208_v26 = vpop.f32.mrb[3].mxu0 }
 0x115   :  { %v190_v27 = vpack.c.bf16 %v155_v25, %v154_v24 }
 0x117   :  { %191 = vst [vmem:[%s304_s3] sm:$0xff] %v190_v27  }
 0x118   :  { %170 = vsyncpa [#allocation5], 1 }

// kernel: _lambda_.37
= control target key start
LH: loop header
LB: loop body
LE: loop exit
PB: predicated region body
PF: predicated region fallthrough
CT: control target
= control target key end

     0   :  { %9 = vsyncpa [#allocation4], 0  ;;  %s355_s15 = smov [#allocation3]   ;;  %s457_s0 = inlined_call_operand.vmem [shape: bf16[16,256], index: 0, kind: input, shape index: {}]   ;;  %s458_s1 = inlined_call_operand.vmem [shape: bf16[256,64], index: 1, kind: input, shape index: {}]   ;;  %s459_s2 = inlined_call_operand.hbm [shape: f32[1,64], index: 2, kind: input, shape index: {}]   ;;  %s460_s3 = inlined_call_operand.vmem [shape: bf16[16,64], index: 3, kind: input, shape index: {}]   ;;  %s461_s4 = inlined_call_operand.vmem [shape: bf16[16,64], index: 4, kind: output, shape index: {}]  }
   0x1   :  { %s20_s16 = sshll.u32 %s355_s15, 4  ;;  %s331_s19 = scalar_lea.hbm %s459_s2, 16  ;;  %s21_s16 = int_to_ptr.vmem [resolvable:$true] %s20_s16 }
   0x2   :  { %p332_p0 = scmp.ne.s32.totalorder %s459_s2, %s331_s19  ;;  %p335_p1 = scmp.lt.u32.totalorder %s331_s19, %s459_s2 }
   0x4   :  { %p337_p2 = pnand %p335_p1, %p332_p0 }
   0x6   :  { %340 = shalt.err (!%p337_p2)
}
   0x7   :  { %s341_s24 = scalar_lea.vmem %s21_s16, 16  ;;  %s345_s25 = scalar_lea.vmem %s21_s16, 32 }
   0x8   :  { %p342_p3 = scmp.ne.s32.totalorder %s21_s16, %s341_s24  ;;  %p346_p4 = scmp.lt.s32.totalorder %s21_s16, %s21_s16 }
   0x9   :  { %p347_p5 = scmp.lt.s32.totalorder %s345_s25, %s341_s24 }
   0xb   :  { %p348_p6 = por %p347_p5, %p346_p4 }
   0xd   :  { %p349_p7 = pnand %p348_p6, %p342_p3 }
   0xf   :  { %352 = shalt.err (!%p349_p7)
}
  0x10   :  { %23 = dma.hbm_to_vmem [thread:$0]  %s459_s2, 16, %s21_s16, [#allocation4]  }
  0x11   :  { %353 = dma.done.wait [#allocation4], 16  }
  0x12   :  { %354 = vsyncadd [#allocation4], 4294967280  ;;  %v312_v0 = vld [vmem:[%s458_s1 + $0x40] sm:$0xff]   ;;  %v314_v2 = vld [vmem:[%s458_s1 + $0x48] sm:$0xff]   ;;  %vm34_vm0 = vcmask 523264   ;;  %v356_v18 = vmov 0.0  }
  0x13   :  { %v313_v1 = vld [vmem:[%s458_s1] sm:$0xff]   ;;  %288 = vmatprep.subr.bf16.mxu0 %v312_v0  ;;  %v315_v3 = vld [vmem:[%s458_s1 + $0x8] sm:$0xff]   ;;  %v316_v4 = vld [vmem:[%s458_s1 + $0x50] sm:$0xff]   ;;  %35 = vst.msk [vmem:[#allocation2] sm:$0xff] %vm34_vm0, %v356_v18  ;;  %vm253_vm1 = vcmask 519168  }
  0x14   :  { %289 = vmatpush3.bf16.msra.mxu0 %v313_v1  ;;  %v317_v5 = vld [vmem:[%s458_s1 + $0x10] sm:$0xff]   ;;  %v318_v6 = vld [vmem:[%s458_s1 + $0x58] sm:$0xff]   ;;  %v320_v8 = vld [vmem:[%s458_s1 + $0x60] sm:$0xff]   ;;  %36 = vst.msk [vmem:[#allocation2 + $0x8] sm:$0xff] %vm34_vm0, %v356_v18 }
  0x15   :  { %290 = vmatprep.subr.bf16.mxu0 %v314_v2  ;;  %v319_v7 = vld [vmem:[%s458_s1 + $0x18] sm:$0xff]   ;;  %v321_v9 = vld [vmem:[%s458_s1 + $0x20] sm:$0xff]   ;;  %v322_v10 = vld [vmem:[%s458_s1 + $0x68] sm:$0xff]  }
  0x16   :  { %v330_v11 = vld [vmem:[%s457_s0 + $0x4] ss:$8 sps:$4 sm:$0xff]   ;;  %v324_v13 = vld [vmem:[%s458_s1 + $0x70] sm:$0xff]   ;;  %v326_v15 = vld [vmem:[%s458_s1 + $0x78] sm:$0xff]  }
  0x17   :  { %v323_v12 = vld [vmem:[%s458_s1 + $0x28] sm:$0xff]   ;;  %211 = vmatprep.mubr.bf16.mxu0 %v330_v11  ;;  %v325_v14 = vld [vmem:[%s458_s1 + $0x30] sm:$0xff]   ;;  %v327_v16 = vld [vmem:[%s458_s1 + $0x38] sm:$0xff]  }
  0x18   :  { %291 = vmatpush3.bf16.msra.mxu0 %v315_v3  ;;  %v328_v17 = vld [vmem:[%s457_s0] ss:$8 sps:$4 sm:$0xff]   ;;  %v279_v30 = vld [vmem:[#allocation3] ss:$0 sm:$0xff] }
  0x19   :  { %292 = vmatprep.subr.bf16.mxu0 %v316_v4  ;;  %v285_v29 = vld [vmem:[%s460_s3] sm:$0xff]  }
  0x1a   :  { %v39_v20 = vld [vmem:[#allocation2] sm:$0xff]  ;;  %v286_v31 = vunpack.c.l.bf16 %v285_v29  ;;  %v287_v34 = vunpack.c.h.bf16 %v285_v29 }
  0x1b   :  { %v40_v24 = vld [vmem:[#allocation2 + $0x8] sm:$0xff] }
  0x1c   :  { %293 = vmatpush3.bf16.msra.mxu0 %v317_v5 }
  0x1d   :  { %294 = vmatprep.subr.bf16.mxu0 %v318_v6 }
  0x20   :  { %295 = vmatpush3.bf16.msra.mxu0 %v319_v7 }
  0x21   :  { %296 = vmatprep.subr.bf16.mxu0 %v320_v8 }
  0x24   :  { %297 = vmatpush3.bf16.msra.mxu0 %v321_v9 }
  0x25   :  { %298 = vmatprep.subr.bf16.mxu0 %v322_v10 }
  0x28   :  { %299 = vmatpush3.bf16.msra.mxu0 %v323_v12 }
  0x29   :  { %300 = vmatprep.subr.bf16.mxu0 %v324_v13 }
  0x2c   :  { %301 = vmatpush3.bf16.msra.mxu0 %v325_v14 }
  0x2d   :  { %302 = vmatprep.subr.bf16.mxu0 %v326_v15 }
  0x30   :  { %303 = vmatpush3.bf16.msra.mxu0 %v327_v16 }
  0x33   :  { %212 = vmatmul.mubr.bf16.vlgmr.msra.gmra.mrb[0].mxu0 %v328_v17 }
 0x106   :  { %v304_v19 = vpop.f32.mrb[0].mxu0 }
 0x107   :  { %v305_v21 = vpop.f32.mrb[1].mxu0 }
 0x108   :  { %v306_v22 = vadd.f32 %v305_v21, %v304_v19  ;;  %v307_v23 = vpop.f32.mrb[2].mxu0 }
 0x109   :  { %v308_v25 = vpop.f32.mrb[3].mxu0 }
 0x10a   :  { %v220_v26 = vadd.f32 %v306_v22, %v39_v20  ;;  %v309_v27 = vadd.f32 %v308_v25, %v307_v23 }
 0x10c   :  { %223 = vst.msk [vmem:[#allocation2] sm:$0xff] %vm34_vm0, %v220_v26  ;;  %v221_v28 = vadd.f32 %v309_v27, %v40_v24 }
 0x10e   :  { %224 = vst.msk [vmem:[#allocation2 + $0x8] sm:$0xff] %vm34_vm0, %v221_v28 }
 0x113   :  { %v228_v32 = vld [vmem:[#allocation2] sm:$0xff] }
 0x114   :  { %v237_v33 = vadd.f32 %v279_v30, %v228_v32 }
 0x115   :  { %v229_v35 = vld [vmem:[#allocation2 + $0x8] sm:$0xff] }
 0x116   :  { %v243_v36 = vadd.f32 %v286_v31, %v237_v33  ;;  %v238_v37 = vadd.f32 %v279_v30, %v229_v35 }
 0x118   :  { %v282_v38 = vpack.c.bf16 %v243_v36, %v243_v36  ;;  %v244_v39 = vadd.f32 %v287_v34, %v238_v37 }
 0x11a   :  { %254 = vst.msk [vmem:[%s461_s4] sm:$0xf] %vm253_vm1, %v282_v38  ;;  %v283_v40 = vpack.c.bf16 %v244_v39, %v244_v39 }
 0x11c   :  { %255 = vst.msk [vmem:[%s461_s4 + $0x4] sm:$0xf] %vm253_vm1, %v283_v40 }
 0x11d   :  { %260 = vsyncpa [#allocation4], 1 }

// kernel: _lambda_.39
= control target key start
LH: loop header
LB: loop body
LE: loop exit
PB: predicated region body
PF: predicated region fallthrough
CT: control target
= control target key end

     0   :  { %9 = vsyncpa [#allocation5], 0  ;;  %s266_s15 = smov [#allocation4]   ;;  %s343_s0 = inlined_call_operand.vmem [shape: bf16[16,64], index: 0, kind: input, shape index: {}]   ;;  %s344_s1 = inlined_call_operand.vmem [shape: bf16[64,16], index: 1, kind: input, shape index: {}]   ;;  %s345_s2 = inlined_call_operand.hbm [shape: f32[1,16], index: 2, kind: input, shape index: {}]   ;;  %s346_s3 = inlined_call_operand.vmem [shape: bf16[16,128], index: 3, kind: input, shape index: {}]   ;;  %s347_s4 = inlined_call_operand.vmem [shape: f32[16,16], index: 4, kind: output, shape index: {}]  }
   0x1   :  { %s20_s16 = sshll.u32 %s266_s15, 4  ;;  %s242_s19 = scalar_lea.hbm %s345_s2, 16  ;;  %s21_s16 = int_to_ptr.vmem [resolvable:$true] %s20_s16 }
   0x2   :  { %p243_p0 = scmp.ne.s32.totalorder %s345_s2, %s242_s19  ;;  %p246_p1 = scmp.lt.u32.totalorder %s242_s19, %s345_s2 }
   0x4   :  { %p248_p2 = pnand %p246_p1, %p243_p0 }
   0x6   :  { %251 = shalt.err (!%p248_p2)
}
   0x7   :  { %s252_s24 = scalar_lea.vmem %s21_s16, 16  ;;  %s256_s25 = scalar_lea.vmem %s21_s16, 32 }
   0x8   :  { %p253_p3 = scmp.ne.s32.totalorder %s21_s16, %s252_s24  ;;  %p257_p4 = scmp.lt.s32.totalorder %s21_s16, %s21_s16 }
   0x9   :  { %p258_p5 = scmp.lt.s32.totalorder %s256_s25, %s252_s24 }
   0xb   :  { %p259_p6 = por %p258_p5, %p257_p4 }
   0xd   :  { %p260_p7 = pnand %p259_p6, %p253_p3 }
   0xf   :  { %263 = shalt.err (!%p260_p7)
}
  0x10   :  { %23 = dma.hbm_to_vmem [thread:$0]  %s345_s2, 16, %s21_s16, [#allocation5]  }
  0x11   :  { %264 = dma.done.wait [#allocation5], 16  }
  0x12   :  { %265 = vsyncadd [#allocation5], 4294967280  ;;  %v206_v0 = vld [vmem:[%s343_s0] sm:$0xff]   ;;  %vm49_vm0 = vcmask 523264   ;;  %s267_s2 = smov 64   ;;  %v268_v21 = vmov 0.0  }
  0x13   :  { %v207_v1 = vunpack.c.l.bf16 %v206_v0  ;;  %v208_v2 = vunpack.c.h.bf16 %v206_v0  ;;  %v210_v5 = vld [vmem:[%s346_s3] sm:$0xff]   ;;  %218 = vmatprep.subr.bf16.mxu0 %v268_v21  ;;  %v235_v22 = vld [vmem:[%s344_s1 + $0x8] sm:$0xff]   ;;  %v236_v23 = vld [vmem:[%s344_s1 + $0x10] sm:$0xff]   ;;  %vm269_vm1 = vmmov 0   ;;  %vm34_vm2 = vcmask 130048  }
  0x14   :  { %v211_v6 = vunpack.c.l.bf16 %v210_v5  ;;  %v212_v18 = vunpack.c.h.bf16 %v210_v5  ;;  %v234_v20 = vld [vmem:[%s344_s1] sm:$0xff]   ;;  %v237_v24 = vld [vmem:[%s344_s1 + $0x18] sm:$0xff]   ;;  %226 = vmatprep.mubr.msk.bf16.mxu0 %vm269_vm1, %v268_v21  ;;  %35 = vst.msk [vmem:[#allocation2] sm:$0xff] %vm34_vm2, %v268_v21  ;;  %36 = vst.msk [vmem:[#allocation2 + $0x8] sm:$0xff] %vm34_vm2, %v268_v21 }
  0x15   :  { %v50_v3 = vsel %vm49_vm0, %v207_v1, 0.0  ;;  %v53_v4 = vsel %vm49_vm0, %v208_v2, 0.0  ;;  %219 = vmatpush3.bf16.msra.mxu0 %v234_v20  ;;  %v204_v51 = vld [vmem:[#allocation4] ss:$0 sm:$0xff] }
  0x16   :  { %51 = vadd.xlane.f32.xlu0 %v50_v3  ;;  %v77_v7 = vadd.f32 1.0, %v211_v6  ;;  %v78_v19 = vadd.f32 1.0, %v212_v18  ;;  %220 = vmatprep.subr.bf16.mxu0 %v268_v21 }
  0x19   :  { %221 = vmatpush3.bf16.msra.mxu0 %v235_v22 }
  0x1a   :  { %54 = vadd.xlane.f32.xlu0 %v53_v4  ;;  %222 = vmatprep.subr.bf16.mxu0 %v268_v21 }
  0x1b   :  { %v94_v43 = vld [vmem:[#allocation2] sm:$0xff]  ;;  %v95_v45 = vld [vmem:[#allocation2 + $0x8] sm:$0xff] }
  0x1d   :  { %223 = vmatpush3.bf16.msra.mxu0 %v236_v23 }
  0x1e   :  { %224 = vmatprep.subr.bf16.mxu0 %v268_v21 }
  0x21   :  { %225 = vmatpush3.bf16.msra.mxu0 %v237_v24 }
  0x30   :  { %81 = vrot.lane.b32.xlu0 %v77_v7, %s267_s2 }
  0xa3   :  { %v52_v8 = vpop.xlane.xlu0 %51 }
  0xa4   :  { %v57_v9 = vmul.f32 0.015625, %v52_v8 }
  0xa6   :  { %v59_v10 = vsub.f32 %v207_v1, %v57_v9 }
  0xa7   :  { %v55_v11 = vpop.xlane.xlu0 %54 }
  0xa8   :  { %v58_v12 = vmul.f32 0.015625, %v55_v11  ;;  %v61_v13 = vmul.f32 %v59_v10, %v59_v10 }
  0xaa   :  { %v60_v14 = vsub.f32 %v208_v2, %v58_v12  ;;  %v63_v15 = vsel %vm49_vm0, %v61_v13, 0.0 }
  0xab   :  { %64 = vadd.xlane.f32.xlu1 %v63_v15  ;;  %v82_v33 = vpop.permute.xlu0 %81 }
  0xac   :  { %v62_v16 = vmul.f32 %v60_v14, %v60_v14 }
  0xae   :  { %v66_v17 = vsel %vm49_vm0, %v62_v16, 0.0 }
  0xaf   :  { %67 = vadd.xlane.f32.xlu1 %v66_v17 }
  0xc0   :  { %83 = vrot.lane.b32.xlu1 %v78_v19, %s267_s2 }
 0x138   :  { %v65_v25 = vpop.xlane.xlu1 %64 }
 0x139   :  { %v69_v26 = vmul.f32 0.015625, %v65_v25 }
 0x13b   :  { %v71_v27 = vadd.f32 1e-06, %v69_v26 }
 0x13c   :  { %v68_v28 = vpop.xlane.xlu1 %67 }
 0x13d   :  { %238 = vrsqrt.f32 %v71_v27  ;;  %v70_v29 = vmul.f32 0.015625, %v68_v28 }
 0x13f   :  { %v72_v30 = vadd.f32 1e-06, %v70_v29 }
 0x140   :  { %v84_v35 = vpop.permute.xlu1 %83 }
 0x141   :  { %240 = vrsqrt.f32 %v72_v30 }
 0x147   :  { %v239_v31 = vpop.eup %238 }
 0x148   :  { %v75_v32 = vmul.f32 %v239_v31, %v59_v10 }
 0x14a   :  { %v87_v36 = vmul.f32 %v82_v33, %v75_v32 }
 0x14b   :  { %v241_v34 = vpop.eup %240 }
 0x14c   :  { %v76_v37 = vmul.f32 %v241_v34, %v60_v14  ;;  %v89_v39 = vadd.f32 %v211_v6, %v87_v36 }
 0x14e   :  { %v88_v38 = vmul.f32 %v84_v35, %v76_v37 }
 0x150   :  { %v90_v40 = vadd.f32 %v212_v18, %v88_v38 }
 0x152   :  { %v91_v41 = vpack.c.bf16 %v90_v40, %v89_v39 }
 0x154   :  { %92 = vst.msk [vmem:[#allocation3] sm:$0xff] %vm49_vm0, %v91_v41 }
 0x15b   :  { %v93_v42 = vld [vmem:[#allocation3] sm:$0xff] }
 0x15c   :  { %227 = vmatmul.mubr.msk.bf16.vlgmr.msra.gmra.mrb[0].mxu0 %vm49_vm0, %v93_v42 }
 0x22f   :  { %v166_v44 = vpop.f32.mrb[0].mxu0 }
 0x230   :  { %v173_v46 = vadd.f32 %v166_v44, %v94_v43  ;;  %v228_v47 = vpop.f32.mrb[1].mxu0 }
 0x231   :  { %v169_v48 = vpop.f32.mrb[2].mxu0 }
 0x232   :  { %176 = vst.msk [vmem:[#allocation2] sm:$0xff] %vm34_vm2, %v173_v46  ;;  %v174_v49 = vadd.f32 %v169_v48, %v95_v45  ;;  %v229_v50 = vpop.f32.mrb[3].mxu0 }
 0x234   :  { %177 = vst.msk [vmem:[#allocation2 + $0x8] sm:$0xff] %vm34_vm2, %v174_v49 }
 0x239   :  { %v181_v52 = vld [vmem:[#allocation2] sm:$0xff] }
 0x23a   :  { %v190_v53 = vadd.f32 %v204_v51, %v181_v52 }
 0x23b   :  { %v182_v54 = vld [vmem:[#allocation2 + $0x8] sm:$0xff] }
 0x23c   :  { %192 = vst.msk [vmem:[%s347_s4] sm:$0xff] %vm34_vm2, %v190_v53  ;;  %v191_v55 = vadd.f32 %v204_v51, %v182_v54 }
 0x23e   :  { %193 = vst.msk [vmem:[%s347_s4 + $0x8] sm:$0xff] %vm34_vm2, %v191_v55 }
 0x23f   :  { %198 = vsyncpa [#allocation5], 1 }

</bundles_post_ra>
